<compile_context>
chip_gen: v7x
topology: tpu7x:2x2x1
jax: 0.10.0
libtpu: 0.0.40
codegen_flags: <defaults>
</compile_context>

<pallas_src>
import jax
import jax.numpy as jnp
from jax.experimental import pallas as pl
from jax.experimental.pallas import tpu as pltpu

# ---------------- model dimensions (small, self-consistent) ----------------
B = 2        # real batch
BP = 8       # batch padded to one sublane group
S = 8        # src sequence length
T = 8        # tgt sequence length
E = 32       # emb_dim
H = 32       # src_hidden_dim == tgt_hidden_dim
V = 128      # src == tgt vocab size
N_ATTR = 2   # len(config['data']['test'])

_VMEM = pl.BlockSpec(memory_space=pltpu.MemorySpace.VMEM)
_SMEM = pl.BlockSpec(memory_space=pltpu.MemorySpace.SMEM)
_F32 = jnp.float32


# ============================ fused Pallas kernel ============================

def _fused_kernel(src_x_ref, validf_ref, enc_wih_ref, enc_whh_ref, enc_b_ref,
                  ctx_w_ref, ctx_b_ref, a_ht_ref, cbr_w_ref, cbr_b_ref,
                  hbr_w_ref, hbr_b_ref,
                  tgt_x_ref, dec_wih_ref, dec_whh_ref, dec_b_ref,
                  wa_t_ref, attn_mask_ref, wc_ref, bc_ref, wp_ref, bp_ref,
                  lm_x_ref, lm_w_ref, lm_b_ref, multp_ref,
                  comb_ref, probs_ref, states_ref,
                  pre_enc, pre_dec, enc_raw):
    bp = a_ht_ref.shape[0]
    hdim = ctx_w_ref.shape[0]
    slen = src_x_ref.shape[0] // bp
    tlen = tgt_x_ref.shape[0] // bp

    # ------------------- encoder: packed-sequence LSTM -------------------
    # hoisted input->hidden projection for ALL src timesteps (one MXU op)
    pre_enc[...] = (jnp.dot(src_x_ref[...], enc_wih_ref[...],
                            preferred_element_type=_F32) + enc_b_ref[...])
    whh_e = enc_whh_ref[...]                                   # (H, 4H)

    def enc_step(t, carry):
        h, c = carry
        r = pl.ds(pl.multiple_of(t * bp, bp), bp)
        # one fused (bp, H) @ (H, 4H) recurrent matmul; split gates afterwards
        gates = pre_enc[r, :] + jnp.dot(h, whh_e, preferred_element_type=_F32)
        ig = jax.nn.sigmoid(gates[:, 0 * hdim:1 * hdim])
        fg = jax.nn.sigmoid(gates[:, 1 * hdim:2 * hdim])
        gg = jnp.tanh(gates[:, 2 * hdim:3 * hdim])
        og = jax.nn.sigmoid(gates[:, 3 * hdim:4 * hdim])
        c_new = fg * c + ig * gg
        h_new = og * jnp.tanh(c_new)
        enc_raw[r, :] = h_new                                  # raw outputs
        # packed-sequence semantics: freeze states past srclens
        v = validf_ref[r, :]
        h = v * h_new + (1.0 - v) * h
        c = v * c_new + (1.0 - v) * c
        return h, c

    h0 = jnp.zeros((bp, hdim), _F32)
    c0 = jnp.zeros((bp, hdim), _F32)
    h_enc, c_enc = jax.lax.fori_loop(0, slen, enc_step, (h0, c0), unroll=True)

    # ctx bridge on all timesteps at once; valid mask folded into the matmul
    ctx_flat = (jnp.dot(validf_ref[...] * enc_raw[...], ctx_w_ref[...],
                        preferred_element_type=_F32) + ctx_b_ref[...])   # (S*bp, H)

    # c/h bridges: concat([state, attr_emb]) realized as split matmuls
    a = a_ht_ref[...]
    cw = cbr_w_ref[...]
    hw = hbr_w_ref[...]
    c_t = (jnp.dot(c_enc, cw[0:hdim, :], preferred_element_type=_F32)
           + jnp.dot(a, cw[hdim:, :], preferred_element_type=_F32) + cbr_b_ref[...])
    h_t = (jnp.dot(h_enc, hw[0:hdim, :], preferred_element_type=_F32)
           + jnp.dot(a, hw[hdim:, :], preferred_element_type=_F32) + hbr_b_ref[...])

    # attention keys precomputed once: keys = ctx @ Wa^T, kept transposed (H, S*bp)
    keys_t = jnp.dot(ctx_flat, wa_t_ref[...], preferred_element_type=_F32).T

    # -------------------------- decoder ---------------------------------
    pre_dec[...] = (jnp.dot(tgt_x_ref[...], dec_wih_ref[...],
                            preferred_element_type=_F32) + dec_b_ref[...])
    whh_d = dec_whh_ref[...]
    wc = wc_ref[...]
    wc_ctx = wc[0:hdim, :]
    wc_hy = wc[hdim:, :]
    bc = bc_ref[...]
    amask = attn_mask_ref[...]        # (bp, S*bp): 0 where (same batch & valid), else -1e9

    def dec_step(t, carry):
        h, c = carry
        r = pl.ds(pl.multiple_of(t * bp, bp), bp)
        gates = pre_dec[r, :] + jnp.dot(h, whh_d, preferred_element_type=_F32)
        ig = jax.nn.sigmoid(gates[:, 0 * hdim:1 * hdim])
        fg = jax.nn.sigmoid(gates[:, 1 * hdim:2 * hdim])
        gg = jnp.tanh(gates[:, 2 * hdim:3 * hdim])
        og = jax.nn.sigmoid(gates[:, 3 * hdim:4 * hdim])
        c_new = fg * c + ig * gg
        hy = og * jnp.tanh(c_new)                              # (bp, H)

        # Luong "general" attention over the flattened (s, b') axis; the
        # batch-diagonal + padding mask makes the full matmul equivalent to a
        # batched attention while staying in plain 2-D MXU ops.
        scores = jnp.dot(hy, keys_t, preferred_element_type=_F32) + amask  # (bp, S*bp)
        m = jnp.max(scores, axis=-1, keepdims=True)
        e = jnp.exp(scores - m)
        att = e / jnp.sum(e, axis=-1, keepdims=True)
        cv = jnp.dot(att, ctx_flat, preferred_element_type=_F32)           # (bp, H)

        h_tilde = jnp.tanh(jnp.dot(cv, wc_ctx, preferred_element_type=_F32)
                           + jnp.dot(hy, wc_hy, preferred_element_type=_F32) + bc)
        states_ref[r, :] = h_tilde
        # h_tilde (not hy) is fed back as the recurrent hidden, as in LSTMAttentionDot.
        return h_tilde, c_new

    jax.lax.fori_loop(0, tlen, dec_step, (h_t, c_t), unroll=True)

    # ------ hoisted output head: projection + shallow fusion + softmax ------
    multp = multp_ref[0]                                       # SMEM scalar
    lm_logit = (jnp.dot(lm_x_ref[...], lm_w_ref[...], preferred_element_type=_F32)
                + lm_b_ref[...])                               # (T*bp, V)
    logits = (jnp.dot(states_ref[...], wp_ref[...], preferred_element_type=_F32)
              + bp_ref[...] + multp * lm_logit)                # (T*bp, V)
    comb_ref[...] = logits
    mm = jnp.max(logits, axis=-1, keepdims=True)
    ee = jnp.exp(logits - mm)
    probs_ref[...] = ee / jnp.sum(ee, axis=-1, keepdims=True)  # exact softmax


def _fused_call(src_x, validf, enc_wih, enc_whh, enc_b, ctx_w, ctx_b, a_ht,
                cbr_w, cbr_b, hbr_w, hbr_b,
                tgt_x, dec_wih, dec_whh, dec_b,
                wa_t, attn_mask, wc, bc, wp, bp_, lm_x, lm_w, lm_b, multp):
    s_b = src_x.shape[0]
    t_b = tgt_x.shape[0]
    hdim = ctx_w.shape[0]
    vdim = wp.shape[1]
    return pl.pallas_call(
        _fused_kernel,
        out_shape=(jax.ShapeDtypeStruct((t_b, vdim), _F32),   # combined logits
                   jax.ShapeDtypeStruct((t_b, vdim), _F32),   # probs
                   jax.ShapeDtypeStruct((t_b, hdim), _F32)),  # decoder states
        in_specs=[_VMEM] * 25 + [_SMEM],
        out_specs=(_VMEM, _VMEM, _VMEM),
        scratch_shapes=[pltpu.VMEM((s_b, 4 * hdim), _F32),    # encoder pre-activations
                        pltpu.VMEM((t_b, 4 * hdim), _F32),    # decoder pre-activations
                        pltpu.VMEM((s_b, hdim), _F32)],       # raw encoder outputs
    )(src_x, validf, enc_wih, enc_whh, enc_b, ctx_w, ctx_b, a_ht,
      cbr_w, cbr_b, hbr_w, hbr_b,
      tgt_x, dec_wih, dec_whh, dec_b,
      wa_t, attn_mask, wc, bc, wp, bp_, lm_x, lm_w, lm_b, multp)


# ============================ parameters & forward ==========================

def init_params(key):
    ks = jax.random.split(key, 16)
    u = lambda k, shape, s=0.1: jax.random.uniform(k, shape, _F32, -s, s)
    return dict(
        src_embedding=u(ks[0], (V, E)),
        tgt_embedding=u(ks[1], (V, E)),
        attribute_embedding=u(ks[2], (N_ATTR, E)),
        enc_wih=u(ks[3], (E, 4 * H)),
        enc_whh=u(ks[4], (H, 4 * H)),
        enc_b=jnp.zeros((1, 4 * H), _F32),
        ctx_bridge_w=u(ks[5], (H, H)),
        ctx_bridge_b=u(ks[6], (H,)),
        c_bridge_w=u(ks[7], (H + E, H)),
        c_bridge_b=jnp.zeros((H,), _F32),        # init_weights(): bias = 0
        h_bridge_w=u(ks[8], (H + E, H)),
        h_bridge_b=jnp.zeros((H,), _F32),        # init_weights(): bias = 0
        dec_wih=u(ks[9], (E, 4 * H)),
        dec_whh=u(ks[10], (H, 4 * H)),
        dec_b=jnp.zeros((1, 4 * H), _F32),
        dec_wa=u(ks[11], (H, H)),
        dec_wc=u(ks[12], (2 * H, H)),
        dec_bc=jnp.zeros((H,), _F32),
        out_proj_w=u(ks[13], (H, V)),
        out_proj_b=jnp.zeros((V,), _F32),        # init_weights(): bias = 0
        multp=jnp.ones((1,), _F32),              # join='shallow', init='ones'
        lm_embedding=u(ks[14], (V, E)),
        lm_head_w=u(ks[15], (E, V)),
        lm_head_b=jnp.zeros((V,), _F32),
    )


@jax.jit
def fused_seq_model_forward(params, input_src, input_tgt, srcmask, srclens,
                            input_attr, attrlens, attrmask, tgtmask):
    del attrlens, attrmask, tgtmask  # unused: model_type='delete', LM is a stub
    bsz, slen = input_src.shape
    _, tlen = input_tgt.shape
    hdim = params['ctx_bridge_w'].shape[0]
    vdim = params['out_proj_w'].shape[1]
    bp = BP  # batch padded to one sublane group

    # ---- embedding gathers + layout glue (plain XLA, tiny) ----
    src_emb = jnp.take(params['src_embedding'], input_src, axis=0)       # (B,S,E)
    tgt_emb = jnp.take(params['tgt_embedding'], input_tgt, axis=0)       # (B,T,E)
    lm_emb = jnp.take(params['lm_embedding'], input_tgt, axis=0)         # (B,T,E)
    a_hts = jnp.take(params['attribute_embedding'], input_attr, axis=0)  # (B,A,E)
    a_ht = jnp.mean(a_hts, axis=-2) if a_hts.shape[1] > 1 else a_hts[:, 0, :]

    # pad batch to bp (zeros / all-valid masks so pad rows stay finite),
    # then time-major flatten (row index = t*bp + b)
    def tm_flat(x):  # (B, L, D) -> (L*bp, D)
        xp = jnp.pad(x, ((0, bp - bsz), (0, 0), (0, 0)))
        return jnp.transpose(xp, (1, 0, 2)).reshape(x.shape[1] * bp, x.shape[2])

    src_x = tm_flat(src_emb)
    tgt_x = tm_flat(tgt_emb)
    lm_x = tm_flat(lm_emb)
    a_ht_p = jnp.pad(a_ht, ((0, bp - bsz), (0, 0)))

    srclens_p = jnp.pad(srclens, (0, bp - bsz))                          # pad rows len 0
    validf = (jnp.arange(slen)[:, None] < srclens_p[None, :]).astype(_F32)
    validf = validf.reshape(slen * bp, 1)                                # (S*bp, 1)

    # attention mask over flattened (s, b') positions: allowed only where the
    # key batch matches the query batch AND the src position is not padding.
    srcmask_p = jnp.pad(srcmask, ((0, bp - bsz), (0, 0)))                # pad rows valid
    same_b = jnp.eye(bp, dtype=bool)                                     # (bp, bp)
    allow = (~srcmask_p)[:, :, None] & same_b[:, None, :]                # (bp, S, bp)
    attn_mask = jnp.where(allow, 0.0, -1e9).astype(_F32).reshape(bp, slen * bp)

    # ---- single fused kernel: encoder + bridges + decoder + head ----
    comb_flat, probs_flat, states_flat = _fused_call(
        src_x, validf, params['enc_wih'], params['enc_whh'], params['enc_b'],
        params['ctx_bridge_w'], params['ctx_bridge_b'].reshape(1, hdim),
        a_ht_p, params['c_bridge_w'], params['c_bridge_b'].reshape(1, hdim),
        params['h_bridge_w'], params['h_bridge_b'].reshape(1, hdim),
        tgt_x, params['dec_wih'], params['dec_whh'], params['dec_b'],
        params['dec_wa'].T, attn_mask,
        params['dec_wc'], params['dec_bc'].reshape(1, hdim),
        params['out_proj_w'], params['out_proj_b'].reshape(1, vdim),
        lm_x, params['lm_head_w'], params['lm_head_b'].reshape(1, vdim),
        params['multp'])

    def un_tm(x, length, d):  # (L*bp, D) -> (B, L, D), strip pad rows
        return jnp.transpose(x.reshape(length, bp, d), (1, 0, 2))[:bsz]

    combined = un_tm(comb_flat, tlen, vdim)
    probs = un_tm(probs_flat, tlen, vdim)
    dec_states = un_tm(states_flat, tlen, hdim)
    return combined, probs, dec_states


# ================================ demo ======================================

if __name__ == "__main__":
    key = jax.random.PRNGKey(0)
    pkey, k1, k2, k3 = jax.random.split(key, 4)
    params = init_params(pkey)

    input_src = jax.random.randint(k1, (B, S), 0, V, dtype=jnp.int32)
    input_tgt = jax.random.randint(k2, (B, T), 0, V, dtype=jnp.int32)
    srclens = jnp.array([S, S - 3], dtype=jnp.int32)
    srcmask = jnp.arange(S)[None, :] >= srclens[:, None]          # True = padding
    input_attr = jax.random.randint(k3, (B, 1), 0, N_ATTR, dtype=jnp.int32)
    attrlens = jnp.ones((B,), dtype=jnp.int32)                    # unused ('delete')
    attrmask = jnp.zeros((B, 1), dtype=jnp.bool_)                 # unused ('delete')
    tgtmask = jnp.zeros((B, T), dtype=jnp.bool_)                  # consumed by LM stub

    combined, probs, dec_states = fused_seq_model_forward(
        params, input_src, input_tgt, srcmask, srclens,
        input_attr, attrlens, attrmask, tgtmask)
    jax.block_until_ready((combined, probs, dec_states))

    assert combined.shape == (B, T, V)
    assert probs.shape == (B, T, V)
    assert dec_states.shape == (B, T, H)
    assert bool(jnp.all(jnp.isfinite(combined)))
    assert bool(jnp.all(jnp.isfinite(probs)))
    assert bool(jnp.all(jnp.isfinite(dec_states)))
    # exact softmax in the fused output head -> probs sum to 1 within f32 error
    assert bool(jnp.allclose(jnp.sum(probs, axis=-1), 1.0, atol=1e-4))
    print("KERNEL_OK")
</pallas_src>

<mosaic_0001>
module attributes {stable_mosaic.version = 11 : i64} {
  func.func @_fused_kernel(%arg0: memref<64x32xf32, #tpu.memory_space<vmem>>, %arg1: memref<64x1xf32, #tpu.memory_space<vmem>>, %arg2: memref<32x128xf32, #tpu.memory_space<vmem>>, %arg3: memref<32x128xf32, #tpu.memory_space<vmem>>, %arg4: memref<1x128xf32, #tpu.memory_space<vmem>>, %arg5: memref<32x32xf32, #tpu.memory_space<vmem>>, %arg6: memref<1x32xf32, #tpu.memory_space<vmem>>, %arg7: memref<8x32xf32, #tpu.memory_space<vmem>>, %arg8: memref<64x32xf32, #tpu.memory_space<vmem>>, %arg9: memref<1x32xf32, #tpu.memory_space<vmem>>, %arg10: memref<64x32xf32, #tpu.memory_space<vmem>>, %arg11: memref<1x32xf32, #tpu.memory_space<vmem>>, %arg12: memref<64x32xf32, #tpu.memory_space<vmem>>, %arg13: memref<32x128xf32, #tpu.memory_space<vmem>>, %arg14: memref<32x128xf32, #tpu.memory_space<vmem>>, %arg15: memref<1x128xf32, #tpu.memory_space<vmem>>, %arg16: memref<32x32xf32, #tpu.memory_space<vmem>>, %arg17: memref<8x64xf32, #tpu.memory_space<vmem>>, %arg18: memref<64x32xf32, #tpu.memory_space<vmem>>, %arg19: memref<1x32xf32, #tpu.memory_space<vmem>>, %arg20: memref<32x128xf32, #tpu.memory_space<vmem>>, %arg21: memref<1x128xf32, #tpu.memory_space<vmem>>, %arg22: memref<64x32xf32, #tpu.memory_space<vmem>>, %arg23: memref<32x128xf32, #tpu.memory_space<vmem>>, %arg24: memref<1x128xf32, #tpu.memory_space<vmem>>, %arg25: memref<1xf32, #tpu.memory_space<smem>>, %arg26: memref<64x128xf32, #tpu.memory_space<vmem>>, %arg27: memref<64x128xf32, #tpu.memory_space<vmem>>, %arg28: memref<64x32xf32, #tpu.memory_space<vmem>>, %arg29: memref<64x128xf32, #tpu.memory_space<vmem>>, %arg30: memref<64x128xf32, #tpu.memory_space<vmem>>, %arg31: memref<64x32xf32, #tpu.memory_space<vmem>>) attributes {dimension_semantics = [], scalar_prefetch = 0 : i64, scratch_operands = 3 : i64, tpu.core_type = #tpu.core_type<tc>} {
    %c0 = arith.constant 0 : index
    %c0_0 = arith.constant 0 : index
    %0 = vector.load %arg0[%c0, %c0_0] : memref<64x32xf32, #tpu.memory_space<vmem>>, vector<64x32xf32>
    %c0_1 = arith.constant 0 : index
    %c0_2 = arith.constant 0 : index
    %1 = vector.load %arg2[%c0_1, %c0_2] : memref<32x128xf32, #tpu.memory_space<vmem>>, vector<32x128xf32>
    %cst = arith.constant dense<0.000000e+00> : vector<64x128xf32>
    %2 = tpu.matmul %0, %1, %cst {dimension_numbers = #tpu.dot_dimension_numbers<[1], [0], [0], [1], [0, 0, 1, 1], [], []>} : vector<64x32xf32>, vector<32x128xf32>, vector<64x128xf32> -> vector<64x128xf32>
    %c0_3 = arith.constant 0 : index
    %c0_4 = arith.constant 0 : index
    %3 = vector.load %arg4[%c0_3, %c0_4] : memref<1x128xf32, #tpu.memory_space<vmem>>, vector<1x128xf32>
    %4 = vector.broadcast %3 : vector<1x128xf32> to vector<64x128xf32>
    %5 = arith.addf %2, %4 : vector<64x128xf32>
    %c0_5 = arith.constant 0 : index
    %c0_6 = arith.constant 0 : index
    %6 = vector.load %arg29[%c0_5, %c0_6] : memref<64x128xf32, #tpu.memory_space<vmem>>, vector<64x128xf32>
    tpu.vector_store %arg29[%c0_5, %c0_6], %5 {strides = array<i32>} : memref<64x128xf32, #tpu.memory_space<vmem>>, vector<64x128xf32>,
    %c0_7 = arith.constant 0 : index
    %c0_8 = arith.constant 0 : index
    %7 = vector.load %arg3[%c0_7, %c0_8] : memref<32x128xf32, #tpu.memory_space<vmem>>, vector<32x128xf32>
    %cst_9 = arith.constant 0.000000e+00 : f32
    %8 = vector.broadcast %cst_9 : f32 to vector<8x32xf32>
    %cst_10 = arith.constant 0.000000e+00 : f32
    %9 = vector.broadcast %cst_10 : f32 to vector<8x32xf32>
    %c0_i32 = arith.constant 0 : i32
    %c8_i32 = arith.constant 8 : i32
    %10 = arith.muli %c0_i32, %c8_i32 : i32
    %11 = tpu.assume_multiple %10, 8 : i32
    %12 = arith.index_cast %11 : i32 to index
    %c0_11 = arith.constant 0 : index
    %13 = vector.load %arg29[%12, %c0_11] : memref<64x128xf32, #tpu.memory_space<vmem>>, vector<8x128xf32>
    %cst_12 = arith.constant dense<0.000000e+00> : vector<8x128xf32>
    %14 = tpu.matmul %8, %7, %cst_12 {dimension_numbers = #tpu.dot_dimension_numbers<[1], [0], [0], [1], [0, 0, 1, 1], [], []>} : vector<8x32xf32>, vector<32x128xf32>, vector<8x128xf32> -> vector<8x128xf32>
    %15 = arith.addf %13, %14 : vector<8x128xf32>
    %16 = vector.extract_strided_slice %15 {offsets = [0, 0], sizes = [8, 32], strides = [1, 1]} : vector<8x128xf32> to vector<8x32xf32>
    %17 = arith.negf %16 : vector<8x32xf32>
    %18 = math.exp %17 : vector<8x32xf32>
    %cst_13 = arith.constant 1.000000e+00 : f32
    %19 = vector.broadcast %cst_13 : f32 to vector<8x32xf32>
    %20 = arith.addf %19, %18 : vector<8x32xf32>
    %21 = arith.divf %19, %20 : vector<8x32xf32>
    %22 = vector.extract_strided_slice %15 {offsets = [0, 32], sizes = [8, 32], strides = [1, 1]} : vector<8x128xf32> to vector<8x32xf32>
    %23 = arith.negf %22 : vector<8x32xf32>
    %24 = math.exp %23 : vector<8x32xf32>
    %cst_14 = arith.constant 1.000000e+00 : f32
    %25 = vector.broadcast %cst_14 : f32 to vector<8x32xf32>
    %26 = arith.addf %25, %24 : vector<8x32xf32>
    %27 = arith.divf %25, %26 : vector<8x32xf32>
    %28 = vector.extract_strided_slice %15 {offsets = [0, 64], sizes = [8, 32], strides = [1, 1]} : vector<8x128xf32> to vector<8x32xf32>
    %29 = math.tanh %28 : vector<8x32xf32>
    %30 = vector.extract_strided_slice %15 {offsets = [0, 96], sizes = [8, 32], strides = [1, 1]} : vector<8x128xf32> to vector<8x32xf32>
    %31 = arith.negf %30 : vector<8x32xf32>
    %32 = math.exp %31 : vector<8x32xf32>
    %cst_15 = arith.constant 1.000000e+00 : f32
    %33 = vector.broadcast %cst_15 : f32 to vector<8x32xf32>
    %34 = arith.addf %33, %32 : vector<8x32xf32>
    %35 = arith.divf %33, %34 : vector<8x32xf32>
    %36 = arith.mulf %27, %9 : vector<8x32xf32>
    %37 = arith.mulf %21, %29 : vector<8x32xf32>
    %38 = arith.addf %36, %37 : vector<8x32xf32>
    %39 = math.tanh %38 : vector<8x32xf32>
    %40 = arith.mulf %35, %39 : vector<8x32xf32>
    %41 = arith.index_cast %11 : i32 to index
    %c0_16 = arith.constant 0 : index
    %42 = vector.load %arg31[%41, %c0_16] : memref<64x32xf32, #tpu.memory_space<vmem>>, vector<8x32xf32>
    tpu.vector_store %arg31[%41, %c0_16], %40 {strides = array<i32>} : memref<64x32xf32, #tpu.memory_space<vmem>>, vector<8x32xf32>,
    %43 = arith.index_cast %11 : i32 to index
    %c0_17 = arith.constant 0 : index
    %44 = vector.load %arg1[%43, %c0_17] : memref<64x1xf32, #tpu.memory_space<vmem>>, vector<8x1xf32>
    %45 = vector.broadcast %44 : vector<8x1xf32> to vector<8x32xf32>
    %46 = arith.mulf %45, %40 : vector<8x32xf32>
    %cst_18 = arith.constant 1.000000e+00 : f32
    %47 = vector.broadcast %cst_18 : f32 to vector<8x1xf32>
    %48 = arith.subf %47, %44 : vector<8x1xf32>
    %49 = vector.broadcast %48 : vector<8x1xf32> to vector<8x32xf32>
    %50 = arith.mulf %49, %8 : vector<8x32xf32>
    %51 = arith.addf %46, %50 : vector<8x32xf32>
    %52 = vector.broadcast %44 : vector<8x1xf32> to vector<8x32xf32>
    %53 = arith.mulf %52, %38 : vector<8x32xf32>
    %cst_19 = arith.constant 1.000000e+00 : f32
    %54 = vector.broadcast %cst_19 : f32 to vector<8x1xf32>
    %55 = arith.subf %54, %44 : vector<8x1xf32>
    %56 = vector.broadcast %55 : vector<8x1xf32> to vector<8x32xf32>
    %57 = arith.mulf %56, %9 : vector<8x32xf32>
    %58 = arith.addf %53, %57 : vector<8x32xf32>
    %c1_i32 = arith.constant 1 : i32
    %c8_i32_20 = arith.constant 8 : i32
    %59 = arith.muli %c1_i32, %c8_i32_20 : i32
    %60 = tpu.assume_multiple %59, 8 : i32
    %61 = arith.index_cast %60 : i32 to index
    %c0_21 = arith.constant 0 : index
    %62 = vector.load %arg29[%61, %c0_21] : memref<64x128xf32, #tpu.memory_space<vmem>>, vector<8x128xf32>
    %cst_22 = arith.constant dense<0.000000e+00> : vector<8x128xf32>
    %63 = tpu.matmul %51, %7, %cst_22 {dimension_numbers = #tpu.dot_dimension_numbers<[1], [0], [0], [1], [0, 0, 1, 1], [], []>} : vector<8x32xf32>, vector<32x128xf32>, vector<8x128xf32> -> vector<8x128xf32>
    %64 = arith.addf %62, %63 : vector<8x128xf32>
    %65 = vector.extract_strided_slice %64 {offsets = [0, 0], sizes = [8, 32], strides = [1, 1]} : vector<8x128xf32> to vector<8x32xf32>
    %66 = arith.negf %65 : vector<8x32xf32>
    %67 = math.exp %66 : vector<8x32xf32>
    %cst_23 = arith.constant 1.000000e+00 : f32
    %68 = vector.broadcast %cst_23 : f32 to vector<8x32xf32>
    %69 = arith.addf %68, %67 : vector<8x32xf32>
    %70 = arith.divf %68, %69 : vector<8x32xf32>
    %71 = vector.extract_strided_slice %64 {offsets = [0, 32], sizes = [8, 32], strides = [1, 1]} : vector<8x128xf32> to vector<8x32xf32>
    %72 = arith.negf %71 : vector<8x32xf32>
    %73 = math.exp %72 : vector<8x32xf32>
    %cst_24 = arith.constant 1.000000e+00 : f32
    %74 = vector.broadcast %cst_24 : f32 to vector<8x32xf32>
    %75 = arith.addf %74, %73 : vector<8x32xf32>
    %76 = arith.divf %74, %75 : vector<8x32xf32>
    %77 = vector.extract_strided_slice %64 {offsets = [0, 64], sizes = [8, 32], strides = [1, 1]} : vector<8x128xf32> to vector<8x32xf32>
    %78 = math.tanh %77 : vector<8x32xf32>
    %79 = vector.extract_strided_slice %64 {offsets = [0, 96], sizes = [8, 32], strides = [1, 1]} : vector<8x128xf32> to vector<8x32xf32>
    %80 = arith.negf %79 : vector<8x32xf32>
    %81 = math.exp %80 : vector<8x32xf32>
    %cst_25 = arith.constant 1.000000e+00 : f32
    %82 = vector.broadcast %cst_25 : f32 to vector<8x32xf32>
    %83 = arith.addf %82, %81 : vector<8x32xf32>
    %84 = arith.divf %82, %83 : vector<8x32xf32>
    %85 = arith.mulf %76, %58 : vector<8x32xf32>
    %86 = arith.mulf %70, %78 : vector<8x32xf32>
    %87 = arith.addf %85, %86 : vector<8x32xf32>
    %88 = math.tanh %87 : vector<8x32xf32>
    %89 = arith.mulf %84, %88 : vector<8x32xf32>
    %90 = arith.index_cast %60 : i32 to index
    %c0_26 = arith.constant 0 : index
    %91 = vector.load %arg31[%90, %c0_26] : memref<64x32xf32, #tpu.memory_space<vmem>>, vector<8x32xf32>
    tpu.vector_store %arg31[%90, %c0_26], %89 {strides = array<i32>} : memref<64x32xf32, #tpu.memory_space<vmem>>, vector<8x32xf32>,
    %92 = arith.index_cast %60 : i32 to index
    %c0_27 = arith.constant 0 : index
    %93 = vector.load %arg1[%92, %c0_27] : memref<64x1xf32, #tpu.memory_space<vmem>>, vector<8x1xf32>
    %94 = vector.broadcast %93 : vector<8x1xf32> to vector<8x32xf32>
    %95 = arith.mulf %94, %89 : vector<8x32xf32>
    %cst_28 = arith.constant 1.000000e+00 : f32
    %96 = vector.broadcast %cst_28 : f32 to vector<8x1xf32>
    %97 = arith.subf %96, %93 : vector<8x1xf32>
    %98 = vector.broadcast %97 : vector<8x1xf32> to vector<8x32xf32>
    %99 = arith.mulf %98, %51 : vector<8x32xf32>
    %100 = arith.addf %95, %99 : vector<8x32xf32>
    %101 = vector.broadcast %93 : vector<8x1xf32> to vector<8x32xf32>
    %102 = arith.mulf %101, %87 : vector<8x32xf32>
    %cst_29 = arith.constant 1.000000e+00 : f32
    %103 = vector.broadcast %cst_29 : f32 to vector<8x1xf32>
    %104 = arith.subf %103, %93 : vector<8x1xf32>
    %105 = vector.broadcast %104 : vector<8x1xf32> to vector<8x32xf32>
    %106 = arith.mulf %105, %58 : vector<8x32xf32>
    %107 = arith.addf %102, %106 : vector<8x32xf32>
    %c2_i32 = arith.constant 2 : i32
    %c8_i32_30 = arith.constant 8 : i32
    %108 = arith.muli %c2_i32, %c8_i32_30 : i32
    %109 = tpu.assume_multiple %108, 8 : i32
    %110 = arith.index_cast %109 : i32 to index
    %c0_31 = arith.constant 0 : index
    %111 = vector.load %arg29[%110, %c0_31] : memref<64x128xf32, #tpu.memory_space<vmem>>, vector<8x128xf32>
    %cst_32 = arith.constant dense<0.000000e+00> : vector<8x128xf32>
    %112 = tpu.matmul %100, %7, %cst_32 {dimension_numbers = #tpu.dot_dimension_numbers<[1], [0], [0], [1], [0, 0, 1, 1], [], []>} : vector<8x32xf32>, vector<32x128xf32>, vector<8x128xf32> -> vector<8x128xf32>
    %113 = arith.addf %111, %112 : vector<8x128xf32>
    %114 = vector.extract_strided_slice %113 {offsets = [0, 0], sizes = [8, 32], strides = [1, 1]} : vector<8x128xf32> to vector<8x32xf32>
    %115 = arith.negf %114 : vector<8x32xf32>
    %116 = math.exp %115 : vector<8x32xf32>
    %cst_33 = arith.constant 1.000000e+00 : f32
    %117 = vector.broadcast %cst_33 : f32 to vector<8x32xf32>
    %118 = arith.addf %117, %116 : vector<8x32xf32>
    %119 = arith.divf %117, %118 : vector<8x32xf32>
    %120 = vector.extract_strided_slice %113 {offsets = [0, 32], sizes = [8, 32], strides = [1, 1]} : vector<8x128xf32> to vector<8x32xf32>
    %121 = arith.negf %120 : vector<8x32xf32>
    %122 = math.exp %121 : vector<8x32xf32>
    %cst_34 = arith.constant 1.000000e+00 : f32
    %123 = vector.broadcast %cst_34 : f32 to vector<8x32xf32>
    %124 = arith.addf %123, %122 : vector<8x32xf32>
    %125 = arith.divf %123, %124 : vector<8x32xf32>
    %126 = vector.extract_strided_slice %113 {offsets = [0, 64], sizes = [8, 32], strides = [1, 1]} : vector<8x128xf32> to vector<8x32xf32>
    %127 = math.tanh %126 : vector<8x32xf32>
    %128 = vector.extract_strided_slice %113 {offsets = [0, 96], sizes = [8, 32], strides = [1, 1]} : vector<8x128xf32> to vector<8x32xf32>
    %129 = arith.negf %128 : vector<8x32xf32>
    %130 = math.exp %129 : vector<8x32xf32>
    %cst_35 = arith.constant 1.000000e+00 : f32
    %131 = vector.broadcast %cst_35 : f32 to vector<8x32xf32>
    %132 = arith.addf %131, %130 : vector<8x32xf32>
    %133 = arith.divf %131, %132 : vector<8x32xf32>
    %134 = arith.mulf %125, %107 : vector<8x32xf32>
    %135 = arith.mulf %119, %127 : vector<8x32xf32>
    %136 = arith.addf %134, %135 : vector<8x32xf32>
    %137 = math.tanh %136 : vector<8x32xf32>
    %138 = arith.mulf %133, %137 : vector<8x32xf32>
    %139 = arith.index_cast %109 : i32 to index
    %c0_36 = arith.constant 0 : index
    %140 = vector.load %arg31[%139, %c0_36] : memref<64x32xf32, #tpu.memory_space<vmem>>, vector<8x32xf32>
    tpu.vector_store %arg31[%139, %c0_36], %138 {strides = array<i32>} : memref<64x32xf32, #tpu.memory_space<vmem>>, vector<8x32xf32>,
    %141 = arith.index_cast %109 : i32 to index
    %c0_37 = arith.constant 0 : index
    %142 = vector.load %arg1[%141, %c0_37] : memref<64x1xf32, #tpu.memory_space<vmem>>, vector<8x1xf32>
    %143 = vector.broadcast %142 : vector<8x1xf32> to vector<8x32xf32>
    %144 = arith.mulf %143, %138 : vector<8x32xf32>
    %cst_38 = arith.constant 1.000000e+00 : f32
    %145 = vector.broadcast %cst_38 : f32 to vector<8x1xf32>
    %146 = arith.subf %145, %142 : vector<8x1xf32>
    %147 = vector.broadcast %146 : vector<8x1xf32> to vector<8x32xf32>
    %148 = arith.mulf %147, %100 : vector<8x32xf32>
    %149 = arith.addf %144, %148 : vector<8x32xf32>
    %150 = vector.broadcast %142 : vector<8x1xf32> to vector<8x32xf32>
    %151 = arith.mulf %150, %136 : vector<8x32xf32>
    %cst_39 = arith.constant 1.000000e+00 : f32
    %152 = vector.broadcast %cst_39 : f32 to vector<8x1xf32>
    %153 = arith.subf %152, %142 : vector<8x1xf32>
    %154 = vector.broadcast %153 : vector<8x1xf32> to vector<8x32xf32>
    %155 = arith.mulf %154, %107 : vector<8x32xf32>
    %156 = arith.addf %151, %155 : vector<8x32xf32>
    %c3_i32 = arith.constant 3 : i32
    %c8_i32_40 = arith.constant 8 : i32
    %157 = arith.muli %c3_i32, %c8_i32_40 : i32
    %158 = tpu.assume_multiple %157, 8 : i32
    %159 = arith.index_cast %158 : i32 to index
    %c0_41 = arith.constant 0 : index
    %160 = vector.load %arg29[%159, %c0_41] : memref<64x128xf32, #tpu.memory_space<vmem>>, vector<8x128xf32>
    %cst_42 = arith.constant dense<0.000000e+00> : vector<8x128xf32>
    %161 = tpu.matmul %149, %7, %cst_42 {dimension_numbers = #tpu.dot_dimension_numbers<[1], [0], [0], [1], [0, 0, 1, 1], [], []>} : vector<8x32xf32>, vector<32x128xf32>, vector<8x128xf32> -> vector<8x128xf32>
    %162 = arith.addf %160, %161 : vector<8x128xf32>
    %163 = vector.extract_strided_slice %162 {offsets = [0, 0], sizes = [8, 32], strides = [1, 1]} : vector<8x128xf32> to vector<8x32xf32>
    %164 = arith.negf %163 : vector<8x32xf32>
    %165 = math.exp %164 : vector<8x32xf32>
    %cst_43 = arith.constant 1.000000e+00 : f32
    %166 = vector.broadcast %cst_43 : f32 to vector<8x32xf32>
    %167 = arith.addf %166, %165 : vector<8x32xf32>
    %168 = arith.divf %166, %167 : vector<8x32xf32>
    %169 = vector.extract_strided_slice %162 {offsets = [0, 32], sizes = [8, 32], strides = [1, 1]} : vector<8x128xf32> to vector<8x32xf32>
    %170 = arith.negf %169 : vector<8x32xf32>
    %171 = math.exp %170 : vector<8x32xf32>
    %cst_44 = arith.constant 1.000000e+00 : f32
    %172 = vector.broadcast %cst_44 : f32 to vector<8x32xf32>
    %173 = arith.addf %172, %171 : vector<8x32xf32>
    %174 = arith.divf %172, %173 : vector<8x32xf32>
    %175 = vector.extract_strided_slice %162 {offsets = [0, 64], sizes = [8, 32], strides = [1, 1]} : vector<8x128xf32> to vector<8x32xf32>
    %176 = math.tanh %175 : vector<8x32xf32>
    %177 = vector.extract_strided_slice %162 {offsets = [0, 96], sizes = [8, 32], strides = [1, 1]} : vector<8x128xf32> to vector<8x32xf32>
    %178 = arith.negf %177 : vector<8x32xf32>
    %179 = math.exp %178 : vector<8x32xf32>
    %cst_45 = arith.constant 1.000000e+00 : f32
    %180 = vector.broadcast %cst_45 : f32 to vector<8x32xf32>
    %181 = arith.addf %180, %179 : vector<8x32xf32>
    %182 = arith.divf %180, %181 : vector<8x32xf32>
    %183 = arith.mulf %174, %156 : vector<8x32xf32>
    %184 = arith.mulf %168, %176 : vector<8x32xf32>
    %185 = arith.addf %183, %184 : vector<8x32xf32>
    %186 = math.tanh %185 : vector<8x32xf32>
    %187 = arith.mulf %182, %186 : vector<8x32xf32>
    %188 = arith.index_cast %158 : i32 to index
    %c0_46 = arith.constant 0 : index
    %189 = vector.load %arg31[%188, %c0_46] : memref<64x32xf32, #tpu.memory_space<vmem>>, vector<8x32xf32>
    tpu.vector_store %arg31[%188, %c0_46], %187 {strides = array<i32>} : memref<64x32xf32, #tpu.memory_space<vmem>>, vector<8x32xf32>,
    %190 = arith.index_cast %158 : i32 to index
    %c0_47 = arith.constant 0 : index
    %191 = vector.load %arg1[%190, %c0_47] : memref<64x1xf32, #tpu.memory_space<vmem>>, vector<8x1xf32>
    %192 = vector.broadcast %191 : vector<8x1xf32> to vector<8x32xf32>
    %193 = arith.mulf %192, %187 : vector<8x32xf32>
    %cst_48 = arith.constant 1.000000e+00 : f32
    %194 = vector.broadcast %cst_48 : f32 to vector<8x1xf32>
    %195 = arith.subf %194, %191 : vector<8x1xf32>
    %196 = vector.broadcast %195 : vector<8x1xf32> to vector<8x32xf32>
    %197 = arith.mulf %196, %149 : vector<8x32xf32>
    %198 = arith.addf %193, %197 : vector<8x32xf32>
    %199 = vector.broadcast %191 : vector<8x1xf32> to vector<8x32xf32>
    %200 = arith.mulf %199, %185 : vector<8x32xf32>
    %cst_49 = arith.constant 1.000000e+00 : f32
    %201 = vector.broadcast %cst_49 : f32 to vector<8x1xf32>
    %202 = arith.subf %201, %191 : vector<8x1xf32>
    %203 = vector.broadcast %202 : vector<8x1xf32> to vector<8x32xf32>
    %204 = arith.mulf %203, %156 : vector<8x32xf32>
    %205 = arith.addf %200, %204 : vector<8x32xf32>
    %c4_i32 = arith.constant 4 : i32
    %c8_i32_50 = arith.constant 8 : i32
    %206 = arith.muli %c4_i32, %c8_i32_50 : i32
    %207 = tpu.assume_multiple %206, 8 : i32
    %208 = arith.index_cast %207 : i32 to index
    %c0_51 = arith.constant 0 : index
    %209 = vector.load %arg29[%208, %c0_51] : memref<64x128xf32, #tpu.memory_space<vmem>>, vector<8x128xf32>
    %cst_52 = arith.constant dense<0.000000e+00> : vector<8x128xf32>
    %210 = tpu.matmul %198, %7, %cst_52 {dimension_numbers = #tpu.dot_dimension_numbers<[1], [0], [0], [1], [0, 0, 1, 1], [], []>} : vector<8x32xf32>, vector<32x128xf32>, vector<8x128xf32> -> vector<8x128xf32>
    %211 = arith.addf %209, %210 : vector<8x128xf32>
    %212 = vector.extract_strided_slice %211 {offsets = [0, 0], sizes = [8, 32], strides = [1, 1]} : vector<8x128xf32> to vector<8x32xf32>
    %213 = arith.negf %212 : vector<8x32xf32>
    %214 = math.exp %213 : vector<8x32xf32>
    %cst_53 = arith.constant 1.000000e+00 : f32
    %215 = vector.broadcast %cst_53 : f32 to vector<8x32xf32>
    %216 = arith.addf %215, %214 : vector<8x32xf32>
    %217 = arith.divf %215, %216 : vector<8x32xf32>
    %218 = vector.extract_strided_slice %211 {offsets = [0, 32], sizes = [8, 32], strides = [1, 1]} : vector<8x128xf32> to vector<8x32xf32>
    %219 = arith.negf %218 : vector<8x32xf32>
    %220 = math.exp %219 : vector<8x32xf32>
    %cst_54 = arith.constant 1.000000e+00 : f32
    %221 = vector.broadcast %cst_54 : f32 to vector<8x32xf32>
    %222 = arith.addf %221, %220 : vector<8x32xf32>
    %223 = arith.divf %221, %222 : vector<8x32xf32>
    %224 = vector.extract_strided_slice %211 {offsets = [0, 64], sizes = [8, 32], strides = [1, 1]} : vector<8x128xf32> to vector<8x32xf32>
    %225 = math.tanh %224 : vector<8x32xf32>
    %226 = vector.extract_strided_slice %211 {offsets = [0, 96], sizes = [8, 32], strides = [1, 1]} : vector<8x128xf32> to vector<8x32xf32>
    %227 = arith.negf %226 : vector<8x32xf32>
    %228 = math.exp %227 : vector<8x32xf32>
    %cst_55 = arith.constant 1.000000e+00 : f32
    %229 = vector.broadcast %cst_55 : f32 to vector<8x32xf32>
    %230 = arith.addf %229, %228 : vector<8x32xf32>
    %231 = arith.divf %229, %230 : vector<8x32xf32>
    %232 = arith.mulf %223, %205 : vector<8x32xf32>
    %233 = arith.mulf %217, %225 : vector<8x32xf32>
    %234 = arith.addf %232, %233 : vector<8x32xf32>
    %235 = math.tanh %234 : vector<8x32xf32>
    %236 = arith.mulf %231, %235 : vector<8x32xf32>
    %237 = arith.index_cast %207 : i32 to index
    %c0_56 = arith.constant 0 : index
    %238 = vector.load %arg31[%237, %c0_56] : memref<64x32xf32, #tpu.memory_space<vmem>>, vector<8x32xf32>
    tpu.vector_store %arg31[%237, %c0_56], %236 {strides = array<i32>} : memref<64x32xf32, #tpu.memory_space<vmem>>, vector<8x32xf32>,
    %239 = arith.index_cast %207 : i32 to index
    %c0_57 = arith.constant 0 : index
    %240 = vector.load %arg1[%239, %c0_57] : memref<64x1xf32, #tpu.memory_space<vmem>>, vector<8x1xf32>
    %241 = vector.broadcast %240 : vector<8x1xf32> to vector<8x32xf32>
    %242 = arith.mulf %241, %236 : vector<8x32xf32>
    %cst_58 = arith.constant 1.000000e+00 : f32
    %243 = vector.broadcast %cst_58 : f32 to vector<8x1xf32>
    %244 = arith.subf %243, %240 : vector<8x1xf32>
    %245 = vector.broadcast %244 : vector<8x1xf32> to vector<8x32xf32>
    %246 = arith.mulf %245, %198 : vector<8x32xf32>
    %247 = arith.addf %242, %246 : vector<8x32xf32>
    %248 = vector.broadcast %240 : vector<8x1xf32> to vector<8x32xf32>
    %249 = arith.mulf %248, %234 : vector<8x32xf32>
    %cst_59 = arith.constant 1.000000e+00 : f32
    %250 = vector.broadcast %cst_59 : f32 to vector<8x1xf32>
    %251 = arith.subf %250, %240 : vector<8x1xf32>
    %252 = vector.broadcast %251 : vector<8x1xf32> to vector<8x32xf32>
    %253 = arith.mulf %252, %205 : vector<8x32xf32>
    %254 = arith.addf %249, %253 : vector<8x32xf32>
    %c5_i32 = arith.constant 5 : i32
    %c8_i32_60 = arith.constant 8 : i32
    %255 = arith.muli %c5_i32, %c8_i32_60 : i32
    %256 = tpu.assume_multiple %255, 8 : i32
    %257 = arith.index_cast %256 : i32 to index
    %c0_61 = arith.constant 0 : index
    %258 = vector.load %arg29[%257, %c0_61] : memref<64x128xf32, #tpu.memory_space<vmem>>, vector<8x128xf32>
    %cst_62 = arith.constant dense<0.000000e+00> : vector<8x128xf32>
    %259 = tpu.matmul %247, %7, %cst_62 {dimension_numbers = #tpu.dot_dimension_numbers<[1], [0], [0], [1], [0, 0, 1, 1], [], []>} : vector<8x32xf32>, vector<32x128xf32>, vector<8x128xf32> -> vector<8x128xf32>
    %260 = arith.addf %258, %259 : vector<8x128xf32>
    %261 = vector.extract_strided_slice %260 {offsets = [0, 0], sizes = [8, 32], strides = [1, 1]} : vector<8x128xf32> to vector<8x32xf32>
    %262 = arith.negf %261 : vector<8x32xf32>
    %263 = math.exp %262 : vector<8x32xf32>
    %cst_63 = arith.constant 1.000000e+00 : f32
    %264 = vector.broadcast %cst_63 : f32 to vector<8x32xf32>
    %265 = arith.addf %264, %263 : vector<8x32xf32>
    %266 = arith.divf %264, %265 : vector<8x32xf32>
    %267 = vector.extract_strided_slice %260 {offsets = [0, 32], sizes = [8, 32], strides = [1, 1]} : vector<8x128xf32> to vector<8x32xf32>
    %268 = arith.negf %267 : vector<8x32xf32>
    %269 = math.exp %268 : vector<8x32xf32>
    %cst_64 = arith.constant 1.000000e+00 : f32
    %270 = vector.broadcast %cst_64 : f32 to vector<8x32xf32>
    %271 = arith.addf %270, %269 : vector<8x32xf32>
    %272 = arith.divf %270, %271 : vector<8x32xf32>
    %273 = vector.extract_strided_slice %260 {offsets = [0, 64], sizes = [8, 32], strides = [1, 1]} : vector<8x128xf32> to vector<8x32xf32>
    %274 = math.tanh %273 : vector<8x32xf32>
    %275 = vector.extract_strided_slice %260 {offsets = [0, 96], sizes = [8, 32], strides = [1, 1]} : vector<8x128xf32> to vector<8x32xf32>
    %276 = arith.negf %275 : vector<8x32xf32>
    %277 = math.exp %276 : vector<8x32xf32>
    %cst_65 = arith.constant 1.000000e+00 : f32
    %278 = vector.broadcast %cst_65 : f32 to vector<8x32xf32>
    %279 = arith.addf %278, %277 : vector<8x32xf32>
    %280 = arith.divf %278, %279 : vector<8x32xf32>
    %281 = arith.mulf %272, %254 : vector<8x32xf32>
    %282 = arith.mulf %266, %274 : vector<8x32xf32>
    %283 = arith.addf %281, %282 : vector<8x32xf32>
    %284 = math.tanh %283 : vector<8x32xf32>
    %285 = arith.mulf %280, %284 : vector<8x32xf32>
    %286 = arith.index_cast %256 : i32 to index
    %c0_66 = arith.constant 0 : index
    %287 = vector.load %arg31[%286, %c0_66] : memref<64x32xf32, #tpu.memory_space<vmem>>, vector<8x32xf32>
    tpu.vector_store %arg31[%286, %c0_66], %285 {strides = array<i32>} : memref<64x32xf32, #tpu.memory_space<vmem>>, vector<8x32xf32>,
    %288 = arith.index_cast %256 : i32 to index
    %c0_67 = arith.constant 0 : index
    %289 = vector.load %arg1[%288, %c0_67] : memref<64x1xf32, #tpu.memory_space<vmem>>, vector<8x1xf32>
    %290 = vector.broadcast %289 : vector<8x1xf32> to vector<8x32xf32>
    %291 = arith.mulf %290, %285 : vector<8x32xf32>
    %cst_68 = arith.constant 1.000000e+00 : f32
    %292 = vector.broadcast %cst_68 : f32 to vector<8x1xf32>
    %293 = arith.subf %292, %289 : vector<8x1xf32>
    %294 = vector.broadcast %293 : vector<8x1xf32> to vector<8x32xf32>
    %295 = arith.mulf %294, %247 : vector<8x32xf32>
    %296 = arith.addf %291, %295 : vector<8x32xf32>
    %297 = vector.broadcast %289 : vector<8x1xf32> to vector<8x32xf32>
    %298 = arith.mulf %297, %283 : vector<8x32xf32>
    %cst_69 = arith.constant 1.000000e+00 : f32
    %299 = vector.broadcast %cst_69 : f32 to vector<8x1xf32>
    %300 = arith.subf %299, %289 : vector<8x1xf32>
    %301 = vector.broadcast %300 : vector<8x1xf32> to vector<8x32xf32>
    %302 = arith.mulf %301, %254 : vector<8x32xf32>
    %303 = arith.addf %298, %302 : vector<8x32xf32>
    %c6_i32 = arith.constant 6 : i32
    %c8_i32_70 = arith.constant 8 : i32
    %304 = arith.muli %c6_i32, %c8_i32_70 : i32
    %305 = tpu.assume_multiple %304, 8 : i32
    %306 = arith.index_cast %305 : i32 to index
    %c0_71 = arith.constant 0 : index
    %307 = vector.load %arg29[%306, %c0_71] : memref<64x128xf32, #tpu.memory_space<vmem>>, vector<8x128xf32>
    %cst_72 = arith.constant dense<0.000000e+00> : vector<8x128xf32>
    %308 = tpu.matmul %296, %7, %cst_72 {dimension_numbers = #tpu.dot_dimension_numbers<[1], [0], [0], [1], [0, 0, 1, 1], [], []>} : vector<8x32xf32>, vector<32x128xf32>, vector<8x128xf32> -> vector<8x128xf32>
    %309 = arith.addf %307, %308 : vector<8x128xf32>
    %310 = vector.extract_strided_slice %309 {offsets = [0, 0], sizes = [8, 32], strides = [1, 1]} : vector<8x128xf32> to vector<8x32xf32>
    %311 = arith.negf %310 : vector<8x32xf32>
    %312 = math.exp %311 : vector<8x32xf32>
    %cst_73 = arith.constant 1.000000e+00 : f32
    %313 = vector.broadcast %cst_73 : f32 to vector<8x32xf32>
    %314 = arith.addf %313, %312 : vector<8x32xf32>
    %315 = arith.divf %313, %314 : vector<8x32xf32>
    %316 = vector.extract_strided_slice %309 {offsets = [0, 32], sizes = [8, 32], strides = [1, 1]} : vector<8x128xf32> to vector<8x32xf32>
    %317 = arith.negf %316 : vector<8x32xf32>
    %318 = math.exp %317 : vector<8x32xf32>
    %cst_74 = arith.constant 1.000000e+00 : f32
    %319 = vector.broadcast %cst_74 : f32 to vector<8x32xf32>
    %320 = arith.addf %319, %318 : vector<8x32xf32>
    %321 = arith.divf %319, %320 : vector<8x32xf32>
    %322 = vector.extract_strided_slice %309 {offsets = [0, 64], sizes = [8, 32], strides = [1, 1]} : vector<8x128xf32> to vector<8x32xf32>
    %323 = math.tanh %322 : vector<8x32xf32>
    %324 = vector.extract_strided_slice %309 {offsets = [0, 96], sizes = [8, 32], strides = [1, 1]} : vector<8x128xf32> to vector<8x32xf32>
    %325 = arith.negf %324 : vector<8x32xf32>
    %326 = math.exp %325 : vector<8x32xf32>
    %cst_75 = arith.constant 1.000000e+00 : f32
    %327 = vector.broadcast %cst_75 : f32 to vector<8x32xf32>
    %328 = arith.addf %327, %326 : vector<8x32xf32>
    %329 = arith.divf %327, %328 : vector<8x32xf32>
    %330 = arith.mulf %321, %303 : vector<8x32xf32>
    %331 = arith.mulf %315, %323 : vector<8x32xf32>
    %332 = arith.addf %330, %331 : vector<8x32xf32>
    %333 = math.tanh %332 : vector<8x32xf32>
    %334 = arith.mulf %329, %333 : vector<8x32xf32>
    %335 = arith.index_cast %305 : i32 to index
    %c0_76 = arith.constant 0 : index
    %336 = vector.load %arg31[%335, %c0_76] : memref<64x32xf32, #tpu.memory_space<vmem>>, vector<8x32xf32>
    tpu.vector_store %arg31[%335, %c0_76], %334 {strides = array<i32>} : memref<64x32xf32, #tpu.memory_space<vmem>>, vector<8x32xf32>,
    %337 = arith.index_cast %305 : i32 to index
    %c0_77 = arith.constant 0 : index
    %338 = vector.load %arg1[%337, %c0_77] : memref<64x1xf32, #tpu.memory_space<vmem>>, vector<8x1xf32>
    %339 = vector.broadcast %338 : vector<8x1xf32> to vector<8x32xf32>
    %340 = arith.mulf %339, %334 : vector<8x32xf32>
    %cst_78 = arith.constant 1.000000e+00 : f32
    %341 = vector.broadcast %cst_78 : f32 to vector<8x1xf32>
    %342 = arith.subf %341, %338 : vector<8x1xf32>
    %343 = vector.broadcast %342 : vector<8x1xf32> to vector<8x32xf32>
    %344 = arith.mulf %343, %296 : vector<8x32xf32>
    %345 = arith.addf %340, %344 : vector<8x32xf32>
    %346 = vector.broadcast %338 : vector<8x1xf32> to vector<8x32xf32>
    %347 = arith.mulf %346, %332 : vector<8x32xf32>
    %cst_79 = arith.constant 1.000000e+00 : f32
    %348 = vector.broadcast %cst_79 : f32 to vector<8x1xf32>
    %349 = arith.subf %348, %338 : vector<8x1xf32>
    %350 = vector.broadcast %349 : vector<8x1xf32> to vector<8x32xf32>
    %351 = arith.mulf %350, %303 : vector<8x32xf32>
    %352 = arith.addf %347, %351 : vector<8x32xf32>
    %c7_i32 = arith.constant 7 : i32
    %c8_i32_80 = arith.constant 8 : i32
    %353 = arith.muli %c7_i32, %c8_i32_80 : i32
    %354 = tpu.assume_multiple %353, 8 : i32
    %355 = arith.index_cast %354 : i32 to index
    %c0_81 = arith.constant 0 : index
    %356 = vector.load %arg29[%355, %c0_81] : memref<64x128xf32, #tpu.memory_space<vmem>>, vector<8x128xf32>
    %cst_82 = arith.constant dense<0.000000e+00> : vector<8x128xf32>
    %357 = tpu.matmul %345, %7, %cst_82 {dimension_numbers = #tpu.dot_dimension_numbers<[1], [0], [0], [1], [0, 0, 1, 1], [], []>} : vector<8x32xf32>, vector<32x128xf32>, vector<8x128xf32> -> vector<8x128xf32>
    %358 = arith.addf %356, %357 : vector<8x128xf32>
    %359 = vector.extract_strided_slice %358 {offsets = [0, 0], sizes = [8, 32], strides = [1, 1]} : vector<8x128xf32> to vector<8x32xf32>
    %360 = arith.negf %359 : vector<8x32xf32>
    %361 = math.exp %360 : vector<8x32xf32>
    %cst_83 = arith.constant 1.000000e+00 : f32
    %362 = vector.broadcast %cst_83 : f32 to vector<8x32xf32>
    %363 = arith.addf %362, %361 : vector<8x32xf32>
    %364 = arith.divf %362, %363 : vector<8x32xf32>
    %365 = vector.extract_strided_slice %358 {offsets = [0, 32], sizes = [8, 32], strides = [1, 1]} : vector<8x128xf32> to vector<8x32xf32>
    %366 = arith.negf %365 : vector<8x32xf32>
    %367 = math.exp %366 : vector<8x32xf32>
    %cst_84 = arith.constant 1.000000e+00 : f32
    %368 = vector.broadcast %cst_84 : f32 to vector<8x32xf32>
    %369 = arith.addf %368, %367 : vector<8x32xf32>
    %370 = arith.divf %368, %369 : vector<8x32xf32>
    %371 = vector.extract_strided_slice %358 {offsets = [0, 64], sizes = [8, 32], strides = [1, 1]} : vector<8x128xf32> to vector<8x32xf32>
    %372 = math.tanh %371 : vector<8x32xf32>
    %373 = vector.extract_strided_slice %358 {offsets = [0, 96], sizes = [8, 32], strides = [1, 1]} : vector<8x128xf32> to vector<8x32xf32>
    %374 = arith.negf %373 : vector<8x32xf32>
    %375 = math.exp %374 : vector<8x32xf32>
    %cst_85 = arith.constant 1.000000e+00 : f32
    %376 = vector.broadcast %cst_85 : f32 to vector<8x32xf32>
    %377 = arith.addf %376, %375 : vector<8x32xf32>
    %378 = arith.divf %376, %377 : vector<8x32xf32>
    %379 = arith.mulf %370, %352 : vector<8x32xf32>
    %380 = arith.mulf %364, %372 : vector<8x32xf32>
    %381 = arith.addf %379, %380 : vector<8x32xf32>
    %382 = math.tanh %381 : vector<8x32xf32>
    %383 = arith.mulf %378, %382 : vector<8x32xf32>
    %384 = arith.index_cast %354 : i32 to index
    %c0_86 = arith.constant 0 : index
    %385 = vector.load %arg31[%384, %c0_86] : memref<64x32xf32, #tpu.memory_space<vmem>>, vector<8x32xf32>
    tpu.vector_store %arg31[%384, %c0_86], %383 {strides = array<i32>} : memref<64x32xf32, #tpu.memory_space<vmem>>, vector<8x32xf32>,
    %386 = arith.index_cast %354 : i32 to index
    %c0_87 = arith.constant 0 : index
    %387 = vector.load %arg1[%386, %c0_87] : memref<64x1xf32, #tpu.memory_space<vmem>>, vector<8x1xf32>
    %388 = vector.broadcast %387 : vector<8x1xf32> to vector<8x32xf32>
    %389 = arith.mulf %388, %383 : vector<8x32xf32>
    %cst_88 = arith.constant 1.000000e+00 : f32
    %390 = vector.broadcast %cst_88 : f32 to vector<8x1xf32>
    %391 = arith.subf %390, %387 : vector<8x1xf32>
    %392 = vector.broadcast %391 : vector<8x1xf32> to vector<8x32xf32>
    %393 = arith.mulf %392, %345 : vector<8x32xf32>
    %394 = arith.addf %389, %393 : vector<8x32xf32>
    %395 = vector.broadcast %387 : vector<8x1xf32> to vector<8x32xf32>
    %396 = arith.mulf %395, %381 : vector<8x32xf32>
    %cst_89 = arith.constant 1.000000e+00 : f32
    %397 = vector.broadcast %cst_89 : f32 to vector<8x1xf32>
    %398 = arith.subf %397, %387 : vector<8x1xf32>
    %399 = vector.broadcast %398 : vector<8x1xf32> to vector<8x32xf32>
    %400 = arith.mulf %399, %352 : vector<8x32xf32>
    %401 = arith.addf %396, %400 : vector<8x32xf32>
    %c8_i32_90 = arith.constant 8 : i32
    %c0_91 = arith.constant 0 : index
    %c0_92 = arith.constant 0 : index
    %402 = vector.load %arg1[%c0_91, %c0_92] : memref<64x1xf32, #tpu.memory_space<vmem>>, vector<64x1xf32>
    %c0_93 = arith.constant 0 : index
    %c0_94 = arith.constant 0 : index
    %403 = vector.load %arg31[%c0_93, %c0_94] : memref<64x32xf32, #tpu.memory_space<vmem>>, vector<64x32xf32>
    %404 = vector.broadcast %402 : vector<64x1xf32> to vector<64x32xf32>
    %405 = arith.mulf %404, %403 : vector<64x32xf32>
    %c0_95 = arith.constant 0 : index
    %c0_96 = arith.constant 0 : index
    %406 = vector.load %arg5[%c0_95, %c0_96] : memref<32x32xf32, #tpu.memory_space<vmem>>, vector<32x32xf32>
    %cst_97 = arith.constant dense<0.000000e+00> : vector<64x32xf32>
    %407 = tpu.matmul %405, %406, %cst_97 {dimension_numbers = #tpu.dot_dimension_numbers<[1], [0], [0], [1], [0, 0, 1, 1], [], []>} : vector<64x32xf32>, vector<32x32xf32>, vector<64x32xf32> -> vector<64x32xf32>
    %c0_98 = arith.constant 0 : index
    %c0_99 = arith.constant 0 : index
    %408 = vector.load %arg6[%c0_98, %c0_99] : memref<1x32xf32, #tpu.memory_space<vmem>>, vector<1x32xf32>
    %409 = vector.broadcast %408 : vector<1x32xf32> to vector<64x32xf32>
    %410 = arith.addf %407, %409 : vector<64x32xf32>
    %c0_100 = arith.constant 0 : index
    %c0_101 = arith.constant 0 : index
    %411 = vector.load %arg7[%c0_100, %c0_101] : memref<8x32xf32, #tpu.memory_space<vmem>>, vector<8x32xf32>
    %c0_102 = arith.constant 0 : index
    %c0_103 = arith.constant 0 : index
    %412 = vector.load %arg8[%c0_102, %c0_103] : memref<64x32xf32, #tpu.memory_space<vmem>>, vector<64x32xf32>
    %c0_104 = arith.constant 0 : index
    %c0_105 = arith.constant 0 : index
    %413 = vector.load %arg10[%c0_104, %c0_105] : memref<64x32xf32, #tpu.memory_space<vmem>>, vector<64x32xf32>
    %414 = vector.extract_strided_slice %412 {offsets = [0, 0], sizes = [32, 32], strides = [1, 1]} : vector<64x32xf32> to vector<32x32xf32>
    %cst_106 = arith.constant dense<0.000000e+00> : vector<8x32xf32>
    %415 = tpu.matmul %401, %414, %cst_106 {dimension_numbers = #tpu.dot_dimension_numbers<[1], [0], [0], [1], [0, 0, 1, 1], [], []>} : vector<8x32xf32>, vector<32x32xf32>, vector<8x32xf32> -> vector<8x32xf32>
    %416 = vector.extract_strided_slice %412 {offsets = [32, 0], sizes = [32, 32], strides = [1, 1]} : vector<64x32xf32> to vector<32x32xf32>
    %cst_107 = arith.constant dense<0.000000e+00> : vector<8x32xf32>
    %417 = tpu.matmul %411, %416, %cst_107 {dimension_numbers = #tpu.dot_dimension_numbers<[1], [0], [0], [1], [0, 0, 1, 1], [], []>} : vector<8x32xf32>, vector<32x32xf32>, vector<8x32xf32> -> vector<8x32xf32>
    %418 = arith.addf %415, %417 : vector<8x32xf32>
    %c0_108 = arith.constant 0 : index
    %c0_109 = arith.constant 0 : index
    %419 = vector.load %arg9[%c0_108, %c0_109] : memref<1x32xf32, #tpu.memory_space<vmem>>, vector<1x32xf32>
    %420 = vector.broadcast %419 : vector<1x32xf32> to vector<8x32xf32>
    %421 = arith.addf %418, %420 : vector<8x32xf32>
    %422 = vector.extract_strided_slice %413 {offsets = [0, 0], sizes = [32, 32], strides = [1, 1]} : vector<64x32xf32> to vector<32x32xf32>
    %cst_110 = arith.constant dense<0.000000e+00> : vector<8x32xf32>
    %423 = tpu.matmul %394, %422, %cst_110 {dimension_numbers = #tpu.dot_dimension_numbers<[1], [0], [0], [1], [0, 0, 1, 1], [], []>} : vector<8x32xf32>, vector<32x32xf32>, vector<8x32xf32> -> vector<8x32xf32>
    %424 = vector.extract_strided_slice %413 {offsets = [32, 0], sizes = [32, 32], strides = [1, 1]} : vector<64x32xf32> to vector<32x32xf32>
    %cst_111 = arith.constant dense<0.000000e+00> : vector<8x32xf32>
    %425 = tpu.matmul %411, %424, %cst_111 {dimension_numbers = #tpu.dot_dimension_numbers<[1], [0], [0], [1], [0, 0, 1, 1], [], []>} : vector<8x32xf32>, vector<32x32xf32>, vector<8x32xf32> -> vector<8x32xf32>
    %426 = arith.addf %423, %425 : vector<8x32xf32>
    %c0_112 = arith.constant 0 : index
    %c0_113 = arith.constant 0 : index
    %427 = vector.load %arg11[%c0_112, %c0_113] : memref<1x32xf32, #tpu.memory_space<vmem>>, vector<1x32xf32>
    %428 = vector.broadcast %427 : vector<1x32xf32> to vector<8x32xf32>
    %429 = arith.addf %426, %428 : vector<8x32xf32>
    %c0_114 = arith.constant 0 : index
    %c0_115 = arith.constant 0 : index
    %430 = vector.load %arg16[%c0_114, %c0_115] : memref<32x32xf32, #tpu.memory_space<vmem>>, vector<32x32xf32>
    %cst_116 = arith.constant dense<0.000000e+00> : vector<64x32xf32>
    %431 = tpu.matmul %410, %430, %cst_116 {dimension_numbers = #tpu.dot_dimension_numbers<[1], [0], [0], [1], [0, 0, 1, 1], [], []>} : vector<64x32xf32>, vector<32x32xf32>, vector<64x32xf32> -> vector<64x32xf32>
    %432 = tpu.transpose %431, [1, 0] : vector<64x32xf32> -> vector<32x64xf32>
    %c0_117 = arith.constant 0 : index
    %c0_118 = arith.constant 0 : index
    %433 = vector.load %arg12[%c0_117, %c0_118] : memref<64x32xf32, #tpu.memory_space<vmem>>, vector<64x32xf32>
    %c0_119 = arith.constant 0 : index
    %c0_120 = arith.constant 0 : index
    %434 = vector.load %arg13[%c0_119, %c0_120] : memref<32x128xf32, #tpu.memory_space<vmem>>, vector<32x128xf32>
    %cst_121 = arith.constant dense<0.000000e+00> : vector<64x128xf32>
    %435 = tpu.matmul %433, %434, %cst_121 {dimension_numbers = #tpu.dot_dimension_numbers<[1], [0], [0], [1], [0, 0, 1, 1], [], []>} : vector<64x32xf32>, vector<32x128xf32>, vector<64x128xf32> -> vector<64x128xf32>
    %c0_122 = arith.constant 0 : index
    %c0_123 = arith.constant 0 : index
    %436 = vector.load %arg15[%c0_122, %c0_123] : memref<1x128xf32, #tpu.memory_space<vmem>>, vector<1x128xf32>
    %437 = vector.broadcast %436 : vector<1x128xf32> to vector<64x128xf32>
    %438 = arith.addf %435, %437 : vector<64x128xf32>
    %c0_124 = arith.constant 0 : index
    %c0_125 = arith.constant 0 : index
    %439 = vector.load %arg30[%c0_124, %c0_125] : memref<64x128xf32, #tpu.memory_space<vmem>>, vector<64x128xf32>
    tpu.vector_store %arg30[%c0_124, %c0_125], %438 {strides = array<i32>} : memref<64x128xf32, #tpu.memory_space<vmem>>, vector<64x128xf32>,
    %c0_126 = arith.constant 0 : index
    %c0_127 = arith.constant 0 : index
    %440 = vector.load %arg14[%c0_126, %c0_127] : memref<32x128xf32, #tpu.memory_space<vmem>>, vector<32x128xf32>
    %c0_128 = arith.constant 0 : index
    %c0_129 = arith.constant 0 : index
    %441 = vector.load %arg18[%c0_128, %c0_129] : memref<64x32xf32, #tpu.memory_space<vmem>>, vector<64x32xf32>
    %442 = vector.extract_strided_slice %441 {offsets = [0, 0], sizes = [32, 32], strides = [1, 1]} : vector<64x32xf32> to vector<32x32xf32>
    %443 = vector.extract_strided_slice %441 {offsets = [32, 0], sizes = [32, 32], strides = [1, 1]} : vector<64x32xf32> to vector<32x32xf32>
    %c0_130 = arith.constant 0 : index
    %c0_131 = arith.constant 0 : index
    %444 = vector.load %arg19[%c0_130, %c0_131] : memref<1x32xf32, #tpu.memory_space<vmem>>, vector<1x32xf32>
    %c0_132 = arith.constant 0 : index
    %c0_133 = arith.constant 0 : index
    %445 = vector.load %arg17[%c0_132, %c0_133] : memref<8x64xf32, #tpu.memory_space<vmem>>, vector<8x64xf32>
    %c0_i32_134 = arith.constant 0 : i32
    %c8_i32_135 = arith.constant 8 : i32
    %446 = arith.muli %c0_i32_134, %c8_i32_135 : i32
    %447 = tpu.assume_multiple %446, 8 : i32
    %448 = arith.index_cast %447 : i32 to index
    %c0_136 = arith.constant 0 : index
    %449 = vector.load %arg30[%448, %c0_136] : memref<64x128xf32, #tpu.memory_space<vmem>>, vector<8x128xf32>
    %cst_137 = arith.constant dense<0.000000e+00> : vector<8x128xf32>
    %450 = tpu.matmul %429, %440, %cst_137 {dimension_numbers = #tpu.dot_dimension_numbers<[1], [0], [0], [1], [0, 0, 1, 1], [], []>} : vector<8x32xf32>, vector<32x128xf32>, vector<8x128xf32> -> vector<8x128xf32>
    %451 = arith.addf %449, %450 : vector<8x128xf32>
    %452 = vector.extract_strided_slice %451 {offsets = [0, 0], sizes = [8, 32], strides = [1, 1]} : vector<8x128xf32> to vector<8x32xf32>
    %453 = arith.negf %452 : vector<8x32xf32>
    %454 = math.exp %453 : vector<8x32xf32>
    %cst_138 = arith.constant 1.000000e+00 : f32
    %455 = vector.broadcast %cst_138 : f32 to vector<8x32xf32>
    %456 = arith.addf %455, %454 : vector<8x32xf32>
    %457 = arith.divf %455, %456 : vector<8x32xf32>
    %458 = vector.extract_strided_slice %451 {offsets = [0, 32], sizes = [8, 32], strides = [1, 1]} : vector<8x128xf32> to vector<8x32xf32>
    %459 = arith.negf %458 : vector<8x32xf32>
    %460 = math.exp %459 : vector<8x32xf32>
    %cst_139 = arith.constant 1.000000e+00 : f32
    %461 = vector.broadcast %cst_139 : f32 to vector<8x32xf32>
    %462 = arith.addf %461, %460 : vector<8x32xf32>
    %463 = arith.divf %461, %462 : vector<8x32xf32>
    %464 = vector.extract_strided_slice %451 {offsets = [0, 64], sizes = [8, 32], strides = [1, 1]} : vector<8x128xf32> to vector<8x32xf32>
    %465 = math.tanh %464 : vector<8x32xf32>
    %466 = vector.extract_strided_slice %451 {offsets = [0, 96], sizes = [8, 32], strides = [1, 1]} : vector<8x128xf32> to vector<8x32xf32>
    %467 = arith.negf %466 : vector<8x32xf32>
    %468 = math.exp %467 : vector<8x32xf32>
    %cst_140 = arith.constant 1.000000e+00 : f32
    %469 = vector.broadcast %cst_140 : f32 to vector<8x32xf32>
    %470 = arith.addf %469, %468 : vector<8x32xf32>
    %471 = arith.divf %469, %470 : vector<8x32xf32>
    %472 = arith.mulf %463, %421 : vector<8x32xf32>
    %473 = arith.mulf %457, %465 : vector<8x32xf32>
    %474 = arith.addf %472, %473 : vector<8x32xf32>
    %475 = math.tanh %474 : vector<8x32xf32>
    %476 = arith.mulf %471, %475 : vector<8x32xf32>
    %cst_141 = arith.constant dense<0.000000e+00> : vector<8x64xf32>
    %477 = tpu.matmul %476, %432, %cst_141 {dimension_numbers = #tpu.dot_dimension_numbers<[1], [0], [0], [1], [0, 0, 1, 1], [], []>} : vector<8x32xf32>, vector<32x64xf32>, vector<8x64xf32> -> vector<8x64xf32>
    %478 = arith.addf %477, %445 : vector<8x64xf32>
    %cst_142 = arith.constant dense<0xFF800000> : vector<8xf32>
    %479 = vector.multi_reduction <maximumf>, %478, %cst_142 [1] : vector<8x64xf32> to vector<8xf32>
    %480 = vector.shape_cast %479 : vector<8xf32> to vector<8x1xf32>
    %481 = vector.broadcast %480 : vector<8x1xf32> to vector<8x64xf32>
    %482 = arith.subf %478, %481 : vector<8x64xf32>
    %483 = math.exp %482 : vector<8x64xf32>
    %cst_143 = arith.constant dense<0.000000e+00> : vector<8xf32>
    %484 = vector.multi_reduction <add>, %483, %cst_143 [1] : vector<8x64xf32> to vector<8xf32>
    %485 = vector.shape_cast %484 : vector<8xf32> to vector<8x1xf32>
    %486 = vector.broadcast %485 : vector<8x1xf32> to vector<8x64xf32>
    %487 = arith.divf %483, %486 : vector<8x64xf32>
    %cst_144 = arith.constant dense<0.000000e+00> : vector<8x32xf32>
    %488 = tpu.matmul %487, %410, %cst_144 {dimension_numbers = #tpu.dot_dimension_numbers<[1], [0], [0], [1], [0, 0, 1, 1], [], []>} : vector<8x64xf32>, vector<64x32xf32>, vector<8x32xf32> -> vector<8x32xf32>
    %cst_145 = arith.constant dense<0.000000e+00> : vector<8x32xf32>
    %489 = tpu.matmul %488, %442, %cst_145 {dimension_numbers = #tpu.dot_dimension_numbers<[1], [0], [0], [1], [0, 0, 1, 1], [], []>} : vector<8x32xf32>, vector<32x32xf32>, vector<8x32xf32> -> vector<8x32xf32>
    %cst_146 = arith.constant dense<0.000000e+00> : vector<8x32xf32>
    %490 = tpu.matmul %476, %443, %cst_146 {dimension_numbers = #tpu.dot_dimension_numbers<[1], [0], [0], [1], [0, 0, 1, 1], [], []>} : vector<8x32xf32>, vector<32x32xf32>, vector<8x32xf32> -> vector<8x32xf32>
    %491 = arith.addf %489, %490 : vector<8x32xf32>
    %492 = vector.broadcast %444 : vector<1x32xf32> to vector<8x32xf32>
    %493 = arith.addf %491, %492 : vector<8x32xf32>
    %494 = math.tanh %493 : vector<8x32xf32>
    %495 = arith.index_cast %447 : i32 to index
    %c0_147 = arith.constant 0 : index
    %496 = vector.load %arg28[%495, %c0_147] : memref<64x32xf32, #tpu.memory_space<vmem>>, vector<8x32xf32>
    tpu.vector_store %arg28[%495, %c0_147], %494 {strides = array<i32>} : memref<64x32xf32, #tpu.memory_space<vmem>>, vector<8x32xf32>,
    %c1_i32_148 = arith.constant 1 : i32
    %c8_i32_149 = arith.constant 8 : i32
    %497 = arith.muli %c1_i32_148, %c8_i32_149 : i32
    %498 = tpu.assume_multiple %497, 8 : i32
    %499 = arith.index_cast %498 : i32 to index
    %c0_150 = arith.constant 0 : index
    %500 = vector.load %arg30[%499, %c0_150] : memref<64x128xf32, #tpu.memory_space<vmem>>, vector<8x128xf32>
    %cst_151 = arith.constant dense<0.000000e+00> : vector<8x128xf32>
    %501 = tpu.matmul %494, %440, %cst_151 {dimension_numbers = #tpu.dot_dimension_numbers<[1], [0], [0], [1], [0, 0, 1, 1], [], []>} : vector<8x32xf32>, vector<32x128xf32>, vector<8x128xf32> -> vector<8x128xf32>
    %502 = arith.addf %500, %501 : vector<8x128xf32>
    %503 = vector.extract_strided_slice %502 {offsets = [0, 0], sizes = [8, 32], strides = [1, 1]} : vector<8x128xf32> to vector<8x32xf32>
    %504 = arith.negf %503 : vector<8x32xf32>
    %505 = math.exp %504 : vector<8x32xf32>
    %cst_152 = arith.constant 1.000000e+00 : f32
    %506 = vector.broadcast %cst_152 : f32 to vector<8x32xf32>
    %507 = arith.addf %506, %505 : vector<8x32xf32>
    %508 = arith.divf %506, %507 : vector<8x32xf32>
    %509 = vector.extract_strided_slice %502 {offsets = [0, 32], sizes = [8, 32], strides = [1, 1]} : vector<8x128xf32> to vector<8x32xf32>
    %510 = arith.negf %509 : vector<8x32xf32>
    %511 = math.exp %510 : vector<8x32xf32>
    %cst_153 = arith.constant 1.000000e+00 : f32
    %512 = vector.broadcast %cst_153 : f32 to vector<8x32xf32>
    %513 = arith.addf %512, %511 : vector<8x32xf32>
    %514 = arith.divf %512, %513 : vector<8x32xf32>
    %515 = vector.extract_strided_slice %502 {offsets = [0, 64], sizes = [8, 32], strides = [1, 1]} : vector<8x128xf32> to vector<8x32xf32>
    %516 = math.tanh %515 : vector<8x32xf32>
    %517 = vector.extract_strided_slice %502 {offsets = [0, 96], sizes = [8, 32], strides = [1, 1]} : vector<8x128xf32> to vector<8x32xf32>
    %518 = arith.negf %517 : vector<8x32xf32>
    %519 = math.exp %518 : vector<8x32xf32>
    %cst_154 = arith.constant 1.000000e+00 : f32
    %520 = vector.broadcast %cst_154 : f32 to vector<8x32xf32>
    %521 = arith.addf %520, %519 : vector<8x32xf32>
    %522 = arith.divf %520, %521 : vector<8x32xf32>
    %523 = arith.mulf %514, %474 : vector<8x32xf32>
    %524 = arith.mulf %508, %516 : vector<8x32xf32>
    %525 = arith.addf %523, %524 : vector<8x32xf32>
    %526 = math.tanh %525 : vector<8x32xf32>
    %527 = arith.mulf %522, %526 : vector<8x32xf32>
    %cst_155 = arith.constant dense<0.000000e+00> : vector<8x64xf32>
    %528 = tpu.matmul %527, %432, %cst_155 {dimension_numbers = #tpu.dot_dimension_numbers<[1], [0], [0], [1], [0, 0, 1, 1], [], []>} : vector<8x32xf32>, vector<32x64xf32>, vector<8x64xf32> -> vector<8x64xf32>
    %529 = arith.addf %528, %445 : vector<8x64xf32>
    %cst_156 = arith.constant dense<0xFF800000> : vector<8xf32>
    %530 = vector.multi_reduction <maximumf>, %529, %cst_156 [1] : vector<8x64xf32> to vector<8xf32>
    %531 = vector.shape_cast %530 : vector<8xf32> to vector<8x1xf32>
    %532 = vector.broadcast %531 : vector<8x1xf32> to vector<8x64xf32>
    %533 = arith.subf %529, %532 : vector<8x64xf32>
    %534 = math.exp %533 : vector<8x64xf32>
    %cst_157 = arith.constant dense<0.000000e+00> : vector<8xf32>
    %535 = vector.multi_reduction <add>, %534, %cst_157 [1] : vector<8x64xf32> to vector<8xf32>
    %536 = vector.shape_cast %535 : vector<8xf32> to vector<8x1xf32>
    %537 = vector.broadcast %536 : vector<8x1xf32> to vector<8x64xf32>
    %538 = arith.divf %534, %537 : vector<8x64xf32>
    %cst_158 = arith.constant dense<0.000000e+00> : vector<8x32xf32>
    %539 = tpu.matmul %538, %410, %cst_158 {dimension_numbers = #tpu.dot_dimension_numbers<[1], [0], [0], [1], [0, 0, 1, 1], [], []>} : vector<8x64xf32>, vector<64x32xf32>, vector<8x32xf32> -> vector<8x32xf32>
    %cst_159 = arith.constant dense<0.000000e+00> : vector<8x32xf32>
    %540 = tpu.matmul %539, %442, %cst_159 {dimension_numbers = #tpu.dot_dimension_numbers<[1], [0], [0], [1], [0, 0, 1, 1], [], []>} : vector<8x32xf32>, vector<32x32xf32>, vector<8x32xf32> -> vector<8x32xf32>
    %cst_160 = arith.constant dense<0.000000e+00> : vector<8x32xf32>
    %541 = tpu.matmul %527, %443, %cst_160 {dimension_numbers = #tpu.dot_dimension_numbers<[1], [0], [0], [1], [0, 0, 1, 1], [], []>} : vector<8x32xf32>, vector<32x32xf32>, vector<8x32xf32> -> vector<8x32xf32>
    %542 = arith.addf %540, %541 : vector<8x32xf32>
    %543 = vector.broadcast %444 : vector<1x32xf32> to vector<8x32xf32>
    %544 = arith.addf %542, %543 : vector<8x32xf32>
    %545 = math.tanh %544 : vector<8x32xf32>
    %546 = arith.index_cast %498 : i32 to index
    %c0_161 = arith.constant 0 : index
    %547 = vector.load %arg28[%546, %c0_161] : memref<64x32xf32, #tpu.memory_space<vmem>>, vector<8x32xf32>
    tpu.vector_store %arg28[%546, %c0_161], %545 {strides = array<i32>} : memref<64x32xf32, #tpu.memory_space<vmem>>, vector<8x32xf32>,
    %c2_i32_162 = arith.constant 2 : i32
    %c8_i32_163 = arith.constant 8 : i32
    %548 = arith.muli %c2_i32_162, %c8_i32_163 : i32
    %549 = tpu.assume_multiple %548, 8 : i32
    %550 = arith.index_cast %549 : i32 to index
    %c0_164 = arith.constant 0 : index
    %551 = vector.load %arg30[%550, %c0_164] : memref<64x128xf32, #tpu.memory_space<vmem>>, vector<8x128xf32>
    %cst_165 = arith.constant dense<0.000000e+00> : vector<8x128xf32>
    %552 = tpu.matmul %545, %440, %cst_165 {dimension_numbers = #tpu.dot_dimension_numbers<[1], [0], [0], [1], [0, 0, 1, 1], [], []>} : vector<8x32xf32>, vector<32x128xf32>, vector<8x128xf32> -> vector<8x128xf32>
    %553 = arith.addf %551, %552 : vector<8x128xf32>
    %554 = vector.extract_strided_slice %553 {offsets = [0, 0], sizes = [8, 32], strides = [1, 1]} : vector<8x128xf32> to vector<8x32xf32>
    %555 = arith.negf %554 : vector<8x32xf32>
    %556 = math.exp %555 : vector<8x32xf32>
    %cst_166 = arith.constant 1.000000e+00 : f32
    %557 = vector.broadcast %cst_166 : f32 to vector<8x32xf32>
    %558 = arith.addf %557, %556 : vector<8x32xf32>
    %559 = arith.divf %557, %558 : vector<8x32xf32>
    %560 = vector.extract_strided_slice %553 {offsets = [0, 32], sizes = [8, 32], strides = [1, 1]} : vector<8x128xf32> to vector<8x32xf32>
    %561 = arith.negf %560 : vector<8x32xf32>
    %562 = math.exp %561 : vector<8x32xf32>
    %cst_167 = arith.constant 1.000000e+00 : f32
    %563 = vector.broadcast %cst_167 : f32 to vector<8x32xf32>
    %564 = arith.addf %563, %562 : vector<8x32xf32>
    %565 = arith.divf %563, %564 : vector<8x32xf32>
    %566 = vector.extract_strided_slice %553 {offsets = [0, 64], sizes = [8, 32], strides = [1, 1]} : vector<8x128xf32> to vector<8x32xf32>
    %567 = math.tanh %566 : vector<8x32xf32>
    %568 = vector.extract_strided_slice %553 {offsets = [0, 96], sizes = [8, 32], strides = [1, 1]} : vector<8x128xf32> to vector<8x32xf32>
    %569 = arith.negf %568 : vector<8x32xf32>
    %570 = math.exp %569 : vector<8x32xf32>
    %cst_168 = arith.constant 1.000000e+00 : f32
    %571 = vector.broadcast %cst_168 : f32 to vector<8x32xf32>
    %572 = arith.addf %571, %570 : vector<8x32xf32>
    %573 = arith.divf %571, %572 : vector<8x32xf32>
    %574 = arith.mulf %565, %525 : vector<8x32xf32>
    %575 = arith.mulf %559, %567 : vector<8x32xf32>
    %576 = arith.addf %574, %575 : vector<8x32xf32>
    %577 = math.tanh %576 : vector<8x32xf32>
    %578 = arith.mulf %573, %577 : vector<8x32xf32>
    %cst_169 = arith.constant dense<0.000000e+00> : vector<8x64xf32>
    %579 = tpu.matmul %578, %432, %cst_169 {dimension_numbers = #tpu.dot_dimension_numbers<[1], [0], [0], [1], [0, 0, 1, 1], [], []>} : vector<8x32xf32>, vector<32x64xf32>, vector<8x64xf32> -> vector<8x64xf32>
    %580 = arith.addf %579, %445 : vector<8x64xf32>
    %cst_170 = arith.constant dense<0xFF800000> : vector<8xf32>
    %581 = vector.multi_reduction <maximumf>, %580, %cst_170 [1] : vector<8x64xf32> to vector<8xf32>
    %582 = vector.shape_cast %581 : vector<8xf32> to vector<8x1xf32>
    %583 = vector.broadcast %582 : vector<8x1xf32> to vector<8x64xf32>
    %584 = arith.subf %580, %583 : vector<8x64xf32>
    %585 = math.exp %584 : vector<8x64xf32>
    %cst_171 = arith.constant dense<0.000000e+00> : vector<8xf32>
    %586 = vector.multi_reduction <add>, %585, %cst_171 [1] : vector<8x64xf32> to vector<8xf32>
    %587 = vector.shape_cast %586 : vector<8xf32> to vector<8x1xf32>
    %588 = vector.broadcast %587 : vector<8x1xf32> to vector<8x64xf32>
    %589 = arith.divf %585, %588 : vector<8x64xf32>
    %cst_172 = arith.constant dense<0.000000e+00> : vector<8x32xf32>
    %590 = tpu.matmul %589, %410, %cst_172 {dimension_numbers = #tpu.dot_dimension_numbers<[1], [0], [0], [1], [0, 0, 1, 1], [], []>} : vector<8x64xf32>, vector<64x32xf32>, vector<8x32xf32> -> vector<8x32xf32>
    %cst_173 = arith.constant dense<0.000000e+00> : vector<8x32xf32>
    %591 = tpu.matmul %590, %442, %cst_173 {dimension_numbers = #tpu.dot_dimension_numbers<[1], [0], [0], [1], [0, 0, 1, 1], [], []>} : vector<8x32xf32>, vector<32x32xf32>, vector<8x32xf32> -> vector<8x32xf32>
    %cst_174 = arith.constant dense<0.000000e+00> : vector<8x32xf32>
    %592 = tpu.matmul %578, %443, %cst_174 {dimension_numbers = #tpu.dot_dimension_numbers<[1], [0], [0], [1], [0, 0, 1, 1], [], []>} : vector<8x32xf32>, vector<32x32xf32>, vector<8x32xf32> -> vector<8x32xf32>
    %593 = arith.addf %591, %592 : vector<8x32xf32>
    %594 = vector.broadcast %444 : vector<1x32xf32> to vector<8x32xf32>
    %595 = arith.addf %593, %594 : vector<8x32xf32>
    %596 = math.tanh %595 : vector<8x32xf32>
    %597 = arith.index_cast %549 : i32 to index
    %c0_175 = arith.constant 0 : index
    %598 = vector.load %arg28[%597, %c0_175] : memref<64x32xf32, #tpu.memory_space<vmem>>, vector<8x32xf32>
    tpu.vector_store %arg28[%597, %c0_175], %596 {strides = array<i32>} : memref<64x32xf32, #tpu.memory_space<vmem>>, vector<8x32xf32>,
    %c3_i32_176 = arith.constant 3 : i32
    %c8_i32_177 = arith.constant 8 : i32
    %599 = arith.muli %c3_i32_176, %c8_i32_177 : i32
    %600 = tpu.assume_multiple %599, 8 : i32
    %601 = arith.index_cast %600 : i32 to index
    %c0_178 = arith.constant 0 : index
    %602 = vector.load %arg30[%601, %c0_178] : memref<64x128xf32, #tpu.memory_space<vmem>>, vector<8x128xf32>
    %cst_179 = arith.constant dense<0.000000e+00> : vector<8x128xf32>
    %603 = tpu.matmul %596, %440, %cst_179 {dimension_numbers = #tpu.dot_dimension_numbers<[1], [0], [0], [1], [0, 0, 1, 1], [], []>} : vector<8x32xf32>, vector<32x128xf32>, vector<8x128xf32> -> vector<8x128xf32>
    %604 = arith.addf %602, %603 : vector<8x128xf32>
    %605 = vector.extract_strided_slice %604 {offsets = [0, 0], sizes = [8, 32], strides = [1, 1]} : vector<8x128xf32> to vector<8x32xf32>
    %606 = arith.negf %605 : vector<8x32xf32>
    %607 = math.exp %606 : vector<8x32xf32>
    %cst_180 = arith.constant 1.000000e+00 : f32
    %608 = vector.broadcast %cst_180 : f32 to vector<8x32xf32>
    %609 = arith.addf %608, %607 : vector<8x32xf32>
    %610 = arith.divf %608, %609 : vector<8x32xf32>
    %611 = vector.extract_strided_slice %604 {offsets = [0, 32], sizes = [8, 32], strides = [1, 1]} : vector<8x128xf32> to vector<8x32xf32>
    %612 = arith.negf %611 : vector<8x32xf32>
    %613 = math.exp %612 : vector<8x32xf32>
    %cst_181 = arith.constant 1.000000e+00 : f32
    %614 = vector.broadcast %cst_181 : f32 to vector<8x32xf32>
    %615 = arith.addf %614, %613 : vector<8x32xf32>
    %616 = arith.divf %614, %615 : vector<8x32xf32>
    %617 = vector.extract_strided_slice %604 {offsets = [0, 64], sizes = [8, 32], strides = [1, 1]} : vector<8x128xf32> to vector<8x32xf32>
    %618 = math.tanh %617 : vector<8x32xf32>
    %619 = vector.extract_strided_slice %604 {offsets = [0, 96], sizes = [8, 32], strides = [1, 1]} : vector<8x128xf32> to vector<8x32xf32>
    %620 = arith.negf %619 : vector<8x32xf32>
    %621 = math.exp %620 : vector<8x32xf32>
    %cst_182 = arith.constant 1.000000e+00 : f32
    %622 = vector.broadcast %cst_182 : f32 to vector<8x32xf32>
    %623 = arith.addf %622, %621 : vector<8x32xf32>
    %624 = arith.divf %622, %623 : vector<8x32xf32>
    %625 = arith.mulf %616, %576 : vector<8x32xf32>
    %626 = arith.mulf %610, %618 : vector<8x32xf32>
    %627 = arith.addf %625, %626 : vector<8x32xf32>
    %628 = math.tanh %627 : vector<8x32xf32>
    %629 = arith.mulf %624, %628 : vector<8x32xf32>
    %cst_183 = arith.constant dense<0.000000e+00> : vector<8x64xf32>
    %630 = tpu.matmul %629, %432, %cst_183 {dimension_numbers = #tpu.dot_dimension_numbers<[1], [0], [0], [1], [0, 0, 1, 1], [], []>} : vector<8x32xf32>, vector<32x64xf32>, vector<8x64xf32> -> vector<8x64xf32>
    %631 = arith.addf %630, %445 : vector<8x64xf32>
    %cst_184 = arith.constant dense<0xFF800000> : vector<8xf32>
    %632 = vector.multi_reduction <maximumf>, %631, %cst_184 [1] : vector<8x64xf32> to vector<8xf32>
    %633 = vector.shape_cast %632 : vector<8xf32> to vector<8x1xf32>
    %634 = vector.broadcast %633 : vector<8x1xf32> to vector<8x64xf32>
    %635 = arith.subf %631, %634 : vector<8x64xf32>
    %636 = math.exp %635 : vector<8x64xf32>
    %cst_185 = arith.constant dense<0.000000e+00> : vector<8xf32>
    %637 = vector.multi_reduction <add>, %636, %cst_185 [1] : vector<8x64xf32> to vector<8xf32>
    %638 = vector.shape_cast %637 : vector<8xf32> to vector<8x1xf32>
    %639 = vector.broadcast %638 : vector<8x1xf32> to vector<8x64xf32>
    %640 = arith.divf %636, %639 : vector<8x64xf32>
    %cst_186 = arith.constant dense<0.000000e+00> : vector<8x32xf32>
    %641 = tpu.matmul %640, %410, %cst_186 {dimension_numbers = #tpu.dot_dimension_numbers<[1], [0], [0], [1], [0, 0, 1, 1], [], []>} : vector<8x64xf32>, vector<64x32xf32>, vector<8x32xf32> -> vector<8x32xf32>
    %cst_187 = arith.constant dense<0.000000e+00> : vector<8x32xf32>
    %642 = tpu.matmul %641, %442, %cst_187 {dimension_numbers = #tpu.dot_dimension_numbers<[1], [0], [0], [1], [0, 0, 1, 1], [], []>} : vector<8x32xf32>, vector<32x32xf32>, vector<8x32xf32> -> vector<8x32xf32>
    %cst_188 = arith.constant dense<0.000000e+00> : vector<8x32xf32>
    %643 = tpu.matmul %629, %443, %cst_188 {dimension_numbers = #tpu.dot_dimension_numbers<[1], [0], [0], [1], [0, 0, 1, 1], [], []>} : vector<8x32xf32>, vector<32x32xf32>, vector<8x32xf32> -> vector<8x32xf32>
    %644 = arith.addf %642, %643 : vector<8x32xf32>
    %645 = vector.broadcast %444 : vector<1x32xf32> to vector<8x32xf32>
    %646 = arith.addf %644, %645 : vector<8x32xf32>
    %647 = math.tanh %646 : vector<8x32xf32>
    %648 = arith.index_cast %600 : i32 to index
    %c0_189 = arith.constant 0 : index
    %649 = vector.load %arg28[%648, %c0_189] : memref<64x32xf32, #tpu.memory_space<vmem>>, vector<8x32xf32>
    tpu.vector_store %arg28[%648, %c0_189], %647 {strides = array<i32>} : memref<64x32xf32, #tpu.memory_space<vmem>>, vector<8x32xf32>,
    %c4_i32_190 = arith.constant 4 : i32
    %c8_i32_191 = arith.constant 8 : i32
    %650 = arith.muli %c4_i32_190, %c8_i32_191 : i32
    %651 = tpu.assume_multiple %650, 8 : i32
    %652 = arith.index_cast %651 : i32 to index
    %c0_192 = arith.constant 0 : index
    %653 = vector.load %arg30[%652, %c0_192] : memref<64x128xf32, #tpu.memory_space<vmem>>, vector<8x128xf32>
    %cst_193 = arith.constant dense<0.000000e+00> : vector<8x128xf32>
    %654 = tpu.matmul %647, %440, %cst_193 {dimension_numbers = #tpu.dot_dimension_numbers<[1], [0], [0], [1], [0, 0, 1, 1], [], []>} : vector<8x32xf32>, vector<32x128xf32>, vector<8x128xf32> -> vector<8x128xf32>
    %655 = arith.addf %653, %654 : vector<8x128xf32>
    %656 = vector.extract_strided_slice %655 {offsets = [0, 0], sizes = [8, 32], strides = [1, 1]} : vector<8x128xf32> to vector<8x32xf32>
    %657 = arith.negf %656 : vector<8x32xf32>
    %658 = math.exp %657 : vector<8x32xf32>
    %cst_194 = arith.constant 1.000000e+00 : f32
    %659 = vector.broadcast %cst_194 : f32 to vector<8x32xf32>
    %660 = arith.addf %659, %658 : vector<8x32xf32>
    %661 = arith.divf %659, %660 : vector<8x32xf32>
    %662 = vector.extract_strided_slice %655 {offsets = [0, 32], sizes = [8, 32], strides = [1, 1]} : vector<8x128xf32> to vector<8x32xf32>
    %663 = arith.negf %662 : vector<8x32xf32>
    %664 = math.exp %663 : vector<8x32xf32>
    %cst_195 = arith.constant 1.000000e+00 : f32
    %665 = vector.broadcast %cst_195 : f32 to vector<8x32xf32>
    %666 = arith.addf %665, %664 : vector<8x32xf32>
    %667 = arith.divf %665, %666 : vector<8x32xf32>
    %668 = vector.extract_strided_slice %655 {offsets = [0, 64], sizes = [8, 32], strides = [1, 1]} : vector<8x128xf32> to vector<8x32xf32>
    %669 = math.tanh %668 : vector<8x32xf32>
    %670 = vector.extract_strided_slice %655 {offsets = [0, 96], sizes = [8, 32], strides = [1, 1]} : vector<8x128xf32> to vector<8x32xf32>
    %671 = arith.negf %670 : vector<8x32xf32>
    %672 = math.exp %671 : vector<8x32xf32>
    %cst_196 = arith.constant 1.000000e+00 : f32
    %673 = vector.broadcast %cst_196 : f32 to vector<8x32xf32>
    %674 = arith.addf %673, %672 : vector<8x32xf32>
    %675 = arith.divf %673, %674 : vector<8x32xf32>
    %676 = arith.mulf %667, %627 : vector<8x32xf32>
    %677 = arith.mulf %661, %669 : vector<8x32xf32>
    %678 = arith.addf %676, %677 : vector<8x32xf32>
    %679 = math.tanh %678 : vector<8x32xf32>
    %680 = arith.mulf %675, %679 : vector<8x32xf32>
    %cst_197 = arith.constant dense<0.000000e+00> : vector<8x64xf32>
    %681 = tpu.matmul %680, %432, %cst_197 {dimension_numbers = #tpu.dot_dimension_numbers<[1], [0], [0], [1], [0, 0, 1, 1], [], []>} : vector<8x32xf32>, vector<32x64xf32>, vector<8x64xf32> -> vector<8x64xf32>
    %682 = arith.addf %681, %445 : vector<8x64xf32>
    %cst_198 = arith.constant dense<0xFF800000> : vector<8xf32>
    %683 = vector.multi_reduction <maximumf>, %682, %cst_198 [1] : vector<8x64xf32> to vector<8xf32>
    %684 = vector.shape_cast %683 : vector<8xf32> to vector<8x1xf32>
    %685 = vector.broadcast %684 : vector<8x1xf32> to vector<8x64xf32>
    %686 = arith.subf %682, %685 : vector<8x64xf32>
    %687 = math.exp %686 : vector<8x64xf32>
    %cst_199 = arith.constant dense<0.000000e+00> : vector<8xf32>
    %688 = vector.multi_reduction <add>, %687, %cst_199 [1] : vector<8x64xf32> to vector<8xf32>
    %689 = vector.shape_cast %688 : vector<8xf32> to vector<8x1xf32>
    %690 = vector.broadcast %689 : vector<8x1xf32> to vector<8x64xf32>
    %691 = arith.divf %687, %690 : vector<8x64xf32>
    %cst_200 = arith.constant dense<0.000000e+00> : vector<8x32xf32>
    %692 = tpu.matmul %691, %410, %cst_200 {dimension_numbers = #tpu.dot_dimension_numbers<[1], [0], [0], [1], [0, 0, 1, 1], [], []>} : vector<8x64xf32>, vector<64x32xf32>, vector<8x32xf32> -> vector<8x32xf32>
    %cst_201 = arith.constant dense<0.000000e+00> : vector<8x32xf32>
    %693 = tpu.matmul %692, %442, %cst_201 {dimension_numbers = #tpu.dot_dimension_numbers<[1], [0], [0], [1], [0, 0, 1, 1], [], []>} : vector<8x32xf32>, vector<32x32xf32>, vector<8x32xf32> -> vector<8x32xf32>
    %cst_202 = arith.constant dense<0.000000e+00> : vector<8x32xf32>
    %694 = tpu.matmul %680, %443, %cst_202 {dimension_numbers = #tpu.dot_dimension_numbers<[1], [0], [0], [1], [0, 0, 1, 1], [], []>} : vector<8x32xf32>, vector<32x32xf32>, vector<8x32xf32> -> vector<8x32xf32>
    %695 = arith.addf %693, %694 : vector<8x32xf32>
    %696 = vector.broadcast %444 : vector<1x32xf32> to vector<8x32xf32>
    %697 = arith.addf %695, %696 : vector<8x32xf32>
    %698 = math.tanh %697 : vector<8x32xf32>
    %699 = arith.index_cast %651 : i32 to index
    %c0_203 = arith.constant 0 : index
    %700 = vector.load %arg28[%699, %c0_203] : memref<64x32xf32, #tpu.memory_space<vmem>>, vector<8x32xf32>
    tpu.vector_store %arg28[%699, %c0_203], %698 {strides = array<i32>} : memref<64x32xf32, #tpu.memory_space<vmem>>, vector<8x32xf32>,
    %c5_i32_204 = arith.constant 5 : i32
    %c8_i32_205 = arith.constant 8 : i32
    %701 = arith.muli %c5_i32_204, %c8_i32_205 : i32
    %702 = tpu.assume_multiple %701, 8 : i32
    %703 = arith.index_cast %702 : i32 to index
    %c0_206 = arith.constant 0 : index
    %704 = vector.load %arg30[%703, %c0_206] : memref<64x128xf32, #tpu.memory_space<vmem>>, vector<8x128xf32>
    %cst_207 = arith.constant dense<0.000000e+00> : vector<8x128xf32>
    %705 = tpu.matmul %698, %440, %cst_207 {dimension_numbers = #tpu.dot_dimension_numbers<[1], [0], [0], [1], [0, 0, 1, 1], [], []>} : vector<8x32xf32>, vector<32x128xf32>, vector<8x128xf32> -> vector<8x128xf32>
    %706 = arith.addf %704, %705 : vector<8x128xf32>
    %707 = vector.extract_strided_slice %706 {offsets = [0, 0], sizes = [8, 32], strides = [1, 1]} : vector<8x128xf32> to vector<8x32xf32>
    %708 = arith.negf %707 : vector<8x32xf32>
    %709 = math.exp %708 : vector<8x32xf32>
    %cst_208 = arith.constant 1.000000e+00 : f32
    %710 = vector.broadcast %cst_208 : f32 to vector<8x32xf32>
    %711 = arith.addf %710, %709 : vector<8x32xf32>
    %712 = arith.divf %710, %711 : vector<8x32xf32>
    %713 = vector.extract_strided_slice %706 {offsets = [0, 32], sizes = [8, 32], strides = [1, 1]} : vector<8x128xf32> to vector<8x32xf32>
    %714 = arith.negf %713 : vector<8x32xf32>
    %715 = math.exp %714 : vector<8x32xf32>
    %cst_209 = arith.constant 1.000000e+00 : f32
    %716 = vector.broadcast %cst_209 : f32 to vector<8x32xf32>
    %717 = arith.addf %716, %715 : vector<8x32xf32>
    %718 = arith.divf %716, %717 : vector<8x32xf32>
    %719 = vector.extract_strided_slice %706 {offsets = [0, 64], sizes = [8, 32], strides = [1, 1]} : vector<8x128xf32> to vector<8x32xf32>
    %720 = math.tanh %719 : vector<8x32xf32>
    %721 = vector.extract_strided_slice %706 {offsets = [0, 96], sizes = [8, 32], strides = [1, 1]} : vector<8x128xf32> to vector<8x32xf32>
    %722 = arith.negf %721 : vector<8x32xf32>
    %723 = math.exp %722 : vector<8x32xf32>
    %cst_210 = arith.constant 1.000000e+00 : f32
    %724 = vector.broadcast %cst_210 : f32 to vector<8x32xf32>
    %725 = arith.addf %724, %723 : vector<8x32xf32>
    %726 = arith.divf %724, %725 : vector<8x32xf32>
    %727 = arith.mulf %718, %678 : vector<8x32xf32>
    %728 = arith.mulf %712, %720 : vector<8x32xf32>
    %729 = arith.addf %727, %728 : vector<8x32xf32>
    %730 = math.tanh %729 : vector<8x32xf32>
    %731 = arith.mulf %726, %730 : vector<8x32xf32>
    %cst_211 = arith.constant dense<0.000000e+00> : vector<8x64xf32>
    %732 = tpu.matmul %731, %432, %cst_211 {dimension_numbers = #tpu.dot_dimension_numbers<[1], [0], [0], [1], [0, 0, 1, 1], [], []>} : vector<8x32xf32>, vector<32x64xf32>, vector<8x64xf32> -> vector<8x64xf32>
    %733 = arith.addf %732, %445 : vector<8x64xf32>
    %cst_212 = arith.constant dense<0xFF800000> : vector<8xf32>
    %734 = vector.multi_reduction <maximumf>, %733, %cst_212 [1] : vector<8x64xf32> to vector<8xf32>
    %735 = vector.shape_cast %734 : vector<8xf32> to vector<8x1xf32>
    %736 = vector.broadcast %735 : vector<8x1xf32> to vector<8x64xf32>
    %737 = arith.subf %733, %736 : vector<8x64xf32>
    %738 = math.exp %737 : vector<8x64xf32>
    %cst_213 = arith.constant dense<0.000000e+00> : vector<8xf32>
    %739 = vector.multi_reduction <add>, %738, %cst_213 [1] : vector<8x64xf32> to vector<8xf32>
    %740 = vector.shape_cast %739 : vector<8xf32> to vector<8x1xf32>
    %741 = vector.broadcast %740 : vector<8x1xf32> to vector<8x64xf32>
    %742 = arith.divf %738, %741 : vector<8x64xf32>
    %cst_214 = arith.constant dense<0.000000e+00> : vector<8x32xf32>
    %743 = tpu.matmul %742, %410, %cst_214 {dimension_numbers = #tpu.dot_dimension_numbers<[1], [0], [0], [1], [0, 0, 1, 1], [], []>} : vector<8x64xf32>, vector<64x32xf32>, vector<8x32xf32> -> vector<8x32xf32>
    %cst_215 = arith.constant dense<0.000000e+00> : vector<8x32xf32>
    %744 = tpu.matmul %743, %442, %cst_215 {dimension_numbers = #tpu.dot_dimension_numbers<[1], [0], [0], [1], [0, 0, 1, 1], [], []>} : vector<8x32xf32>, vector<32x32xf32>, vector<8x32xf32> -> vector<8x32xf32>
    %cst_216 = arith.constant dense<0.000000e+00> : vector<8x32xf32>
    %745 = tpu.matmul %731, %443, %cst_216 {dimension_numbers = #tpu.dot_dimension_numbers<[1], [0], [0], [1], [0, 0, 1, 1], [], []>} : vector<8x32xf32>, vector<32x32xf32>, vector<8x32xf32> -> vector<8x32xf32>
    %746 = arith.addf %744, %745 : vector<8x32xf32>
    %747 = vector.broadcast %444 : vector<1x32xf32> to vector<8x32xf32>
    %748 = arith.addf %746, %747 : vector<8x32xf32>
    %749 = math.tanh %748 : vector<8x32xf32>
    %750 = arith.index_cast %702 : i32 to index
    %c0_217 = arith.constant 0 : index
    %751 = vector.load %arg28[%750, %c0_217] : memref<64x32xf32, #tpu.memory_space<vmem>>, vector<8x32xf32>
    tpu.vector_store %arg28[%750, %c0_217], %749 {strides = array<i32>} : memref<64x32xf32, #tpu.memory_space<vmem>>, vector<8x32xf32>,
    %c6_i32_218 = arith.constant 6 : i32
    %c8_i32_219 = arith.constant 8 : i32
    %752 = arith.muli %c6_i32_218, %c8_i32_219 : i32
    %753 = tpu.assume_multiple %752, 8 : i32
    %754 = arith.index_cast %753 : i32 to index
    %c0_220 = arith.constant 0 : index
    %755 = vector.load %arg30[%754, %c0_220] : memref<64x128xf32, #tpu.memory_space<vmem>>, vector<8x128xf32>
    %cst_221 = arith.constant dense<0.000000e+00> : vector<8x128xf32>
    %756 = tpu.matmul %749, %440, %cst_221 {dimension_numbers = #tpu.dot_dimension_numbers<[1], [0], [0], [1], [0, 0, 1, 1], [], []>} : vector<8x32xf32>, vector<32x128xf32>, vector<8x128xf32> -> vector<8x128xf32>
    %757 = arith.addf %755, %756 : vector<8x128xf32>
    %758 = vector.extract_strided_slice %757 {offsets = [0, 0], sizes = [8, 32], strides = [1, 1]} : vector<8x128xf32> to vector<8x32xf32>
    %759 = arith.negf %758 : vector<8x32xf32>
    %760 = math.exp %759 : vector<8x32xf32>
    %cst_222 = arith.constant 1.000000e+00 : f32
    %761 = vector.broadcast %cst_222 : f32 to vector<8x32xf32>
    %762 = arith.addf %761, %760 : vector<8x32xf32>
    %763 = arith.divf %761, %762 : vector<8x32xf32>
    %764 = vector.extract_strided_slice %757 {offsets = [0, 32], sizes = [8, 32], strides = [1, 1]} : vector<8x128xf32> to vector<8x32xf32>
    %765 = arith.negf %764 : vector<8x32xf32>
    %766 = math.exp %765 : vector<8x32xf32>
    %cst_223 = arith.constant 1.000000e+00 : f32
    %767 = vector.broadcast %cst_223 : f32 to vector<8x32xf32>
    %768 = arith.addf %767, %766 : vector<8x32xf32>
    %769 = arith.divf %767, %768 : vector<8x32xf32>
    %770 = vector.extract_strided_slice %757 {offsets = [0, 64], sizes = [8, 32], strides = [1, 1]} : vector<8x128xf32> to vector<8x32xf32>
    %771 = math.tanh %770 : vector<8x32xf32>
    %772 = vector.extract_strided_slice %757 {offsets = [0, 96], sizes = [8, 32], strides = [1, 1]} : vector<8x128xf32> to vector<8x32xf32>
    %773 = arith.negf %772 : vector<8x32xf32>
    %774 = math.exp %773 : vector<8x32xf32>
    %cst_224 = arith.constant 1.000000e+00 : f32
    %775 = vector.broadcast %cst_224 : f32 to vector<8x32xf32>
    %776 = arith.addf %775, %774 : vector<8x32xf32>
    %777 = arith.divf %775, %776 : vector<8x32xf32>
    %778 = arith.mulf %769, %729 : vector<8x32xf32>
    %779 = arith.mulf %763, %771 : vector<8x32xf32>
    %780 = arith.addf %778, %779 : vector<8x32xf32>
    %781 = math.tanh %780 : vector<8x32xf32>
    %782 = arith.mulf %777, %781 : vector<8x32xf32>
    %cst_225 = arith.constant dense<0.000000e+00> : vector<8x64xf32>
    %783 = tpu.matmul %782, %432, %cst_225 {dimension_numbers = #tpu.dot_dimension_numbers<[1], [0], [0], [1], [0, 0, 1, 1], [], []>} : vector<8x32xf32>, vector<32x64xf32>, vector<8x64xf32> -> vector<8x64xf32>
    %784 = arith.addf %783, %445 : vector<8x64xf32>
    %cst_226 = arith.constant dense<0xFF800000> : vector<8xf32>
    %785 = vector.multi_reduction <maximumf>, %784, %cst_226 [1] : vector<8x64xf32> to vector<8xf32>
    %786 = vector.shape_cast %785 : vector<8xf32> to vector<8x1xf32>
    %787 = vector.broadcast %786 : vector<8x1xf32> to vector<8x64xf32>
    %788 = arith.subf %784, %787 : vector<8x64xf32>
    %789 = math.exp %788 : vector<8x64xf32>
    %cst_227 = arith.constant dense<0.000000e+00> : vector<8xf32>
    %790 = vector.multi_reduction <add>, %789, %cst_227 [1] : vector<8x64xf32> to vector<8xf32>
    %791 = vector.shape_cast %790 : vector<8xf32> to vector<8x1xf32>
    %792 = vector.broadcast %791 : vector<8x1xf32> to vector<8x64xf32>
    %793 = arith.divf %789, %792 : vector<8x64xf32>
    %cst_228 = arith.constant dense<0.000000e+00> : vector<8x32xf32>
    %794 = tpu.matmul %793, %410, %cst_228 {dimension_numbers = #tpu.dot_dimension_numbers<[1], [0], [0], [1], [0, 0, 1, 1], [], []>} : vector<8x64xf32>, vector<64x32xf32>, vector<8x32xf32> -> vector<8x32xf32>
    %cst_229 = arith.constant dense<0.000000e+00> : vector<8x32xf32>
    %795 = tpu.matmul %794, %442, %cst_229 {dimension_numbers = #tpu.dot_dimension_numbers<[1], [0], [0], [1], [0, 0, 1, 1], [], []>} : vector<8x32xf32>, vector<32x32xf32>, vector<8x32xf32> -> vector<8x32xf32>
    %cst_230 = arith.constant dense<0.000000e+00> : vector<8x32xf32>
    %796 = tpu.matmul %782, %443, %cst_230 {dimension_numbers = #tpu.dot_dimension_numbers<[1], [0], [0], [1], [0, 0, 1, 1], [], []>} : vector<8x32xf32>, vector<32x32xf32>, vector<8x32xf32> -> vector<8x32xf32>
    %797 = arith.addf %795, %796 : vector<8x32xf32>
    %798 = vector.broadcast %444 : vector<1x32xf32> to vector<8x32xf32>
    %799 = arith.addf %797, %798 : vector<8x32xf32>
    %800 = math.tanh %799 : vector<8x32xf32>
    %801 = arith.index_cast %753 : i32 to index
    %c0_231 = arith.constant 0 : index
    %802 = vector.load %arg28[%801, %c0_231] : memref<64x32xf32, #tpu.memory_space<vmem>>, vector<8x32xf32>
    tpu.vector_store %arg28[%801, %c0_231], %800 {strides = array<i32>} : memref<64x32xf32, #tpu.memory_space<vmem>>, vector<8x32xf32>,
    %c7_i32_232 = arith.constant 7 : i32
    %c8_i32_233 = arith.constant 8 : i32
    %803 = arith.muli %c7_i32_232, %c8_i32_233 : i32
    %804 = tpu.assume_multiple %803, 8 : i32
    %805 = arith.index_cast %804 : i32 to index
    %c0_234 = arith.constant 0 : index
    %806 = vector.load %arg30[%805, %c0_234] : memref<64x128xf32, #tpu.memory_space<vmem>>, vector<8x128xf32>
    %cst_235 = arith.constant dense<0.000000e+00> : vector<8x128xf32>
    %807 = tpu.matmul %800, %440, %cst_235 {dimension_numbers = #tpu.dot_dimension_numbers<[1], [0], [0], [1], [0, 0, 1, 1], [], []>} : vector<8x32xf32>, vector<32x128xf32>, vector<8x128xf32> -> vector<8x128xf32>
    %808 = arith.addf %806, %807 : vector<8x128xf32>
    %809 = vector.extract_strided_slice %808 {offsets = [0, 0], sizes = [8, 32], strides = [1, 1]} : vector<8x128xf32> to vector<8x32xf32>
    %810 = arith.negf %809 : vector<8x32xf32>
    %811 = math.exp %810 : vector<8x32xf32>
    %cst_236 = arith.constant 1.000000e+00 : f32
    %812 = vector.broadcast %cst_236 : f32 to vector<8x32xf32>
    %813 = arith.addf %812, %811 : vector<8x32xf32>
    %814 = arith.divf %812, %813 : vector<8x32xf32>
    %815 = vector.extract_strided_slice %808 {offsets = [0, 32], sizes = [8, 32], strides = [1, 1]} : vector<8x128xf32> to vector<8x32xf32>
    %816 = arith.negf %815 : vector<8x32xf32>
    %817 = math.exp %816 : vector<8x32xf32>
    %cst_237 = arith.constant 1.000000e+00 : f32
    %818 = vector.broadcast %cst_237 : f32 to vector<8x32xf32>
    %819 = arith.addf %818, %817 : vector<8x32xf32>
    %820 = arith.divf %818, %819 : vector<8x32xf32>
    %821 = vector.extract_strided_slice %808 {offsets = [0, 64], sizes = [8, 32], strides = [1, 1]} : vector<8x128xf32> to vector<8x32xf32>
    %822 = math.tanh %821 : vector<8x32xf32>
    %823 = vector.extract_strided_slice %808 {offsets = [0, 96], sizes = [8, 32], strides = [1, 1]} : vector<8x128xf32> to vector<8x32xf32>
    %824 = arith.negf %823 : vector<8x32xf32>
    %825 = math.exp %824 : vector<8x32xf32>
    %cst_238 = arith.constant 1.000000e+00 : f32
    %826 = vector.broadcast %cst_238 : f32 to vector<8x32xf32>
    %827 = arith.addf %826, %825 : vector<8x32xf32>
    %828 = arith.divf %826, %827 : vector<8x32xf32>
    %829 = arith.mulf %820, %780 : vector<8x32xf32>
    %830 = arith.mulf %814, %822 : vector<8x32xf32>
    %831 = arith.addf %829, %830 : vector<8x32xf32>
    %832 = math.tanh %831 : vector<8x32xf32>
    %833 = arith.mulf %828, %832 : vector<8x32xf32>
    %cst_239 = arith.constant dense<0.000000e+00> : vector<8x64xf32>
    %834 = tpu.matmul %833, %432, %cst_239 {dimension_numbers = #tpu.dot_dimension_numbers<[1], [0], [0], [1], [0, 0, 1, 1], [], []>} : vector<8x32xf32>, vector<32x64xf32>, vector<8x64xf32> -> vector<8x64xf32>
    %835 = arith.addf %834, %445 : vector<8x64xf32>
    %cst_240 = arith.constant dense<0xFF800000> : vector<8xf32>
    %836 = vector.multi_reduction <maximumf>, %835, %cst_240 [1] : vector<8x64xf32> to vector<8xf32>
    %837 = vector.shape_cast %836 : vector<8xf32> to vector<8x1xf32>
    %838 = vector.broadcast %837 : vector<8x1xf32> to vector<8x64xf32>
    %839 = arith.subf %835, %838 : vector<8x64xf32>
    %840 = math.exp %839 : vector<8x64xf32>
    %cst_241 = arith.constant dense<0.000000e+00> : vector<8xf32>
    %841 = vector.multi_reduction <add>, %840, %cst_241 [1] : vector<8x64xf32> to vector<8xf32>
    %842 = vector.shape_cast %841 : vector<8xf32> to vector<8x1xf32>
    %843 = vector.broadcast %842 : vector<8x1xf32> to vector<8x64xf32>
    %844 = arith.divf %840, %843 : vector<8x64xf32>
    %cst_242 = arith.constant dense<0.000000e+00> : vector<8x32xf32>
    %845 = tpu.matmul %844, %410, %cst_242 {dimension_numbers = #tpu.dot_dimension_numbers<[1], [0], [0], [1], [0, 0, 1, 1], [], []>} : vector<8x64xf32>, vector<64x32xf32>, vector<8x32xf32> -> vector<8x32xf32>
    %cst_243 = arith.constant dense<0.000000e+00> : vector<8x32xf32>
    %846 = tpu.matmul %845, %442, %cst_243 {dimension_numbers = #tpu.dot_dimension_numbers<[1], [0], [0], [1], [0, 0, 1, 1], [], []>} : vector<8x32xf32>, vector<32x32xf32>, vector<8x32xf32> -> vector<8x32xf32>
    %cst_244 = arith.constant dense<0.000000e+00> : vector<8x32xf32>
    %847 = tpu.matmul %833, %443, %cst_244 {dimension_numbers = #tpu.dot_dimension_numbers<[1], [0], [0], [1], [0, 0, 1, 1], [], []>} : vector<8x32xf32>, vector<32x32xf32>, vector<8x32xf32> -> vector<8x32xf32>
    %848 = arith.addf %846, %847 : vector<8x32xf32>
    %849 = vector.broadcast %444 : vector<1x32xf32> to vector<8x32xf32>
    %850 = arith.addf %848, %849 : vector<8x32xf32>
    %851 = math.tanh %850 : vector<8x32xf32>
    %852 = arith.index_cast %804 : i32 to index
    %c0_245 = arith.constant 0 : index
    %853 = vector.load %arg28[%852, %c0_245] : memref<64x32xf32, #tpu.memory_space<vmem>>, vector<8x32xf32>
    tpu.vector_store %arg28[%852, %c0_245], %851 {strides = array<i32>} : memref<64x32xf32, #tpu.memory_space<vmem>>, vector<8x32xf32>,
    %c8_i32_246 = arith.constant 8 : i32
    %c0_247 = arith.constant 0 : index
    %854 = memref.load %arg25[%c0_247] : memref<1xf32, #tpu.memory_space<smem>>
    %c0_248 = arith.constant 0 : index
    %c0_249 = arith.constant 0 : index
    %855 = vector.load %arg22[%c0_248, %c0_249] : memref<64x32xf32, #tpu.memory_space<vmem>>, vector<64x32xf32>
    %c0_250 = arith.constant 0 : index
    %c0_251 = arith.constant 0 : index
    %856 = vector.load %arg23[%c0_250, %c0_251] : memref<32x128xf32, #tpu.memory_space<vmem>>, vector<32x128xf32>
    %cst_252 = arith.constant dense<0.000000e+00> : vector<64x128xf32>
    %857 = tpu.matmul %855, %856, %cst_252 {dimension_numbers = #tpu.dot_dimension_numbers<[1], [0], [0], [1], [0, 0, 1, 1], [], []>} : vector<64x32xf32>, vector<32x128xf32>, vector<64x128xf32> -> vector<64x128xf32>
    %c0_253 = arith.constant 0 : index
    %c0_254 = arith.constant 0 : index
    %858 = vector.load %arg24[%c0_253, %c0_254] : memref<1x128xf32, #tpu.memory_space<vmem>>, vector<1x128xf32>
    %859 = vector.broadcast %858 : vector<1x128xf32> to vector<64x128xf32>
    %860 = arith.addf %857, %859 : vector<64x128xf32>
    %c0_255 = arith.constant 0 : index
    %c0_256 = arith.constant 0 : index
    %861 = vector.load %arg28[%c0_255, %c0_256] : memref<64x32xf32, #tpu.memory_space<vmem>>, vector<64x32xf32>
    %c0_257 = arith.constant 0 : index
    %c0_258 = arith.constant 0 : index
    %862 = vector.load %arg20[%c0_257, %c0_258] : memref<32x128xf32, #tpu.memory_space<vmem>>, vector<32x128xf32>
    %cst_259 = arith.constant dense<0.000000e+00> : vector<64x128xf32>
    %863 = tpu.matmul %861, %862, %cst_259 {dimension_numbers = #tpu.dot_dimension_numbers<[1], [0], [0], [1], [0, 0, 1, 1], [], []>} : vector<64x32xf32>, vector<32x128xf32>, vector<64x128xf32> -> vector<64x128xf32>
    %c0_260 = arith.constant 0 : index
    %c0_261 = arith.constant 0 : index
    %864 = vector.load %arg21[%c0_260, %c0_261] : memref<1x128xf32, #tpu.memory_space<vmem>>, vector<1x128xf32>
    %865 = vector.broadcast %864 : vector<1x128xf32> to vector<64x128xf32>
    %866 = arith.addf %863, %865 : vector<64x128xf32>
    %867 = vector.broadcast %854 : f32 to vector<64x128xf32>
    %868 = arith.mulf %867, %860 : vector<64x128xf32>
    %869 = arith.addf %866, %868 : vector<64x128xf32>
    %c0_262 = arith.constant 0 : index
    %c0_263 = arith.constant 0 : index
    %870 = vector.load %arg26[%c0_262, %c0_263] : memref<64x128xf32, #tpu.memory_space<vmem>>, vector<64x128xf32>
    tpu.vector_store %arg26[%c0_262, %c0_263], %869 {strides = array<i32>} : memref<64x128xf32, #tpu.memory_space<vmem>>, vector<64x128xf32>,
    %cst_264 = arith.constant dense<0xFF800000> : vector<64xf32>
    %871 = vector.multi_reduction <maximumf>, %869, %cst_264 [1] : vector<64x128xf32> to vector<64xf32>
    %872 = vector.shape_cast %871 : vector<64xf32> to vector<64x1xf32>
    %873 = vector.broadcast %872 : vector<64x1xf32> to vector<64x128xf32>
    %874 = arith.subf %869, %873 : vector<64x128xf32>
    %875 = math.exp %874 : vector<64x128xf32>
    %cst_265 = arith.constant dense<0.000000e+00> : vector<64xf32>
    %876 = vector.multi_reduction <add>, %875, %cst_265 [1] : vector<64x128xf32> to vector<64xf32>
    %877 = vector.shape_cast %876 : vector<64xf32> to vector<64x1xf32>
    %878 = vector.broadcast %877 : vector<64x1xf32> to vector<64x128xf32>
    %879 = arith.divf %875, %878 : vector<64x128xf32>
    %c0_266 = arith.constant 0 : index
    %c0_267 = arith.constant 0 : index
    %880 = vector.load %arg27[%c0_266, %c0_267] : memref<64x128xf32, #tpu.memory_space<vmem>>, vector<64x128xf32>
    tpu.vector_store %arg27[%c0_266, %c0_267], %879 {strides = array<i32>} : memref<64x128xf32, #tpu.memory_space<vmem>>, vector<64x128xf32>,
    return
  }
}

</mosaic_0001>

<bundles_post_ra>
// kernel: fused_seq_model_forward.1
= control target key start
LH: loop header
LB: loop body
LE: loop exit
PB: predicated region body
PF: predicated region fallthrough
CT: control target
= control target key end

     0   :  { %v7915_v2 = vmov 0.0|0.0   ;;  %vm106_vm0 = vcmask 261120   ;;  %vm7916_vm1 = vmmov 0   ;;  %v7917_v4 = vmov 0.0   ;;  %s9353_s2 = inlined_call_operand.vmem [shape: f32[32,128], index: 2, kind: input, shape index: {}]   ;;  %s9354_s3 = inlined_call_operand.vmem [shape: f32[32,128], index: 3, kind: input, shape index: {}]   ;;  %s9355_s0 = inlined_call_operand.vmem [shape: f32[64,32], index: 0, kind: input, shape index: {}]   ;;  %s9356_s1 = inlined_call_operand.vmem [shape: f32[64,1], index: 1, kind: input, shape index: {}]   ;;  %s9357_s4 = inlined_call_operand.vmem [shape: f32[1,128], index: 4, kind: input, shape index: {}]   ;;  %s9358_s8 = inlined_call_operand.vmem [shape: f32[64,32], index: 8, kind: input, shape index: {}]   ;;  %s9359_s7 = inlined_call_operand.vmem [shape: f32[8,32], index: 7, kind: input, shape index: {}]   ;;  %s9360_s5 = inlined_call_operand.vmem [shape: f32[32,32], index: 5, kind: input, shape index: {}]   ;;  %s9361_s10 = inlined_call_operand.vmem [shape: f32[64,32], index: 10, kind: input, shape index: {}]   ;;  %s9362_s16 = inlined_call_operand.vmem [shape: f32[32,32], index: 16, kind: input, shape index: {}]   ;;  %s9363_s13 = inlined_call_operand.vmem [shape: f32[32,128], index: 13, kind: input, shape index: {}]   ;;  %s9364_s9 = inlined_call_operand.vmem [shape: f32[1,32], index: 9, kind: input, shape index: {}]   ;;  %s9365_s12 = inlined_call_operand.vmem [shape: f32[64,32], index: 12, kind: input, shape index: {}]   ;;  %s9366_s6 = inlined_call_operand.vmem [shape: f32[1,32], index: 6, kind: input, shape index: {}]   ;;  %s9367_s14 = inlined_call_operand.vmem [shape: f32[32,128], index: 14, kind: input, shape index: {}]   ;;  %s9368_s11 = inlined_call_operand.vmem [shape: f32[1,32], index: 11, kind: input, shape index: {}]   ;;  %s9369_s15 = inlined_call_operand.vmem [shape: f32[1,128], index: 15, kind: input, shape index: {}]   ;;  %s9370_s17 = inlined_call_operand.vmem [shape: f32[8,64], index: 17, kind: input, shape index: {}]   ;;  %s9371_s18 = inlined_call_operand.vmem [shape: f32[64,32], index: 18, kind: input, shape index: {}]   ;;  %s9372_s19 = inlined_call_operand.vmem [shape: f32[1,32], index: 19, kind: input, shape index: {}]   ;;  %s9373_s28 = inlined_call_operand.vmem [shape: f32[64,32], index: 28, kind: output, shape index: {2}]   ;;  %s9374_s23 = inlined_call_operand.vmem [shape: f32[32,128], index: 23, kind: input, shape index: {}]   ;;  %s9375_s22 = inlined_call_operand.vmem [shape: f32[64,32], index: 22, kind: input, shape index: {}]   ;;  %s9376_s20 = inlined_call_operand.vmem [shape: f32[32,128], index: 20, kind: input, shape index: {}]   ;;  %s9377_s24 = inlined_call_operand.vmem [shape: f32[1,128], index: 24, kind: input, shape index: {}]   ;;  %s9378_s25 = inlined_call_operand.<no memory space> [shape: f32[1], index: 25, kind: input, shape index: {}]   ;;  %s9379_s21 = inlined_call_operand.vmem [shape: f32[1,128], index: 21, kind: input, shape index: {}]   ;;  %s9380_s26 = inlined_call_operand.vmem [shape: f32[64,128], index: 26, kind: output, shape index: {0}]   ;;  %s9381_s27 = inlined_call_operand.vmem [shape: f32[64,128], index: 27, kind: output, shape index: {1}]  }
   0x1   :  { %9392 = sst [smem:[#allocation6_spill]] %s9353_s2  ;;  %7211 = vmatprep.subr.bf16.mxu1 %v7915_v2  ;;  %6411 = vmatprep.mubr.msk.f32.mxu1 %vm7916_vm1, %v7917_v4  ;;  %v7918_v16 = vmov 0   ;;  %vm8540_vm2 = vmpackc.low %vm106_vm0, %vm106_vm0  ;;  %vm2293_vm3 = vcmask 523264  }
   0x2   :  { %9393 = sst [smem:[#allocation7_spill]] %s9354_s3  ;;  %7702 = vset.pattern.permute.xlu1 %v7918_v16  ;;  %7703 = vset.pattern.permute.xlu0 %v7918_v16 }
   0x3   :  { %9394 = sst [smem:[#allocation8_spill]] %s9355_s0  ;;  %s9406_s0 = sld [smem:[#allocation7_spill]] }
   0x4   :  { %9395 = sst [smem:[#allocation9_spill]] %s9356_s1 }
   0x5   :  { %9396 = sst [smem:[#allocation10_spill]] %s9357_s4  ;;  %s9408_s2 = sld [smem:[#allocation9_spill]] }
   0x6   :  { %9397 = sst [smem:[#allocation11_spill]] %s9358_s8  ;;  %s9407_s8 = sld [smem:[#allocation8_spill]] }
   0x7   :  { %9398 = sst [smem:[#allocation12_spill]] %s9359_s7  ;;  %s9409_s1 = sld [smem:[#allocation10_spill]] }
   0x8   :  { %9399 = sst [smem:[#allocation13_spill]] %s9360_s5  ;;  %s7919_s4 = smov 64  }
   0x9   :  { %9400 = sst [smem:[#allocation14_spill]] %s9361_s10  ;;  %v244_v3 = vld [vmem:[%s9406_s0] sm:$0xff]  ;;  %v245_v6 = vld [vmem:[%s9406_s0 + $0x8] sm:$0xff]  ;;  %v246_v12 = vld [vmem:[%s9406_s0 + $0x10] sm:$0xff]  ;;  %s7920_s10 = smov 32  }
   0xa   :  { %9401 = sst [smem:[#allocation15_spill]] %s9362_s16  ;;  %s9405_s16 = sld [smem:[#allocation6_spill]]  ;;  %v8088_v9 = vpack.c.bf16 %v245_v6, %v244_v3  ;;  %v247_v13 = vld [vmem:[%s9406_s0 + $0x18] sm:$0xff] }
   0xb   :  { %9402 = sst [smem:[#allocation16_spill]] %s9363_s13  ;;  %v8101_v14 = vpack.c.bf16 %v247_v13, %v246_v12  ;;  %v8125_v17 = vld [vmem:[%s9408_s2] sm:$0xff]  ;;  %v8154_v50 = vld [vmem:[%s9408_s2 + $0x8] sm:$0xff]  ;;  %s9410_s13 = sld [smem:[#allocation11_spill]] }
   0xc   :  { %9403 = sst [smem:[#allocation17_spill]] %s9364_s9  ;;  %v87_v11 = vld [vmem:[%s9407_s8] sm:$0xff]  ;;  %7213 = vmatpush3.bf16.msra.mxu1 %v8088_v9  ;;  %v88_v15 = vld [vmem:[%s9407_s8 + $0x8] sm:$0xff]  ;;  %355 = vperm.xlu1 %7702, %v8125_v17   ;;  %v359_v18 = vsub.f32 1.0, %v8125_v17  ;;  %v485_v57 = vsub.f32 1.0, %v8154_v50  ;;  %v89_v63 = vld [vmem:[%s9407_s8 + $0x10] sm:$0xff] }
   0xd   :  { %9404 = sst [smem:[#allocation18_spill]] %s9365_s12  ;;  %6391 = vmatprep.mubr.msk.f32.mxu0 %vm106_vm0, %v87_v11  ;;  %7214 = vmatprep.subr.bf16.mxu1 %v7915_v2  ;;  %v8132_v19 = vld [vmem:[%s9409_s1] ss:$0 sm:$0xff]  ;;  %v92_v3 = vld [vmem:[%s9407_s8 + $0x28] sm:$0xff]  ;;  %s9412_s30 = sld [smem:[#allocation13_spill]] }
   0xe   :  { %s7921_s9 = smov 96   ;;  %s9413_s5 = sld [smem:[#allocation14_spill]] }
   0xf   :  { %s9414_s3 = sld [smem:[#allocation15_spill]]  ;;  %s9415_s12 = sld [smem:[#allocation16_spill]] }
  0x10   :  { %v95_v0 = vld [vmem:[%s9405_s16] sm:$0xff]  ;;  %v96_v1 = vld [vmem:[%s9405_s16 + $0x8] sm:$0xff]  ;;  %v97_v7 = vld [vmem:[%s9405_s16 + $0x10] sm:$0xff]  ;;  %7216 = vmatpush3.bf16.msra.mxu1 %v8101_v14  ;;  %362 = vperm.xlu1 %7702, %v359_v18   ;;  %s9417_s29 = sld [smem:[#allocation18_spill]] }
  0x11   :  { %v7203_v5 = vpack.c.bf16 %v96_v1, %v95_v0  ;;  %v98_v8 = vld [vmem:[%s9405_s16 + $0x18] sm:$0xff]  ;;  %7217 = vmatprep.subr.bf16.mxu1 %v7915_v2  ;;  %v91_v1 = vld [vmem:[%s9407_s8 + $0x20] sm:$0xff]  ;;  %s9411_s16 = sld [smem:[#allocation12_spill]] }
  0x12   :  { %v7207_v10 = vpack.c.bf16 %v98_v8, %v97_v7  ;;  %v90_v0 = vld [vmem:[%s9407_s8 + $0x18] sm:$0xff] }
  0x13   :  { %7204 = vmatprep.subr.bf16.mxu0 %v7203_v5  ;;  %6412 = vmatmul.mubr.f32.vlgmr.msra.gmra.mrb[0].mxu1 %v7917_v4  ;;  %v94_v7 = vld [vmem:[%s9407_s8 + $0x38] sm:$0xff] }
  0x14   :  { %7206 = vmatpush3.bf16.msra.mxu0 %v7203_v5  ;;  %7219 = vmatpush3.bf16.msra.mxu1 %v8088_v9  ;;  %v93_v5 = vld [vmem:[%s9407_s8 + $0x30] sm:$0xff] }
  0x15   :  { %7208 = vmatprep.subr.bf16.mxu0 %v7207_v10  ;;  %6422 = vmatprep.mubr.msk.f32.mxu1 %vm7916_vm1, %v7917_v4 }
  0x16   :  { %7220 = vmatprep.subr.bf16.mxu1 %v7915_v2 }
  0x18   :  { %7210 = vmatpush3.bf16.msra.mxu0 %v7207_v10  ;;  %7222 = vmatpush3.bf16.msra.mxu1 %v8101_v14 }
  0x19   :  { %7223 = vmatprep.subr.bf16.mxu0 %v7915_v2  ;;  %7229 = vmatprep.subr.bf16.mxu1 %v7915_v2 }
  0x1b   :  { %6392 = vmatmul.mubr.msk.f32.vlgmr.msra.gmra.mrb[0].mxu0 %vm106_vm0, %v88_v15 }
  0x1c   :  { %7225 = vmatpush3.bf16.msra.mxu0 %v8088_v9  ;;  %6394 = vmatprep.mubr.msk.f32.mxu0 %vm106_vm0, %v89_v63 }
  0x1d   :  { %7226 = vmatprep.subr.bf16.mxu0 %v7915_v2 }
  0x1f   :  { %6395 = vmatmul.mubr.msk.f32.gmra.mrb[2].mxu0 %vm106_vm0, %v90_v0 }
  0x20   :  { %7228 = vmatpush3.bf16.msra.mxu0 %v8101_v14  ;;  %6397 = vmatprep.mubr.msk.f32.mxu0 %vm106_vm0, %v91_v1 }
  0x21   :  { %7235 = vmatprep.subr.bf16.mxu0 %v7915_v2 }
  0x23   :  { %6398 = vmatmul.mubr.msk.f32.gmra.mrb[4].mxu0 %vm106_vm0, %v92_v3 }
  0x24   :  { %6400 = vmatprep.mubr.msk.f32.mxu0 %vm106_vm0, %v93_v5 }
  0x27   :  { %6401 = vmatmul.mubr.msk.f32.gmra.mrb[6].mxu0 %vm106_vm0, %v94_v7 }
  0x28   :  { %6433 = vmatprep.mubr.msk.f32.mxu0 %vm7916_vm1, %v7917_v4 }
  0x8b   :  { %v356_v37 = vpop.permute.xlu1 %355 }
  0x8f   :  { %v363_v38 = vpop.permute.xlu1 %362 }
  0x90   :  { %v365_v41 = vmul.f32 0.0, %v363_v38 }
  0xe6   :  { %v318_v21 = vpop.f32.mrb[0].mxu1 }
  0xe7   :  { %v6413_v23 = vpop.f32.mrb[1].mxu1 }
  0xee   :  { %v6393_v20 = vpop.f32.mrb[0].mxu0 }
  0xef   :  { %v197_v22 = vpop.f32.mrb[1].mxu0  ;;  %v203_v45 = vadd.f32 %v6393_v20, %v8132_v19 }
  0xf0   :  { %v198_v24 = vadd.f32 %v8132_v19, %v197_v22 }
  0xf2   :  { %v322_v25 = vadd.f32 %v318_v21, %v198_v24  ;;  %v6396_v18 = vpop.f32.mrb[2].mxu0 }
  0xf3   :  { %v207_v20 = vpop.f32.mrb[3].mxu0 }
  0xf4   :  { %7704 = vtanh.f32 %v322_v25  ;;  %v5795_v27 = vmul.f32 -1.442695, %v322_v25 }
  0xf6   :  { %7706 = vpow2.f32 %v5795_v27  ;;  %v8190_v21 = vpop.f32.mrb[4].mxu0 }
  0xf7   :  { %v8192_v22 = vpop.f32.mrb[5].mxu0 }
  0xfa   :  { %v8194_v23 = vpop.f32.mrb[6].mxu0 }
  0xfb   :  { %v8196_v24 = vpop.f32.mrb[7].mxu0 }
  0xfe   :  { %v7705_v26 = vpop.eup %7704 }
  0xff   :  { %332 = vrot.lane.b32.xlu0 %v7705_v26, %s7919_s4  ;;  %v208_v26 = vadd.f32 %v8132_v19, %v207_v20 }
 0x100   :  { %v7707_v28 = vpop.eup %7706 }
 0x101   :  { %v326_v29 = vadd.f32 1.0, %v7707_v28 }
 0x103   :  { %7708 = vrcp.f32 %v326_v29 }
 0x10d   :  { %v7709_v30 = vpop.eup %7708 }
 0x10e   :  { %v330_v33 = vmul.f32 0.0, %v7709_v30 }
 0x171   :  { %v333_v31 = vpop.permute.xlu0 %332 }
 0x172   :  { %v335_v32 = vmul.f32 %v7709_v30, %v333_v31  ;;  %v8210_v31 = vld [vmem:[%s9408_s2 + $0x10] sm:$0xff] }
 0x173   :  { %v612_v38 = vsub.f32 1.0, %v8210_v31 }
 0x174   :  { %337 = vrot.lane.b32.xlu0 %v335_v32, %s7920_s10 }
 0x1e6   :  { %v338_v34 = vpop.permute.xlu0 %337 }
 0x1e7   :  { %v340_v35 = vadd.f32 %v338_v34, %v330_v33 }
 0x1e9   :  { %7710 = vtanh.f32 %v340_v35  ;;  %v367_v58 = vmul.f32 %v356_v37, %v340_v35 }
 0x1eb   :  { %v368_v59 = vadd.f32 %v367_v58, %v365_v41 }
 0x1f3   :  { %v7711_v36 = vpop.eup %7710 }
 0x1f4   :  { %343 = vrot.lane.b32.xlu0 %v7711_v36, %s7919_s4 }
 0x266   :  { %v344_v39 = vpop.permute.xlu0 %343 }
 0x267   :  { %v8138_v40 = vmul.f32 %v7709_v30, %v344_v39 }
 0x269   :  { %v358_v42 = vmul.f32 %v356_v37, %v8138_v40 }
 0x26b   :  { %v366_v43 = vadd.f32 %v365_v41, %v358_v42 }
 0x26d   :  { %372 = vrot.lane.b32.xlu1 %v366_v43, %s7920_s10 }
 0x2df   :  { %v373_v44 = vpop.permute.xlu1 %372 }
 0x2e0   :  { %6423 = vmatmul.mubr.msk.f32.vlgmr.msra.gmra.mrb[2].mxu1 %vm106_vm0, %v373_v44 }
 0x2e1   :  { %7231 = vmatpush3.bf16.msra.mxu1 %v8088_v9  ;;  %6444 = vmatprep.mubr.msk.f32.mxu1 %vm7916_vm1, %v7917_v4 }
 0x2e2   :  { %7232 = vmatprep.subr.bf16.mxu1 %v7915_v2 }
 0x2e5   :  { %7234 = vmatpush3.bf16.msra.mxu1 %v8101_v14 }
 0x2e6   :  { %7241 = vmatprep.subr.bf16.mxu1 %v7915_v2 }
 0x3b3   :  { %v442_v46 = vpop.f32.mrb[2].mxu1 }
 0x3b4   :  { %v446_v47 = vadd.f32 %v442_v46, %v203_v45  ;;  %v6424_v48 = vpop.f32.mrb[3].mxu1 }
 0x3b6   :  { %7712 = vtanh.f32 %v446_v47  ;;  %v5797_v51 = vmul.f32 -1.442695, %v446_v47 }
 0x3b8   :  { %7714 = vpow2.f32 %v5797_v51 }
 0x3c0   :  { %v7713_v49 = vpop.eup %7712 }
 0x3c1   :  { %456 = vrot.lane.b32.xlu0 %v7713_v49, %s7919_s4 }
 0x3c2   :  { %v7715_v52 = vpop.eup %7714 }
 0x3c3   :  { %v450_v53 = vadd.f32 1.0, %v7715_v52 }
 0x3c5   :  { %481 = vperm.xlu0 %7703, %v8154_v50   ;;  %7716 = vrcp.f32 %v450_v53 }
 0x3cf   :  { %v7717_v54 = vpop.eup %7716 }
 0x3d0   :  { %v454_v60 = vmul.f32 %v7717_v54, %v368_v59 }
 0x433   :  { %v457_v55 = vpop.permute.xlu0 %456 }
 0x434   :  { %v459_v56 = vmul.f32 %v7717_v54, %v457_v55 }
 0x436   :  { %461 = vrot.lane.b32.xlu1 %v459_v56, %s7920_s10  ;;  %v213_v56 = vadd.f32 %v6396_v18, %v8132_v19 }
 0x43a   :  { %488 = vperm.xlu1 %7702, %v485_v57  }
 0x444   :  { %v482_v12 = vpop.permute.xlu0 %481 }
 0x4a8   :  { %v462_v61 = vpop.permute.xlu1 %461 }
 0x4a9   :  { %v464_v62 = vadd.f32 %v462_v61, %v454_v60  ;;  %v8232_v61 = vld [vmem:[%s9408_s2 + $0x18] sm:$0xff] }
 0x4ab   :  { %7718 = vtanh.f32 %v464_v62  ;;  %v493_v41 = vmul.f32 %v482_v12, %v464_v62 }
 0x4b5   :  { %v7719_v6 = vpop.eup %7718 }
 0x4b6   :  { %467 = vrot.lane.b32.xlu1 %v7719_v6, %s7919_s4  ;;  %v739_v6 = vsub.f32 1.0, %v8232_v61 }
 0x4b9   :  { %v489_v8 = vpop.permute.xlu1 %488 }
 0x4ba   :  { %v491_v13 = vmul.f32 %v489_v8, %v366_v43  ;;  %v494_v39 = vmul.f32 %v489_v8, %v368_v59 }
 0x4bc   :  { %v495_v42 = vadd.f32 %v494_v39, %v493_v41 }
 0x528   :  { %v468_v10 = vpop.permute.xlu1 %467 }
 0x529   :  { %v8186_v11 = vmul.f32 %v7717_v54, %v468_v10 }
 0x52b   :  { %v484_v15 = vmul.f32 %v482_v12, %v8186_v11 }
 0x52d   :  { %v492_v16 = vadd.f32 %v491_v13, %v484_v15 }
 0x52f   :  { %499 = vrot.lane.b32.xlu0 %v492_v16, %s7920_s10 }
 0x5a1   :  { %v500_v25 = vpop.permute.xlu0 %499 }
 0x5a2   :  { %6434 = vmatmul.mubr.msk.f32.vlgmr.msra.gmra.mrb[8].mxu0 %vm106_vm0, %v500_v25 }
 0x5a3   :  { %7237 = vmatpush3.bf16.msra.mxu0 %v8088_v9  ;;  %6455 = vmatprep.mubr.msk.f32.mxu0 %vm7916_vm1, %v7917_v4 }
 0x5a4   :  { %7238 = vmatprep.subr.bf16.mxu0 %v7915_v2 }
 0x5a7   :  { %7240 = vmatpush3.bf16.msra.mxu0 %v8101_v14 }
 0x5a8   :  { %7247 = vmatprep.subr.bf16.mxu0 %v7915_v2 }
 0x675   :  { %v569_v27 = vpop.f32.mrb[8].mxu0 }
 0x676   :  { %v573_v28 = vadd.f32 %v569_v27, %v208_v26  ;;  %v6435_v29 = vpop.f32.mrb[9].mxu0 }
 0x678   :  { %7720 = vtanh.f32 %v573_v28  ;;  %v5800_v32 = vmul.f32 -1.442695, %v573_v28 }
 0x67a   :  { %7722 = vpow2.f32 %v5800_v32  ;;  %v218_v32 = vadd.f32 %v8132_v19, %v8192_v22 }
 0x682   :  { %v7721_v30 = vpop.eup %7720 }
 0x683   :  { %583 = vrot.lane.b32.xlu1 %v7721_v30, %s7919_s4 }
 0x684   :  { %v7723_v33 = vpop.eup %7722 }
 0x685   :  { %v577_v34 = vadd.f32 1.0, %v7723_v33 }
 0x687   :  { %608 = vperm.xlu1 %7702, %v8210_v31   ;;  %7724 = vrcp.f32 %v577_v34 }
 0x691   :  { %v7725_v35 = vpop.eup %7724 }
 0x692   :  { %v581_v43 = vmul.f32 %v7725_v35, %v495_v42 }
 0x6f5   :  { %v584_v36 = vpop.permute.xlu1 %583 }
 0x6f6   :  { %v586_v37 = vmul.f32 %v7725_v35, %v584_v36 }
 0x6f8   :  { %588 = vrot.lane.b32.xlu0 %v586_v37, %s7920_s10  ;;  %v8254_v37 = vld [vmem:[%s9408_s2 + $0x20] sm:$0xff] }
 0x6fc   :  { %615 = vperm.xlu0 %7703, %v612_v38  }
 0x706   :  { %v609_v47 = vpop.permute.xlu1 %608 }
 0x76a   :  { %v589_v44 = vpop.permute.xlu0 %588 }
 0x76b   :  { %v591_v45 = vadd.f32 %v589_v44, %v581_v43  ;;  %v866_v44 = vsub.f32 1.0, %v8254_v37 }
 0x76d   :  { %7726 = vtanh.f32 %v591_v45  ;;  %v620_v8 = vmul.f32 %v609_v47, %v591_v45 }
 0x777   :  { %v7727_v46 = vpop.eup %7726 }
 0x778   :  { %594 = vrot.lane.b32.xlu1 %v7727_v46, %s7919_s4 }
 0x77b   :  { %v616_v48 = vpop.permute.xlu0 %615 }
 0x77c   :  { %v618_v52 = vmul.f32 %v616_v48, %v492_v16  ;;  %v621_v7 = vmul.f32 %v616_v48, %v495_v42 }
 0x77e   :  { %v622_v10 = vadd.f32 %v621_v7, %v620_v8 }
 0x7ea   :  { %v595_v49 = vpop.permute.xlu1 %594 }
 0x7eb   :  { %v8216_v51 = vmul.f32 %v7725_v35, %v595_v49 }
 0x7ed   :  { %v611_v53 = vmul.f32 %v609_v47, %v8216_v51 }
 0x7ef   :  { %v619_v54 = vadd.f32 %v618_v52, %v611_v53 }
 0x7f1   :  { %626 = vrot.lane.b32.xlu0 %v619_v54, %s7920_s10 }
 0x863   :  { %v627_v55 = vpop.permute.xlu0 %626 }
 0x864   :  { %6445 = vmatmul.mubr.msk.f32.vlgmr.msra.gmra.mrb[4].mxu1 %vm106_vm0, %v627_v55 }
 0x865   :  { %7243 = vmatpush3.bf16.msra.mxu1 %v8088_v9  ;;  %6466 = vmatprep.mubr.msk.f32.mxu1 %vm7916_vm1, %v7917_v4 }
 0x866   :  { %7244 = vmatprep.subr.bf16.mxu1 %v7915_v2 }
 0x869   :  { %7246 = vmatpush3.bf16.msra.mxu1 %v8101_v14 }
 0x86a   :  { %7253 = vmatprep.subr.bf16.mxu1 %v7915_v2 }
 0x937   :  { %v696_v57 = vpop.f32.mrb[4].mxu1 }
 0x938   :  { %v700_v58 = vadd.f32 %v696_v57, %v213_v56  ;;  %v6446_v59 = vpop.f32.mrb[5].mxu1 }
 0x93a   :  { %7728 = vtanh.f32 %v700_v58  ;;  %v5803_v62 = vmul.f32 -1.442695, %v700_v58 }
 0x93c   :  { %7730 = vpow2.f32 %v5803_v62 }
 0x944   :  { %v7729_v60 = vpop.eup %7728 }
 0x945   :  { %710 = vrot.lane.b32.xlu1 %v7729_v60, %s7919_s4 }
 0x946   :  { %v7731_v63 = vpop.eup %7730 }
 0x947   :  { %v704_v0 = vadd.f32 1.0, %v7731_v63  ;;  %v223_v63 = vadd.f32 %v8190_v21, %v8132_v19 }
 0x949   :  { %735 = vperm.xlu1 %7702, %v8232_v61   ;;  %7732 = vrcp.f32 %v704_v0 }
 0x953   :  { %v7733_v1 = vpop.eup %7732 }
 0x954   :  { %v708_v12 = vmul.f32 %v7733_v1, %v622_v10 }
 0x9b7   :  { %v711_v3 = vpop.permute.xlu1 %710 }
 0x9b8   :  { %v713_v5 = vmul.f32 %v7733_v1, %v711_v3 }
 0x9ba   :  { %715 = vrot.lane.b32.xlu0 %v713_v5, %s7920_s10 }
 0x9be   :  { %742 = vperm.xlu0 %7703, %v739_v6  }
 0x9c8   :  { %v736_v18 = vpop.permute.xlu1 %735 }
 0xa2c   :  { %v716_v13 = vpop.permute.xlu0 %715 }
 0xa2d   :  { %v718_v15 = vadd.f32 %v716_v13, %v708_v12 }
 0xa2f   :  { %7734 = vtanh.f32 %v718_v15  ;;  %v747_v46 = vmul.f32 %v736_v18, %v718_v15 }
 0xa39   :  { %v7735_v16 = vpop.eup %7734 }
 0xa3a   :  { %721 = vrot.lane.b32.xlu1 %v7735_v16, %s7919_s4 }
 0xa3d   :  { %v743_v20 = vpop.permute.xlu0 %742 }
 0xa3e   :  { %v745_v27 = vmul.f32 %v743_v20, %v619_v54  ;;  %v748_v45 = vmul.f32 %v743_v20, %v622_v10 }
 0xa40   :  { %v749_v47 = vadd.f32 %v748_v45, %v747_v46 }
 0xaac   :  { %v722_v25 = vpop.permute.xlu1 %721 }
 0xaad   :  { %v8238_v26 = vmul.f32 %v7733_v1, %v722_v25 }
 0xaaf   :  { %v738_v28 = vmul.f32 %v736_v18, %v8238_v26 }
 0xab1   :  { %v746_v29 = vadd.f32 %v745_v27, %v738_v28 }
 0xab3   :  { %753 = vrot.lane.b32.xlu0 %v746_v29, %s7920_s10 }
 0xb25   :  { %v754_v30 = vpop.permute.xlu0 %753 }
 0xb26   :  { %6456 = vmatmul.mubr.msk.f32.vlgmr.msra.gmra.mrb[10].mxu0 %vm106_vm0, %v754_v30 }
 0xb27   :  { %7249 = vmatpush3.bf16.msra.mxu0 %v8088_v9  ;;  %6477 = vmatprep.mubr.msk.f32.mxu0 %vm7916_vm1, %v7917_v4 }
 0xb28   :  { %7250 = vmatprep.subr.bf16.mxu0 %v7915_v2 }
 0xb2b   :  { %7252 = vmatpush3.bf16.msra.mxu0 %v8101_v14 }
 0xbf9   :  { %v823_v33 = vpop.f32.mrb[10].mxu0 }
 0xbfa   :  { %v827_v34 = vadd.f32 %v823_v33, %v218_v32  ;;  %v6457_v35 = vpop.f32.mrb[11].mxu0 }
 0xbfc   :  { %7736 = vtanh.f32 %v827_v34  ;;  %v5806_v38 = vmul.f32 -1.442695, %v827_v34 }
 0xbfe   :  { %7738 = vpow2.f32 %v5806_v38  ;;  %v228_v38 = vadd.f32 %v8132_v19, %v8196_v24 }
 0xc06   :  { %v7737_v36 = vpop.eup %7736 }
 0xc07   :  { %837 = vrot.lane.b32.xlu1 %v7737_v36, %s7919_s4 }
 0xc08   :  { %v7739_v39 = vpop.eup %7738 }
 0xc09   :  { %v831_v41 = vadd.f32 1.0, %v7739_v39 }
 0xc0b   :  { %862 = vperm.xlu1 %7702, %v8254_v37   ;;  %7740 = vrcp.f32 %v831_v41 }
 0xc15   :  { %v7741_v22 = vpop.eup %7740 }
 0xc16   :  { %v835_v48 = vmul.f32 %v7741_v22, %v749_v47 }
 0xc79   :  { %v838_v42 = vpop.permute.xlu1 %837 }
 0xc7a   :  { %v840_v43 = vmul.f32 %v7741_v22, %v838_v42 }
 0xc7c   :  { %842 = vrot.lane.b32.xlu0 %v840_v43, %s7920_s10  ;;  %v5813_v43 = vld [vmem:[%s9408_s2 + $0x30] sm:$0xff] }
 0xc80   :  { %869 = vperm.xlu0 %7703, %v866_v44  }
 0xc8a   :  { %v863_v54 = vpop.permute.xlu1 %862 }
 0xcee   :  { %v843_v49 = vpop.permute.xlu0 %842 }
 0xcef   :  { %v845_v52 = vadd.f32 %v843_v49, %v835_v48  ;;  %v1120_v49 = vsub.f32 1.0, %v5813_v43 }
 0xcf1   :  { %7742 = vtanh.f32 %v845_v52  ;;  %v874_v15 = vmul.f32 %v863_v54, %v845_v52 }
 0xcfb   :  { %v7743_v53 = vpop.eup %7742 }
 0xcfc   :  { %848 = vrot.lane.b32.xlu1 %v7743_v53, %s7919_s4 }
 0xcff   :  { %v870_v55 = vpop.permute.xlu0 %869 }
 0xd00   :  { %v872_v58 = vmul.f32 %v870_v55, %v746_v29  ;;  %v875_v13 = vmul.f32 %v870_v55, %v749_v47 }
 0xd02   :  { %v876_v16 = vadd.f32 %v875_v13, %v874_v15 }
 0xd6e   :  { %v849_v56 = vpop.permute.xlu1 %848 }
 0xd6f   :  { %v8260_v57 = vmul.f32 %v7741_v22, %v849_v56 }
 0xd71   :  { %v865_v59 = vmul.f32 %v863_v54, %v8260_v57 }
 0xd73   :  { %v873_v60 = vadd.f32 %v872_v58, %v865_v59 }
 0xd75   :  { %880 = vrot.lane.b32.xlu0 %v873_v60, %s7920_s10 }
 0xde7   :  { %v881_v62 = vpop.permute.xlu0 %880 }
 0xde8   :  { %6467 = vmatmul.mubr.msk.f32.vlgmr.msra.gmra.mrb[6].mxu1 %vm106_vm0, %v881_v62 }
 0xde9   :  { %7255 = vmatpush3.bf16.msra.mxu1 %v8088_v9  ;;  %6488 = vmatprep.mubr.msk.f32.mxu1 %vm7916_vm1, %v7917_v4  ;;  %v8277_v9 = vld [vmem:[%s9408_s2 + $0x28] sm:$0xff] }
 0xdea   :  { %7256 = vmatprep.subr.bf16.mxu1 %v7915_v2  ;;  %v993_v12 = vsub.f32 1.0, %v8277_v9 }
 0xded   :  { %7258 = vmatpush3.bf16.msra.mxu1 %v8101_v14 }
 0xdee   :  { %7267 = vmatprep.subr.bf16.mxu1 %v7915_v2 }
 0xebb   :  { %v950_v0 = vpop.f32.mrb[6].mxu1 }
 0xebc   :  { %v954_v1 = vadd.f32 %v950_v0, %v223_v63  ;;  %v6468_v3 = vpop.f32.mrb[7].mxu1 }
 0xebe   :  { %7744 = vtanh.f32 %v954_v1  ;;  %v5809_v14 = vmul.f32 -1.442695, %v954_v1 }
 0xec0   :  { %7746 = vpow2.f32 %v5809_v14 }
 0xec8   :  { %v7745_v5 = vpop.eup %7744 }
 0xec9   :  { %964 = vrot.lane.b32.xlu1 %v7745_v5, %s7919_s4 }
 0xeca   :  { %v7747_v6 = vpop.eup %7746 }
 0xecb   :  { %v958_v7 = vadd.f32 1.0, %v7747_v6  ;;  %v233_v6 = vadd.f32 %v8194_v23, %v8132_v19 }
 0xecd   :  { %989 = vperm.xlu1 %7702, %v8277_v9   ;;  %7748 = vrcp.f32 %v958_v7 }
 0xed7   :  { %v7749_v21 = vpop.eup %7748 }
 0xed8   :  { %v962_v18 = vmul.f32 %v7749_v21, %v876_v16 }
 0xf3b   :  { %v965_v8 = vpop.permute.xlu1 %964 }
 0xf3c   :  { %v967_v10 = vmul.f32 %v7749_v21, %v965_v8 }
 0xf3e   :  { %969 = vrot.lane.b32.xlu0 %v967_v10, %s7920_s10 }
 0xf42   :  { %996 = vperm.xlu0 %7703, %v993_v12   ;;  %v8309_v12 = vld [vmem:[%s9408_s2 + $0x38] sm:$0xff] }
 0xf4c   :  { %v990_v28 = vpop.permute.xlu1 %989 }
 0xfb0   :  { %v970_v20 = vpop.permute.xlu0 %969 }
 0xfb1   :  { %v972_v25 = vadd.f32 %v970_v20, %v962_v18  ;;  %v1247_v20 = vsub.f32 1.0, %v8309_v12 }
 0xfb3   :  { %7750 = vtanh.f32 %v972_v25  ;;  %v1001_v53 = vmul.f32 %v990_v28, %v972_v25  ;;  %v1467_v25 = vld [vmem:[%s9410_s13 + $0x20] sm:$0xff] }
 0xfbd   :  { %v7751_v27 = vpop.eup %7750 }
 0xfbe   :  { %975 = vrot.lane.b32.xlu1 %v7751_v27, %s7919_s4 }
 0xfc1   :  { %v997_v29 = vpop.permute.xlu0 %996 }
 0xfc2   :  { %v999_v33 = vmul.f32 %v997_v29, %v873_v60  ;;  %v1002_v52 = vmul.f32 %v997_v29, %v876_v16 }
 0xfc4   :  { %v1003_v54 = vadd.f32 %v1002_v52, %v1001_v53 }
0x1030   :  { %v976_v30 = vpop.permute.xlu1 %975 }
0x1031   :  { %v8283_v32 = vmul.f32 %v7749_v21, %v976_v30  ;;  %v1463_v30 = vld [vmem:[%s9410_s13] sm:$0xff] }
0x1033   :  { %v992_v34 = vmul.f32 %v990_v28, %v8283_v32 }
0x1035   :  { %v1000_v35 = vadd.f32 %v999_v33, %v992_v34  ;;  %v1464_v33 = vld [vmem:[%s9410_s13 + $0x8] sm:$0xff] }
0x1037   :  { %1007 = vrot.lane.b32.xlu0 %v1000_v35, %s7920_s10 }
0x10a9   :  { %v1008_v36 = vpop.permute.xlu0 %1007 }
0x10aa   :  { %6478 = vmatmul.mubr.msk.f32.vlgmr.msra.gmra.mrb[12].mxu0 %vm106_vm0, %v1008_v36 }
0x117d   :  { %v1077_v39 = vpop.f32.mrb[12].mxu0 }
0x117e   :  { %v1081_v41 = vadd.f32 %v1077_v39, %v228_v38  ;;  %v6479_v22 = vpop.f32.mrb[13].mxu0  ;;  %v8351_v38 = vld [vmem:[%s9411_s16] sm:$0xff]  ;;  %v1465_v39 = vld [vmem:[%s9410_s13 + $0x10] sm:$0xff]  ;;  %s9416_s16 = sld [smem:[#allocation17_spill]] }
0x1180   :  { %7752 = vtanh.f32 %v1081_v41  ;;  %v5812_v44 = vmul.f32 -1.442695, %v1081_v41  ;;  %v1466_v41 = vld [vmem:[%s9410_s13 + $0x18] sm:$0xff] }
0x1181   :  { %v7277_v22 = vpack.c.bf16 %v1466_v41, %v1465_v39 }
0x1182   :  { %7754 = vpow2.f32 %v5812_v44  ;;  %v1324_v44 = vld [vmem:[%s9412_s30 + $0x10] sm:$0xff] }
0x118a   :  { %v7753_v42 = vpop.eup %7752 }
0x118b   :  { %1091 = vrot.lane.b32.xlu1 %v7753_v42, %s7919_s4  ;;  %v1322_v42 = vld [vmem:[%s9412_s30] sm:$0xff] }
0x118c   :  { %v7755_v45 = vpop.eup %7754 }
0x118d   :  { %v1085_v46 = vadd.f32 1.0, %v7755_v45 }
0x118f   :  { %1116 = vperm.xlu1 %7702, %v5813_v43   ;;  %7756 = vrcp.f32 %v1085_v46 }
0x1199   :  { %v7757_v47 = vpop.eup %7756 }
0x119a   :  { %v1089_v55 = vmul.f32 %v7757_v47, %v1003_v54 }
0x11fd   :  { %v1092_v48 = vpop.permute.xlu1 %1091 }
0x11fe   :  { %v1094_v24 = vmul.f32 %v7757_v47, %v1092_v48 }
0x1200   :  { %1096 = vrot.lane.b32.xlu0 %v1094_v24, %s7920_s10 }
0x1204   :  { %1123 = vperm.xlu0 %7703, %v1120_v49  }
0x120e   :  { %v1117_v60 = vpop.permute.xlu1 %1116 }
0x1272   :  { %v1097_v56 = vpop.permute.xlu0 %1096 }
0x1273   :  { %v1099_v58 = vadd.f32 %v1097_v56, %v1089_v55 }
0x1275   :  { %7758 = vtanh.f32 %v1099_v58  ;;  %v1128_v27 = vmul.f32 %v1117_v60, %v1099_v58 }
0x127f   :  { %v7759_v59 = vpop.eup %7758 }
0x1280   :  { %1102 = vrot.lane.b32.xlu1 %v7759_v59, %s7919_s4 }
0x1283   :  { %v1124_v62 = vpop.permute.xlu0 %1123 }
0x1284   :  { %v1126_v1 = vmul.f32 %v1124_v62, %v1000_v35  ;;  %v7274_v35 = vpack.c.bf16 %v1464_v33, %v1463_v30 }
0x12f2   :  { %v1103_v63 = vpop.permute.xlu1 %1102 }
0x12f3   :  { %v1105_v0 = vmul.f32 %v7757_v47, %v1103_v63  ;;  %v1325_v47 = vld [vmem:[%s9412_s30 + $0x18] sm:$0xff] }
0x12f4   :  { %v7263_v48 = vpack.c.bf16 %v1325_v47, %v1324_v44 }
0x12f5   :  { %v1119_v3 = vmul.f32 %v1117_v60, %v1105_v0 }
0x12f7   :  { %v8296_v5 = vadd.f32 %v1126_v1, %v1119_v3 }
0x12f9   :  { %1134 = vrot.lane.b32.xlu0 %v8296_v5, %s7920_s10 }
0x136b   :  { %v1135_v14 = vpop.permute.xlu0 %1134 }
0x136c   :  { %6489 = vmatmul.mubr.msk.f32.vlgmr.msra.gmra.mrb[8].mxu1 %vm106_vm0, %v1135_v14 }
0x136d   :  { %6519 = vmatprep.mubr.msk.f32.mxu1 %vm7916_vm1, %v7917_v4 }
0x143f   :  { %v1204_v7 = vpop.f32.mrb[8].mxu1 }
0x1440   :  { %v1208_v21 = vadd.f32 %v1204_v7, %v233_v6  ;;  %v6490_v8 = vpop.f32.mrb[9].mxu1  ;;  %v1473_v7 = vld [vmem:[%s9413_s5 + $0x10] sm:$0xff] }
0x1442   :  { %7760 = vtanh.f32 %v1208_v21  ;;  %v5815_v13 = vmul.f32 -1.442695, %v1208_v21  ;;  %v1474_v21 = vld [vmem:[%s9413_s5 + $0x18] sm:$0xff] }
0x1444   :  { %7762 = vpow2.f32 %v5815_v13  ;;  %v7289_v13 = vpack.c.bf16 %v1474_v21, %v1473_v7  ;;  %v2079_v7 = vld [vmem:[%s9367_s14 + $0x10] sm:$0xff]  ;;  %v2080_v21 = vld [vmem:[%s9367_s14 + $0x18] sm:$0xff] }
0x144c   :  { %v7761_v10 = vpop.eup %7760 }
0x144d   :  { %1218 = vrot.lane.b32.xlu1 %v7761_v10, %s7919_s4 }
0x144e   :  { %v7763_v15 = vpop.eup %7762 }
0x144f   :  { %v1212_v16 = vadd.f32 1.0, %v7763_v15 }
0x1451   :  { %1243 = vperm.xlu1 %7702, %v8309_v12   ;;  %7764 = vrcp.f32 %v1212_v16 }
0x145b   :  { %v8312_v19 = vpop.eup %7764 }
0x14bf   :  { %v1219_v23 = vpop.permute.xlu1 %1218 }
0x14c0   :  { %v1221_v18 = vmul.f32 %v8312_v19, %v1219_v23 }
0x14c2   :  { %1223 = vrot.lane.b32.xlu0 %v1221_v18, %s7920_s10 }
0x14c6   :  { %1250 = vperm.xlu0 %7703, %v1247_v20   ;;  %v1477_v20 = vld [vmem:[%s9413_s5 + $0x30] sm:$0xff] }
0x14ca   :  { %348 = vrot.lane.b32.xlu0 %v8138_v40, %s7920_s10  ;;  %v1469_v40 = vld [vmem:[%s9410_s13 + $0x30] sm:$0xff] }
0x14ce   :  { %1276 = vperm.xlu0 %7703, %v8125_v17   ;;  %v1468_v17 = vld [vmem:[%s9410_s13 + $0x28] sm:$0xff] }
0x14d0   :  { %v1244_v24 = vpop.permute.xlu1 %1243 }
0x14d2   :  { %599 = vrot.lane.b32.xlu0 %v8216_v51, %s7920_s10  ;;  %v1470_v51 = vld [vmem:[%s9410_s13 + $0x38] sm:$0xff] }
0x14d6   :  { %1286 = vperm.xlu0 %7703, %v8210_v31   ;;  %v7268_v31 = vpack.c.bf16 %v1468_v17, %v1467_v25  ;;  %v1478_v25 = vld [vmem:[%s9413_s5 + $0x38] sm:$0xff] }
0x14d8   :  { %7269 = vmatpush3.bf16.msra.mxu1 %v7268_v31  ;;  %v7283_v31 = vpack.c.bf16 %v1478_v25, %v1477_v20 }
0x14d9   :  { %7270 = vmatprep.subr.bf16.mxu1 %v7915_v2 }
0x14da   :  { %853 = vrot.lane.b32.xlu0 %v8260_v57, %s7920_s10  ;;  %v1129_v57 = vmul.f32 %v1124_v62, %v1003_v54 }
0x14dc   :  { %v1130_v28 = vadd.f32 %v1129_v57, %v1128_v27 }
0x14de   :  { %1296 = vperm.xlu0 %7703, %v8254_v37   ;;  %v7271_v37 = vpack.c.bf16 %v1470_v51, %v1469_v40  ;;  %v1216_v29 = vmul.f32 %v8312_v19, %v1130_v28 }
0x14e0   :  { %7272 = vmatpush3.bf16.msra.mxu1 %v7271_v37 }
0x14e1   :  { %7273 = vmatprep.subr.bf16.mxu1 %v7915_v2 }
0x14e2   :  { %1107 = vrot.lane.b32.xlu0 %v1105_v0, %s7920_s10 }
0x14e3   :  { %6520 = vmatmul.mubr.msk.f32.vlgmr.msra.gmra.mrb[10].mxu1 %vm106_vm0, %v8351_v38 }
0x14e4   :  { %7275 = vmatpush3.bf16.msra.mxu1 %v7274_v35  ;;  %6530 = vmatprep.mubr.msk.f32.mxu1 %vm7916_vm1, %v7917_v4 }
0x14e5   :  { %7276 = vmatprep.subr.bf16.mxu1 %v7915_v2 }
0x14e6   :  { %1306 = vperm.xlu0 %7703, %v5813_v43   ;;  %v1323_v43 = vld [vmem:[%s9412_s30 + $0x8] sm:$0xff] }
0x14e7   :  { %v7259_v46 = vpack.c.bf16 %v1323_v43, %v1322_v42  ;;  %v1789_v42 = vld [vmem:[%s9414_s3 + $0x8] sm:$0xff] }
0x14e8   :  { %7278 = vmatpush3.bf16.msra.mxu1 %v7277_v22  ;;  %v1788_v22 = vld [vmem:[%s9414_s3] sm:$0xff] }
0x14e9   :  { %7285 = vmatprep.subr.bf16.mxu1 %v7915_v2  ;;  %7260 = vmatprep.subr.bf16.mxu0 %v7259_v46  ;;  %v7291_v43 = vpack.c.bf16 %v1789_v42, %v1788_v22 }
0x14ea   :  { %7262 = vmatpush3.bf16.msra.mxu0 %v7259_v46 }
0x14eb   :  { %7264 = vmatprep.subr.bf16.mxu0 %v7263_v48 }
0x14ee   :  { %7266 = vmatpush3.bf16.msra.mxu0 %v7263_v48  ;;  %v1790_v48 = vld [vmem:[%s9414_s3 + $0x10] sm:$0xff] }
0x14ef   :  { %7279 = vmatprep.subr.bf16.mxu0 %v7915_v2 }
0x1534   :  { %v1224_v34 = vpop.permute.xlu0 %1223 }
0x1535   :  { %v1226_v36 = vadd.f32 %v1224_v34, %v1216_v29 }
0x1537   :  { %7766 = vtanh.f32 %v1226_v36  ;;  %v1255_v52 = vmul.f32 %v1244_v24, %v1226_v36 }
0x1541   :  { %v7767_v45 = vpop.eup %7766 }
0x1542   :  { %1229 = vrot.lane.b32.xlu1 %v7767_v45, %s7919_s4 }
0x1545   :  { %v1251_v49 = vpop.permute.xlu0 %1250 }
0x1546   :  { %v1256_v53 = vmul.f32 %v1251_v49, %v1130_v28  ;;  %472 = vrot.lane.b32.xlu1 %v8186_v11, %s7920_s10  ;;  %v1253_v6 = vmul.f32 %v1251_v49, %v8296_v5  ;;  %v1475_v5 = vld [vmem:[%s9413_s5 + $0x20] sm:$0xff] }
0x1548   :  { %v1257_v54 = vadd.f32 %v1256_v53, %v1255_v52  ;;  %v1929_v53 = vld [vmem:[%s9415_s12] sm:$0xff] }
0x1549   :  { %v349_v55 = vpop.permute.xlu0 %348 }
0x154a   :  { %351 = vst.msk [vmem:[#allocation4] sm:$0xff] %vm106_vm0, %v349_v55  ;;  %1553 = vrot.lane.b32.xlu0 %v1257_v54, %s7921_s9  ;;  %1281 = vperm.xlu1 %7702, %v8154_v50   ;;  %v1930_v54 = vld [vmem:[%s9415_s12 + $0x8] sm:$0xff] }
0x154b   :  { %v7299_v55 = vpack.c.bf16 %v1930_v54, %v1929_v53 }
0x154d   :  { %v1277_v56 = vpop.permute.xlu0 %1276 }
0x154e   :  { %726 = vrot.lane.b32.xlu1 %v8238_v26, %s7920_s10 }
0x1551   :  { %v1266_v58 = vld [vmem:[#allocation4] sm:$0xff]  ;;  %v600_v59 = vpop.permute.xlu0 %599 }
0x1552   :  { %v1314_v60 = vmul.f32 %v1277_v56, %v1266_v58  ;;  %603 = vst.msk [vmem:[#allocation4 + $0x10] sm:$0xff] %vm106_vm0, %v600_v59  ;;  %1291 = vperm.xlu1 %7702, %v8232_v61   ;;  %v1471_v61 = vld [vmem:[%s9413_s5] sm:$0xff]  ;;  %v1932_v56 = vld [vmem:[%s9415_s12 + $0x18] sm:$0xff] }
0x1554   :  { %6499 = vmatprep.mubr.msk.f32.mxu0 %vm106_vm0, %v1314_v60  ;;  %v5828_v60 = vld [vmem:[%s9416_s16] ss:$0 sm:$0xff] }
0x1555   :  { %v1287_v11 = vpop.permute.xlu0 %1286 }
0x1556   :  { %980 = vrot.lane.b32.xlu1 %v8283_v32, %s7920_s10  ;;  %v1472_v32 = vld [vmem:[%s9413_s5 + $0x8] sm:$0xff] }
0x1557   :  { %v7286_v14 = vpack.c.bf16 %v1472_v32, %v1471_v61  ;;  %v2077_v61 = vld [vmem:[%s9367_s14] sm:$0xff]  ;;  %v2078_v32 = vld [vmem:[%s9367_s14 + $0x8] sm:$0xff] }
0x1559   :  { %v854_v62 = vpop.permute.xlu0 %853  ;;  %v1268_v15 = vld [vmem:[#allocation4 + $0x10] sm:$0xff] }
0x155a   :  { %857 = vst.msk [vmem:[#allocation4 + $0x20] sm:$0xff] %vm106_vm0, %v854_v62  ;;  %1301 = vperm.xlu1 %7702, %v8277_v9   ;;  %v1316_v17 = vmul.f32 %v1287_v11, %v1268_v15 }
0x155d   :  { %v1297_v50 = vpop.permute.xlu0 %1296 }
0x1561   :  { %v1108_v26 = vpop.permute.xlu0 %1107  ;;  %v1270_v37 = vld [vmem:[#allocation4 + $0x20] sm:$0xff] }
0x1562   :  { %1111 = vst.msk [vmem:[#allocation4 + $0x30] sm:$0xff] %vm106_vm0, %v1108_v26  ;;  %v1318_v29 = vmul.f32 %v1297_v50, %v1270_v37  ;;  %v1921_v26 = vld [vmem:[%s9417_s29] sm:$0xff] }
0x1565   :  { %v1307_v1 = vpop.permute.xlu0 %1306 }
0x1569   :  { %v1272_v30 = vld [vmem:[#allocation4 + $0x30] sm:$0xff] }
0x156a   :  { %v1320_v36 = vmul.f32 %v1307_v1, %v1272_v30 }
0x15b4   :  { %v1230_v63 = vpop.permute.xlu1 %1229 }
0x15b5   :  { %v1232_v0 = vmul.f32 %v8312_v19, %v1230_v63  ;;  %v1922_v63 = vld [vmem:[%s9417_s29 + $0x8] sm:$0xff] }
0x15b6   :  { %v1548_v39 = vpop.f32.mrb[10].mxu1 }
0x15b7   :  { %1234 = vrot.lane.b32.xlu1 %v1232_v0, %s7920_s10  ;;  %v1246_v9 = vmul.f32 %v1244_v24, %v1232_v0  ;;  %v6521_v41 = vpop.f32.mrb[11].mxu1  ;;  %v1791_v24 = vld [vmem:[%s9414_s3 + $0x18] sm:$0xff]  ;;  %v5817_v0 = vld [vmem:[%s9366_s6] ss:$0 sm:$0xff] }
0x15b8   :  { %v473_v3 = vpop.permute.xlu1 %472  ;;  %v7295_v52 = vpack.c.bf16 %v1791_v24, %v1790_v48  ;;  %v8565_v24 = vld [vmem:[%s9369_s15] ss:$0 sm:$0xff] }
0x15b9   :  { %476 = vst.msk [vmem:[#allocation4 + $0x8] sm:$0xff] %vm106_vm0, %v473_v3  ;;  %v1254_v10 = vadd.f32 %v1253_v6, %v1246_v9  ;;  %v8490_v6 = vpack.c.bf16 %v2078_v32, %v2077_v61 }
0x15bb   :  { %1311 = vperm.xlu1 %7702, %v8309_v12   ;;  %v1476_v12 = vld [vmem:[%s9413_s5 + $0x28] sm:$0xff] }
0x15bc   :  { %v1554_v8 = vpop.permute.xlu0 %1553  ;;  %v7280_v23 = vpack.c.bf16 %v1476_v12, %v1475_v5 }
0x15bd   :  { %6531 = vmatmul.mubr.msk.f32.vlgmr.msra.gmra.mrb[12].mxu1 %vm106_vm0, %v1554_v8 }
0x15be   :  { %7287 = vmatpush3.bf16.msra.mxu1 %v7286_v14  ;;  %6552 = vmatprep.mubr.msk.f32.mxu1 %vm7916_vm1, %v7917_v4 }
0x15bf   :  { %1706 = vrot.lane.b32.xlu1 %v1254_v10, %s7920_s10  ;;  %7288 = vmatprep.subr.bf16.mxu1 %v7915_v2  ;;  %v8503_v10 = vpack.c.bf16 %v2080_v21, %v2079_v7  ;;  %v1927_v7 = vld [vmem:[%s9417_s29 + $0x30] sm:$0xff]  ;;  %v1928_v21 = vld [vmem:[%s9417_s29 + $0x38] sm:$0xff] }
0x15c0   :  { %v1267_v16 = vld [vmem:[#allocation4 + $0x8] sm:$0xff] }
0x15c2   :  { %7290 = vmatpush3.bf16.msra.mxu1 %v7289_v13 }
0x15c3   :  { %7300 = vmatprep.subr.bf16.mxu1 %v7299_v55 }
0x15c9   :  { %v1282_v19 = vpop.permute.xlu1 %1281 }
0x15ca   :  { %v1315_v18 = vmul.f32 %v1282_v19, %v1267_v16 }
0x15cc   :  { %6500 = vmatmul.mubr.msk.f32.vlgmr.msra.gmra.mrb[14].mxu0 %vm106_vm0, %v1315_v18 }
0x15cd   :  { %6502 = vmatprep.mubr.msk.f32.mxu0 %vm106_vm0, %v1316_v17  ;;  %v727_v40 = vpop.permute.xlu1 %726  ;;  %7281 = vmatpush3.bf16.msra.mxu0 %v7280_v23 }
0x15ce   :  { %730 = vst.msk [vmem:[#allocation4 + $0x18] sm:$0xff] %vm106_vm0, %v727_v40  ;;  %7282 = vmatprep.subr.bf16.mxu0 %v7915_v2 }
0x15d1   :  { %v1292_v51 = vpop.permute.xlu1 %1291  ;;  %7284 = vmatpush3.bf16.msra.mxu0 %v7283_v31 }
0x15d2   :  { %7292 = vmatprep.subr.bf16.mxu0 %v7291_v43 }
0x15d5   :  { %v1269_v57 = vld [vmem:[#allocation4 + $0x18] sm:$0xff]  ;;  %v981_v27 = vpop.permute.xlu1 %980 }
0x15d6   :  { %v1317_v28 = vmul.f32 %v1292_v51, %v1269_v57  ;;  %984 = vst.msk [vmem:[#allocation4 + $0x28] sm:$0xff] %vm106_vm0, %v981_v27 }
0x15d8   :  { %6503 = vmatmul.mubr.msk.f32.gmra.mrb[16].mxu0 %vm106_vm0, %v1317_v28 }
0x15d9   :  { %6505 = vmatprep.mubr.msk.f32.mxu0 %vm106_vm0, %v1318_v29  ;;  %v1302_v34 = vpop.permute.xlu1 %1301  ;;  %v5831_v29 = vld [vmem:[%s9368_s11] ss:$0 sm:$0xff] }
0x15dd   :  { %v1271_v33 = vld [vmem:[#allocation4 + $0x28] sm:$0xff] }
0x15de   :  { %v1319_v35 = vmul.f32 %v1302_v34, %v1271_v33 }
0x15e0   :  { %6506 = vmatmul.mubr.msk.f32.gmra.mrb[18].mxu0 %vm106_vm0, %v1319_v35 }
0x15e1   :  { %6508 = vmatprep.mubr.msk.f32.mxu0 %vm106_vm0, %v1320_v36 }
0x1629   :  { %v1235_v44 = vpop.permute.xlu1 %1234 }
0x162a   :  { %1238 = vst.msk [vmem:[#allocation4 + $0x38] sm:$0xff] %vm106_vm0, %v1235_v44 }
0x1631   :  { %v1273_v45 = vld [vmem:[#allocation4 + $0x38] sm:$0xff] }
0x163a   :  { %v1312_v46 = vpop.permute.xlu1 %1311 }
0x163b   :  { %v1321_v47 = vmul.f32 %v1312_v46, %v1273_v45 }
0x163d   :  { %6509 = vmatmul.mubr.msk.f32.gmra.mrb[20].mxu0 %vm106_vm0, %v1321_v47 }
0x163e   :  { %v1707_v49 = vpop.permute.xlu1 %1706  ;;  %6541 = vmatprep.mubr.msk.f32.mxu0 %vm7916_vm1, %v7917_v4 }
0x163f   :  { %6553 = vmatmul.mubr.msk.f32.vlgmr.msra.gmra.mrb[14].mxu1 %vm106_vm0, %v1707_v49 }
0x1640   :  { %7302 = vmatpush3.bf16.msra.mxu1 %v7299_v55  ;;  %6583 = vmatprep.mubr.msk.f32.mxu1 %vm106_vm0, %v1921_v26 }
0x1641   :  { %6542 = vmatmul.mubr.msk.f32.vlgmr.msra.gmra.mrb[22].mxu0 %vm106_vm0, %v8351_v38  ;;  %v1931_v38 = vld [vmem:[%s9415_s12 + $0x10] sm:$0xff] }
0x1642   :  { %7294 = vmatpush3.bf16.msra.mxu0 %v7291_v43  ;;  %v7303_v58 = vpack.c.bf16 %v1932_v56, %v1931_v38 }
0x1643   :  { %7296 = vmatprep.subr.bf16.mxu0 %v7295_v52 }
0x1644   :  { %7304 = vmatprep.subr.bf16.mxu1 %v7303_v58 }
0x1645   :  { %7306 = vmatpush3.bf16.msra.mxu1 %v7303_v58 }
0x1646   :  { %7298 = vmatpush3.bf16.msra.mxu0 %v7295_v52  ;;  %7313 = vmatprep.subr.bf16.mxu1 %v7915_v2 }
0x1647   :  { %7307 = vmatprep.subr.bf16.mxu0 %v7915_v2 }
0x1648   :  { %6584 = vmatmul.mubr.msk.f32.vlgmr.msra.gmra.mrb[16].mxu1 %vm106_vm0, %v1922_v63 }
0x1690   :  { %v1623_v59 = vpop.f32.mrb[12].mxu1 }
0x1691   :  { %v1624_v11 = vadd.f32 %v1623_v59, %v1548_v39  ;;  %v6532_v62 = vpop.f32.mrb[13].mxu1 }
0x1693   :  { %v1634_v50 = vadd.f32 %v5828_v60, %v1624_v11 }
0x1695   :  { %2174 = vrot.lane.b32.xlu1 %v1634_v50, %s7920_s10 }
0x169f   :  { %v6501_v1 = vpop.f32.mrb[14].mxu0 }
0x16a0   :  { %v1429_v3 = vadd.f32 %v6501_v1, %v5817_v0  ;;  %v1423_v9 = vpop.f32.mrb[15].mxu0  ;;  %v1923_v1 = vld [vmem:[%s9417_s29 + $0x10] sm:$0xff] }
0x16a1   :  { %v1424_v14 = vadd.f32 %v5817_v0, %v1423_v9  ;;  %v1925_v9 = vld [vmem:[%s9417_s29 + $0x20] sm:$0xff]  ;;  %6586 = vmatprep.mubr.msk.f32.mxu1 %vm106_vm0, %v1923_v1 }
0x16a3   :  { %v8498_v8 = vpack.c.bf16 %v1429_v3, %v1424_v14  ;;  %6563 = vmatprep.mubr.msk.f32.mxu0 %vm106_vm0, %v1424_v14  ;;  %v1926_v14 = vld [vmem:[%s9417_s29 + $0x28] sm:$0xff] }
0x16a4   :  { %6564 = vmatmul.mubr.msk.f32.vlgmr.msra.gmra.mrb[24].mxu0 %vm106_vm0, %v1429_v3  ;;  %v1924_v3 = vld [vmem:[%s9417_s29 + $0x18] sm:$0xff] }
0x16a5   :  { %7309 = vmatpush3.bf16.msra.mxu0 %v8490_v6  ;;  %6587 = vmatmul.mubr.msk.f32.gmra.mrb[18].mxu1 %vm106_vm0, %v1924_v3 }
0x16a6   :  { %7310 = vmatprep.subr.bf16.mxu0 %v7915_v2  ;;  %6589 = vmatprep.mubr.msk.f32.mxu1 %vm106_vm0, %v1925_v9 }
0x16a9   :  { %7312 = vmatpush3.bf16.msra.mxu0 %v8503_v10  ;;  %6590 = vmatmul.mubr.msk.f32.gmra.mrb[20].mxu1 %vm106_vm0, %v1926_v14 }
0x16aa   :  { %7329 = vmatprep.subr.bf16.mxu0 %v7915_v2  ;;  %6592 = vmatprep.mubr.msk.f32.mxu1 %vm106_vm0, %v1927_v7 }
0x16ab   :  { %v6504_v13 = vpop.f32.mrb[16].mxu0 }
0x16ac   :  { %v1439_v5 = vadd.f32 %v6504_v13, %v5817_v0  ;;  %v1433_v12 = vpop.f32.mrb[17].mxu0 }
0x16ad   :  { %v1434_v15 = vadd.f32 %v5817_v0, %v1433_v12  ;;  %6593 = vmatmul.mubr.msk.f32.gmra.mrb[22].mxu1 %vm106_vm0, %v1928_v21 }
0x16ae   :  { %6622 = vmatprep.mubr.msk.f32.mxu1 %vm7916_vm1, %v7917_v4 }
0x16af   :  { %v8508_v16 = vpack.c.bf16 %v1439_v5, %v1434_v15  ;;  %6566 = vmatprep.mubr.msk.f32.mxu0 %vm106_vm0, %v1434_v15 }
0x16b0   :  { %6567 = vmatmul.mubr.msk.f32.gmra.mrb[26].mxu0 %vm106_vm0, %v1439_v5 }
0x16b3   :  { %v6507_v19 = vpop.f32.mrb[18].mxu0 }
0x16b4   :  { %v1449_v23 = vadd.f32 %v6507_v19, %v5817_v0  ;;  %v1443_v18 = vpop.f32.mrb[19].mxu0 }
0x16b5   :  { %v1444_v20 = vadd.f32 %v5817_v0, %v1443_v18 }
0x16b7   :  { %v8512_v25 = vpack.c.bf16 %v1449_v23, %v1444_v20  ;;  %6569 = vmatprep.mubr.msk.f32.mxu0 %vm106_vm0, %v1444_v20 }
0x16b8   :  { %6570 = vmatmul.mubr.msk.f32.gmra.mrb[28].mxu0 %vm106_vm0, %v1449_v23 }
0x1707   :  { %v2175_v63 = vpop.permute.xlu1 %2174 }
0x1710   :  { %v6510_v17 = vpop.f32.mrb[20].mxu0 }
0x1711   :  { %v1459_v40 = vadd.f32 %v6510_v17, %v5817_v0  ;;  %v1453_v31 = vpop.f32.mrb[21].mxu0 }
0x1712   :  { %v1454_v51 = vadd.f32 %v5817_v0, %v1453_v31  ;;  %v1776_v37 = vpop.f32.mrb[14].mxu1  ;;  %v8625_v31 = vld [vmem:[%s9370_s17] sm:$0xff] }
0x1713   :  { %v6554_v57 = vpop.f32.mrb[15].mxu1 }
0x1714   :  { %v8516_v27 = vpack.c.bf16 %v1459_v40, %v1454_v51  ;;  %v1701_v28 = vpop.f32.mrb[22].mxu0  ;;  %6572 = vmatprep.mubr.msk.f32.mxu0 %vm106_vm0, %v1454_v51 }
0x1715   :  { %v1777_v30 = vadd.f32 %v1776_v37, %v1701_v28  ;;  %v6543_v33 = vpop.f32.mrb[23].mxu0  ;;  %6573 = vmatmul.mubr.msk.f32.gmra.mrb[30].mxu0 %vm106_vm0, %v1459_v40 }
0x1716   :  { %6603 = vmatprep.mubr.msk.f32.mxu0 %vm7916_vm1, %v7917_v4 }
0x1717   :  { %v1787_v34 = vadd.f32 %v5831_v29, %v1777_v30 }
0x1719   :  { %6604 = vmatmul.mubr.msk.f32.vlgmr.msra.gmra.mrb[32].mxu0 %vm106_vm0, %v1787_v34 }
0x171a   :  { %7331 = vmatpush3.bf16.msra.mxu0 %v8498_v8  ;;  %6641 = vmatprep.mubr.msk.f32.mxu0 %vm7916_vm1, %v7917_v4 }
0x171b   :  { %7332 = vmatprep.subr.bf16.mxu0 %v7915_v2  ;;  %v8536_v35 = vpop.f32.mrb[16].mxu1 }
0x171c   :  { %v2030_v36 = vpop.f32.mrb[17].mxu1  ;;  %v2036_v14 = vadd.f32 %v8536_v35, %v8565_v24 }
0x171d   :  { %v2031_v53 = vadd.f32 %v8565_v24, %v2030_v36 }
0x171e   :  { %7334 = vmatpush3.bf16.msra.mxu0 %v8508_v16 }
0x171f   :  { %7335 = vmatprep.subr.bf16.mxu0 %v7915_v2 }
0x1722   :  { %7337 = vmatpush3.bf16.msra.mxu0 %v8512_v25 }
0x1723   :  { %7338 = vmatprep.subr.bf16.mxu0 %v7915_v2 }
0x1726   :  { %7340 = vmatpush3.bf16.msra.mxu0 %v8516_v27 }
0x1727   :  { %7341 = vmatprep.subr.bf16.mxu0 %v7915_v2 }
0x1777   :  { %v6565_v39 = vpop.f32.mrb[24].mxu0 }
0x1778   :  { %v1882_v41 = vpop.f32.mrb[25].mxu0  ;;  %v8607_v15 = vpop.f32.mrb[18].mxu1 }
0x1779   :  { %v8544_v42 = vpack.c.bf16 %v6565_v39, %v1882_v41  ;;  %v8609_v19 = vpop.f32.mrb[19].mxu1  ;;  %v2081_v39 = vld [vmem:[%s9371_s18] sm:$0xff]  ;;  %v2082_v41 = vld [vmem:[%s9371_s18 + $0x8] sm:$0xff] }
0x177b   :  { %7316 = vmatpush3.bf16.xpose.msk.msra.mxu1 %vm8540_vm2, %v8544_v42 }
0x177c   :  { %7317 = vmatprep.subr.bf16.mxu1 %v7915_v2  ;;  %v8611_v23 = vpop.f32.mrb[20].mxu1 }
0x177d   :  { %v8613_v18 = vpop.f32.mrb[21].mxu1 }
0x1780   :  { %v8615_v20 = vpop.f32.mrb[22].mxu1 }
0x1781   :  { %v8617_v17 = vpop.f32.mrb[23].mxu1 }
0x1783   :  { %v6568_v43 = vpop.f32.mrb[26].mxu0 }
0x1784   :  { %v1892_v44 = vpop.f32.mrb[27].mxu0 }
0x1785   :  { %v8550_v45 = vpack.c.bf16 %v6568_v43, %v1892_v44  ;;  %v2083_v43 = vld [vmem:[%s9371_s18 + $0x10] sm:$0xff]  ;;  %v8639_v44 = vpack.c.bf16 %v2082_v41, %v2081_v39 }
0x1787   :  { %7320 = vmatpush3.bf16.xpose.msk.msra.mxu1 %vm8540_vm2, %v8550_v45 }
0x1788   :  { %7321 = vmatprep.subr.bf16.mxu1 %v7915_v2 }
0x178b   :  { %v6571_v46 = vpop.f32.mrb[28].mxu0 }
0x178c   :  { %v1902_v47 = vpop.f32.mrb[29].mxu0 }
0x178d   :  { %v8556_v48 = vpack.c.bf16 %v6571_v46, %v1902_v47  ;;  %v2084_v46 = vld [vmem:[%s9371_s18 + $0x18] sm:$0xff] }
0x178e   :  { %v8645_v47 = vpack.c.bf16 %v2084_v46, %v2083_v43 }
0x178f   :  { %7324 = vmatpush3.bf16.xpose.msk.msra.mxu1 %vm8540_vm2, %v8556_v48 }
0x1790   :  { %7325 = vmatprep.subr.bf16.mxu1 %v7915_v2 }
0x17e8   :  { %v6574_v49 = vpop.f32.mrb[30].mxu0 }
0x17e9   :  { %v1912_v52 = vpop.f32.mrb[31].mxu0 }
0x17ea   :  { %v8568_v54 = vpack.c.bf16 %v6574_v49, %v1912_v52  ;;  %v2085_v52 = vld [vmem:[%s9371_s18 + $0x20] sm:$0xff] }
0x17ec   :  { %v2161_v55 = vpop.f32.mrb[32].mxu0  ;;  %7328 = vmatpush3.bf16.xpose.msk.msra.mxu1 %vm8540_vm2, %v8568_v54 }
0x17ed   :  { %v2165_v38 = vadd.f32 %v2161_v55, %v2031_v53  ;;  %v6605_v56 = vpop.f32.mrb[33].mxu0  ;;  %7347 = vmatprep.subr.bf16.mxu1 %v7915_v2  ;;  %v2086_v53 = vld [vmem:[%s9371_s18 + $0x28] sm:$0xff] }
0x17ef   :  { %7768 = vtanh.f32 %v2165_v38  ;;  %v5850_v59 = vmul.f32 -1.442695, %v2165_v38  ;;  %v8656_v38 = vpack.c.bf16 %v2086_v53, %v2085_v52 }
0x17f1   :  { %7770 = vpow2.f32 %v5850_v59  ;;  %v2088_v59 = vld [vmem:[%s9371_s18 + $0x38] sm:$0xff] }
0x17f9   :  { %v7769_v58 = vpop.eup %7768 }
0x17fa   :  { %2179 = vrot.lane.b32.xlu0 %v7769_v58, %s7919_s4  ;;  %v2087_v58 = vld [vmem:[%s9371_s18 + $0x30] sm:$0xff] }
0x17fb   :  { %v7771_v60 = vpop.eup %7770 }
0x17fc   :  { %v2169_v11 = vadd.f32 1.0, %v7771_v60  ;;  %v8666_v60 = vpack.c.bf16 %v2088_v59, %v2087_v58 }
0x17fe   :  { %7772 = vrcp.f32 %v2169_v11 }
0x1808   :  { %v7773_v62 = vpop.eup %7772 }
0x1809   :  { %v2177_v0 = vmul.f32 %v7773_v62, %v2175_v63  ;;  %v8702_v63 = vld [vmem:[%s9372_s19] ss:$0 sm:$0xff] }
0x186c   :  { %v2180_v50 = vpop.permute.xlu0 %2179 }
0x186d   :  { %v2182_v26 = vmul.f32 %v7773_v62, %v2180_v50 }
0x186f   :  { %2184 = vrot.lane.b32.xlu0 %v2182_v26, %s7920_s10 }
0x18e1   :  { %v2185_v61 = vpop.permute.xlu0 %2184 }
0x18e2   :  { %v8576_v32 = vadd.f32 %v2185_v61, %v2177_v0 }
0x18e4   :  { %7774 = vtanh.f32 %v8576_v32 }
0x18ee   :  { %v7775_v13 = vpop.eup %7774 }
0x18ef   :  { %2190 = vrot.lane.b32.xlu1 %v7775_v13, %s7919_s4 }
0x1961   :  { %v2191_v5 = vpop.permute.xlu1 %2190 }
0x1962   :  { %v2193_v12 = vmul.f32 %v7773_v62, %v2191_v5 }
0x1964   :  { %2195 = vrot.lane.b32.xlu0 %v2193_v12, %s7920_s10 }
0x19d6   :  { %v2196_v40 = vpop.permute.xlu0 %2195 }
0x19d7   :  { %6623 = vmatmul.mubr.msk.f32.vlgmr.msra.gmra.mrb[24].mxu1 %vm106_vm0, %v2196_v40 }
0x19d8   :  { %6663 = vmatprep.mubr.msk.f32.mxu1 %vm7916_vm1, %v7917_v4  ;;  %7349 = vmatpush3.bf16.msra.mxu1 %v8639_v44 }
0x19d9   :  { %7350 = vmatprep.subr.bf16.mxu1 %v7915_v2 }
0x19dc   :  { %7352 = vmatpush3.bf16.msra.mxu1 %v8645_v47 }
0x19dd   :  { %7359 = vmatprep.subr.bf16.mxu1 %v7915_v2 }
0x1aaa   :  { %v2289_v51 = vpop.f32.mrb[24].mxu1 }
0x1aab   :  { %v2290_v37 = vadd.f32 %v2289_v51, %v8625_v31  ;;  %v6624_v57 = vpop.f32.mrb[25].mxu1 }
0x1aad   :  { %v2294_v28 = vsel %vm2293_vm3, %v2290_v37, -inf }
0x1aae   :  { %2295 = vmax.xlane.f32.xlu1 %v2294_v28 }
0x1b3b   :  { %v2296_v29 = vpop.xlane.xlu1 %2295 }
0x1b3c   :  { %v2297_v30 = vsub.f32 %v2290_v37, %v2296_v29 }
0x1b3e   :  { %v2298_v33 = vmul.f32 1.442695, %v2297_v30 }
0x1b40   :  { %7776 = vpow2.f32 %v2298_v33 }
0x1b4a   :  { %v7777_v34 = vpop.eup %7776 }
0x1b4b   :  { %v2300_v36 = vsel %vm2293_vm3, %v7777_v34, 0.0 }
0x1b4c   :  { %2301 = vadd.xlane.f32.xlu0 %v2300_v36 }
0x1bd9   :  { %v2302_v49 = vpop.xlane.xlu0 %2301 }
0x1bda   :  { %7778 = vrcp.f32 %v2302_v49 }
0x1be4   :  { %v7779_v55 = vpop.eup %7778 }
0x1be5   :  { %v2304_v56 = vmul.f32 %v7779_v55, %v7777_v34 }
0x1be7   :  { %6642 = vmatmul.mubr.msk.f32.vlgmr.msra.gmra.mrb[34].mxu0 %vm2293_vm3, %v2304_v56 }
0x1be8   :  { %7343 = vmatpush3.bf16.msra.mxu0 %v8656_v38  ;;  %6652 = vmatprep.mubr.msk.f32.mxu0 %vm7916_vm1, %v7917_v4 }
0x1be9   :  { %7344 = vmatprep.subr.bf16.mxu0 %v7915_v2 }
0x1bec   :  { %7346 = vmatpush3.bf16.msra.mxu0 %v8666_v60 }
0x1bed   :  { %7353 = vmatprep.subr.bf16.mxu0 %v7915_v2 }
0x1bef   :  { %6653 = vmatmul.mubr.msk.f32.vlgmr.msra.gmra.mrb[36].mxu0 %vm106_vm0, %v2196_v40 }
0x1bf0   :  { %7355 = vmatpush3.bf16.msra.mxu0 %v8490_v6  ;;  %6674 = vmatprep.mubr.msk.f32.mxu0 %vm7916_vm1, %v7917_v4 }
0x1bf1   :  { %7356 = vmatprep.subr.bf16.mxu0 %v7915_v2 }
0x1bf4   :  { %7358 = vmatpush3.bf16.msra.mxu0 %v8503_v10 }
0x1bf5   :  { %7375 = vmatprep.subr.bf16.mxu0 %v7915_v2 }
0x1cba   :  { %v2374_v11 = vpop.f32.mrb[34].mxu0 }
0x1cbb   :  { %v6643_v62 = vpop.f32.mrb[35].mxu0  ;;  %6664 = vmatmul.mubr.msk.f32.vlgmr.msra.gmra.mrb[26].mxu1 %vm106_vm0, %v2374_v11 }
0x1cbc   :  { %7362 = vmatpush3.bf16.xpose.msk.msra.mxu1 %vm8540_vm2, %v8544_v42  ;;  %6693 = vmatprep.mubr.msk.f32.mxu1 %vm7916_vm1, %v7917_v4 }
0x1cbd   :  { %7363 = vmatprep.subr.bf16.mxu1 %v7915_v2 }
0x1cc2   :  { %v2444_v50 = vpop.f32.mrb[36].mxu0 }
0x1cc3   :  { %v6654_v26 = vpop.f32.mrb[37].mxu0 }
0x1cc4   :  { %7366 = vmatpush3.bf16.xpose.msk.msra.mxu1 %vm8540_vm2, %v8550_v45 }
0x1cc5   :  { %7367 = vmatprep.subr.bf16.mxu1 %v7915_v2 }
0x1ccc   :  { %7370 = vmatpush3.bf16.xpose.msk.msra.mxu1 %vm8540_vm2, %v8556_v48 }
0x1ccd   :  { %7371 = vmatprep.subr.bf16.mxu1 %v7915_v2 }
0x1cd4   :  { %7374 = vmatpush3.bf16.xpose.msk.msra.mxu1 %vm8540_vm2, %v8568_v54 }
0x1cd5   :  { %7399 = vmatprep.subr.bf16.mxu1 %v7915_v2 }
0x1d8e   :  { %v2517_v0 = vpop.f32.mrb[26].mxu1 }
0x1d8f   :  { %v2518_v61 = vadd.f32 %v2517_v0, %v2444_v50  ;;  %v6665_v1 = vpop.f32.mrb[27].mxu1 }
0x1d91   :  { %v2527_v3 = vadd.f32 %v8702_v63, %v2518_v61 }
0x1d93   :  { %7780 = vtanh.f32 %v2527_v3 }
0x1d9d   :  { %v7781_v9 = vpop.eup %7780 }
0x1d9e   :  { %2529 = vst.msk [vmem:[%s9373_s28] sm:$0xff] %vm106_vm0, %v7781_v9  ;;  %6675 = vmatmul.mubr.msk.f32.vlgmr.msra.gmra.mrb[38].mxu0 %vm106_vm0, %v7781_v9 }
0x1d9f   :  { %7377 = vmatpush3.bf16.msra.mxu0 %v8498_v8  ;;  %6712 = vmatprep.mubr.msk.f32.mxu0 %vm7916_vm1, %v7917_v4 }
0x1da0   :  { %7378 = vmatprep.subr.bf16.mxu0 %v7915_v2 }
0x1da3   :  { %7380 = vmatpush3.bf16.msra.mxu0 %v8508_v16 }
0x1da4   :  { %7381 = vmatprep.subr.bf16.mxu0 %v7915_v2 }
0x1da7   :  { %7383 = vmatpush3.bf16.msra.mxu0 %v8512_v25 }
0x1da8   :  { %7384 = vmatprep.subr.bf16.mxu0 %v7915_v2 }
0x1dab   :  { %7386 = vmatpush3.bf16.msra.mxu0 %v8516_v27 }
0x1dac   :  { %7387 = vmatprep.subr.bf16.mxu0 %v7915_v2 }
0x1e71   :  { %v2601_v7 = vpop.f32.mrb[38].mxu0 }
0x1e72   :  { %v2605_v21 = vadd.f32 %v2601_v7, %v2036_v14  ;;  %v6676_v13 = vpop.f32.mrb[39].mxu0  ;;  %v2041_v7 = vadd.f32 %v8565_v24, %v8609_v19 }
0x1e74   :  { %7782 = vtanh.f32 %v2605_v21  ;;  %v5865_v12 = vmul.f32 -1.442695, %v2605_v21 }
0x1e76   :  { %7784 = vpow2.f32 %v5865_v12 }
0x1e7e   :  { %v7783_v5 = vpop.eup %7782 }
0x1e7f   :  { %2615 = vrot.lane.b32.xlu0 %v7783_v5, %s7919_s4 }
0x1e80   :  { %v7785_v40 = vpop.eup %7784 }
0x1e81   :  { %v2609_v51 = vadd.f32 1.0, %v7785_v40 }
0x1e83   :  { %7786 = vrcp.f32 %v2609_v51 }
0x1e8d   :  { %v7787_v37 = vpop.eup %7786 }
0x1e8e   :  { %v2613_v29 = vmul.f32 %v7787_v37, %v8576_v32 }
0x1ef1   :  { %v2616_v57 = vpop.permute.xlu0 %2615 }
0x1ef2   :  { %v2618_v28 = vmul.f32 %v7787_v37, %v2616_v57 }
0x1ef4   :  { %2620 = vrot.lane.b32.xlu1 %v2618_v28, %s7920_s10 }
0x1f66   :  { %v2621_v35 = vpop.permute.xlu1 %2620 }
0x1f67   :  { %v8725_v30 = vadd.f32 %v2621_v35, %v2613_v29 }
0x1f69   :  { %7788 = vtanh.f32 %v8725_v30 }
0x1f73   :  { %v7789_v33 = vpop.eup %7788 }
0x1f74   :  { %2626 = vrot.lane.b32.xlu1 %v7789_v33, %s7919_s4 }
0x1fe6   :  { %v2627_v34 = vpop.permute.xlu1 %2626 }
0x1fe7   :  { %v2629_v36 = vmul.f32 %v7787_v37, %v2627_v34 }
0x1fe9   :  { %2631 = vrot.lane.b32.xlu0 %v2629_v36, %s7920_s10 }
0x205b   :  { %v2632_v39 = vpop.permute.xlu0 %2631 }
0x205c   :  { %6694 = vmatmul.mubr.msk.f32.vlgmr.msra.gmra.mrb[28].mxu1 %vm106_vm0, %v2632_v39 }
0x205d   :  { %7401 = vmatpush3.bf16.msra.mxu1 %v8490_v6  ;;  %6745 = vmatprep.mubr.msk.f32.mxu1 %vm7916_vm1, %v7917_v4 }
0x205e   :  { %7402 = vmatprep.subr.bf16.mxu1 %v7915_v2 }
0x2061   :  { %7404 = vmatpush3.bf16.msra.mxu1 %v8503_v10 }
0x2062   :  { %7421 = vmatprep.subr.bf16.mxu1 %v7915_v2 }
0x212f   :  { %v2701_v32 = vpop.f32.mrb[28].mxu1 }
0x2130   :  { %v2702_v41 = vadd.f32 %v2701_v32, %v8625_v31  ;;  %v6695_v43 = vpop.f32.mrb[29].mxu1 }
0x2132   :  { %v2705_v46 = vsel %vm2293_vm3, %v2702_v41, -inf }
0x2133   :  { %2706 = vmax.xlane.f32.xlu1 %v2705_v46 }
0x21c0   :  { %v2707_v49 = vpop.xlane.xlu1 %2706 }
0x21c1   :  { %v2708_v52 = vsub.f32 %v2702_v41, %v2707_v49 }
0x21c3   :  { %v2709_v53 = vmul.f32 1.442695, %v2708_v52 }
0x21c5   :  { %7790 = vpow2.f32 %v2709_v53 }
0x21cf   :  { %v7791_v55 = vpop.eup %7790 }
0x21d0   :  { %v2711_v56 = vsel %vm2293_vm3, %v7791_v55, 0.0 }
0x21d1   :  { %2712 = vadd.xlane.f32.xlu0 %v2711_v56 }
0x225e   :  { %v2713_v58 = vpop.xlane.xlu0 %2712 }
0x225f   :  { %7792 = vrcp.f32 %v2713_v58 }
0x2269   :  { %v7793_v59 = vpop.eup %7792 }
0x226a   :  { %v2715_v11 = vmul.f32 %v7793_v59, %v7791_v55 }
0x226c   :  { %6713 = vmatmul.mubr.msk.f32.vlgmr.msra.gmra.mrb[40].mxu0 %vm2293_vm3, %v2715_v11 }
0x226d   :  { %7389 = vmatpush3.bf16.msra.mxu0 %v8656_v38  ;;  %6723 = vmatprep.mubr.msk.f32.mxu0 %vm7916_vm1, %v7917_v4 }
0x226e   :  { %7390 = vmatprep.subr.bf16.mxu0 %v7915_v2 }
0x2271   :  { %7392 = vmatpush3.bf16.msra.mxu0 %v8666_v60 }
0x2272   :  { %7393 = vmatprep.subr.bf16.mxu0 %v7915_v2 }
0x2274   :  { %6724 = vmatmul.mubr.msk.f32.vlgmr.msra.gmra.mrb[42].mxu0 %vm106_vm0, %v2632_v39 }
0x2275   :  { %7395 = vmatpush3.bf16.msra.mxu0 %v8639_v44  ;;  %6734 = vmatprep.mubr.msk.f32.mxu0 %vm7916_vm1, %v7917_v4 }
0x2276   :  { %7396 = vmatprep.subr.bf16.mxu0 %v7915_v2 }
0x2279   :  { %7398 = vmatpush3.bf16.msra.mxu0 %v8645_v47 }
0x227a   :  { %7405 = vmatprep.subr.bf16.mxu0 %v7915_v2 }
0x233f   :  { %v2785_v62 = vpop.f32.mrb[40].mxu0 }
0x2340   :  { %v6714_v50 = vpop.f32.mrb[41].mxu0  ;;  %6735 = vmatmul.mubr.msk.f32.vlgmr.msra.gmra.mrb[44].mxu0 %vm106_vm0, %v2785_v62 }
0x2341   :  { %7408 = vmatpush3.bf16.xpose.msk.msra.mxu0 %vm8540_vm2, %v8544_v42  ;;  %6764 = vmatprep.mubr.msk.f32.mxu0 %vm7916_vm1, %v7917_v4 }
0x2342   :  { %7409 = vmatprep.subr.bf16.mxu0 %v7915_v2 }
0x2347   :  { %v2855_v26 = vpop.f32.mrb[42].mxu0 }
0x2348   :  { %v6725_v0 = vpop.f32.mrb[43].mxu0 }
0x2349   :  { %7412 = vmatpush3.bf16.xpose.msk.msra.mxu0 %vm8540_vm2, %v8550_v45 }
0x234a   :  { %7413 = vmatprep.subr.bf16.mxu0 %v7915_v2 }
0x2351   :  { %7416 = vmatpush3.bf16.xpose.msk.msra.mxu0 %vm8540_vm2, %v8556_v48 }
0x2352   :  { %7417 = vmatprep.subr.bf16.mxu0 %v7915_v2 }
0x2359   :  { %7420 = vmatpush3.bf16.xpose.msk.msra.mxu0 %vm8540_vm2, %v8568_v54 }
0x235a   :  { %7445 = vmatprep.subr.bf16.mxu0 %v7915_v2 }
0x2413   :  { %v2928_v61 = vpop.f32.mrb[44].mxu0 }
0x2414   :  { %v2929_v1 = vadd.f32 %v2928_v61, %v2855_v26  ;;  %v6736_v3 = vpop.f32.mrb[45].mxu0 }
0x2416   :  { %v2932_v9 = vadd.f32 %v8702_v63, %v2929_v1 }
0x2418   :  { %7794 = vtanh.f32 %v2932_v9 }
0x2422   :  { %v7795_v14 = vpop.eup %7794 }
0x2423   :  { %5878 = vst.msk [vmem:[%s9373_s28 + $0x8] sm:$0xff] %vm106_vm0, %v7795_v14  ;;  %6746 = vmatmul.mubr.msk.f32.vlgmr.msra.gmra.mrb[30].mxu1 %vm106_vm0, %v7795_v14 }
0x2424   :  { %7423 = vmatpush3.bf16.msra.mxu1 %v8498_v8  ;;  %6783 = vmatprep.mubr.msk.f32.mxu1 %vm7916_vm1, %v7917_v4 }
0x2425   :  { %7424 = vmatprep.subr.bf16.mxu1 %v7915_v2 }
0x2428   :  { %7426 = vmatpush3.bf16.msra.mxu1 %v8508_v16 }
0x2429   :  { %7427 = vmatprep.subr.bf16.mxu1 %v7915_v2 }
0x242c   :  { %7429 = vmatpush3.bf16.msra.mxu1 %v8512_v25 }
0x242d   :  { %7430 = vmatprep.subr.bf16.mxu1 %v7915_v2 }
0x2430   :  { %7432 = vmatpush3.bf16.msra.mxu1 %v8516_v27 }
0x2431   :  { %7433 = vmatprep.subr.bf16.mxu1 %v7915_v2 }
0x24f6   :  { %v3007_v21 = vpop.f32.mrb[30].mxu1 }
0x24f7   :  { %v3011_v13 = vadd.f32 %v3007_v21, %v2041_v7  ;;  %v6747_v5 = vpop.f32.mrb[31].mxu1  ;;  %v2046_v7 = vadd.f32 %v8607_v15, %v8565_v24 }
0x24f9   :  { %7796 = vtanh.f32 %v3011_v13  ;;  %v5880_v40 = vmul.f32 -1.442695, %v3011_v13 }
0x24fb   :  { %7798 = vpow2.f32 %v5880_v40 }
0x2503   :  { %v7797_v12 = vpop.eup %7796 }
0x2504   :  { %3021 = vrot.lane.b32.xlu0 %v7797_v12, %s7919_s4 }
0x2505   :  { %v7799_v51 = vpop.eup %7798 }
0x2506   :  { %v3015_v37 = vadd.f32 1.0, %v7799_v51 }
0x2508   :  { %7800 = vrcp.f32 %v3015_v37 }
0x2512   :  { %v7801_v57 = vpop.eup %7800 }
0x2513   :  { %v3019_v35 = vmul.f32 %v7801_v57, %v8725_v30 }
0x2576   :  { %v3022_v28 = vpop.permute.xlu0 %3021 }
0x2577   :  { %v3024_v29 = vmul.f32 %v7801_v57, %v3022_v28 }
0x2579   :  { %3026 = vrot.lane.b32.xlu1 %v3024_v29, %s7920_s10 }
0x25eb   :  { %v3027_v19 = vpop.permute.xlu1 %3026 }
0x25ec   :  { %v8794_v33 = vadd.f32 %v3027_v19, %v3019_v35 }
0x25ee   :  { %7802 = vtanh.f32 %v8794_v33 }
0x25f8   :  { %v7803_v34 = vpop.eup %7802 }
0x25f9   :  { %3032 = vrot.lane.b32.xlu1 %v7803_v34, %s7919_s4 }
0x266b   :  { %v3033_v36 = vpop.permute.xlu1 %3032 }
0x266c   :  { %v3035_v39 = vmul.f32 %v7801_v57, %v3033_v36 }
0x266e   :  { %3037 = vrot.lane.b32.xlu0 %v3035_v39, %s7920_s10 }
0x26e0   :  { %v3038_v32 = vpop.permute.xlu0 %3037 }
0x26e1   :  { %6765 = vmatmul.mubr.msk.f32.vlgmr.msra.gmra.mrb[46].mxu0 %vm106_vm0, %v3038_v32 }
0x26e2   :  { %7447 = vmatpush3.bf16.msra.mxu0 %v8490_v6  ;;  %6816 = vmatprep.mubr.msk.f32.mxu0 %vm7916_vm1, %v7917_v4 }
0x26e3   :  { %7448 = vmatprep.subr.bf16.mxu0 %v7915_v2 }
0x26e6   :  { %7450 = vmatpush3.bf16.msra.mxu0 %v8503_v10 }
0x26e7   :  { %7467 = vmatprep.subr.bf16.mxu0 %v7915_v2 }
0x27b4   :  { %v3107_v30 = vpop.f32.mrb[46].mxu0 }
0x27b5   :  { %v3108_v41 = vadd.f32 %v3107_v30, %v8625_v31  ;;  %v6766_v43 = vpop.f32.mrb[47].mxu0 }
0x27b7   :  { %v3111_v46 = vsel %vm2293_vm3, %v3108_v41, -inf }
0x27b8   :  { %3112 = vmax.xlane.f32.xlu1 %v3111_v46 }
0x2845   :  { %v3113_v49 = vpop.xlane.xlu1 %3112 }
0x2846   :  { %v3114_v52 = vsub.f32 %v3108_v41, %v3113_v49 }
0x2848   :  { %v3115_v53 = vmul.f32 1.442695, %v3114_v52 }
0x284a   :  { %7804 = vpow2.f32 %v3115_v53 }
0x2854   :  { %v7805_v55 = vpop.eup %7804 }
0x2855   :  { %v3117_v56 = vsel %vm2293_vm3, %v7805_v55, 0.0 }
0x2856   :  { %3118 = vadd.xlane.f32.xlu0 %v3117_v56 }
0x28e3   :  { %v3119_v58 = vpop.xlane.xlu0 %3118 }
0x28e4   :  { %7806 = vrcp.f32 %v3119_v58 }
0x28ee   :  { %v7807_v59 = vpop.eup %7806 }
0x28ef   :  { %v3121_v11 = vmul.f32 %v7807_v59, %v7805_v55 }
0x28f1   :  { %6784 = vmatmul.mubr.msk.f32.vlgmr.msra.gmra.mrb[32].mxu1 %vm2293_vm3, %v3121_v11 }
0x28f2   :  { %7435 = vmatpush3.bf16.msra.mxu1 %v8656_v38  ;;  %6794 = vmatprep.mubr.msk.f32.mxu1 %vm7916_vm1, %v7917_v4 }
0x28f3   :  { %7436 = vmatprep.subr.bf16.mxu1 %v7915_v2 }
0x28f6   :  { %7438 = vmatpush3.bf16.msra.mxu1 %v8666_v60 }
0x28f7   :  { %7439 = vmatprep.subr.bf16.mxu1 %v7915_v2 }
0x28f9   :  { %6795 = vmatmul.mubr.msk.f32.vlgmr.msra.gmra.mrb[34].mxu1 %vm106_vm0, %v3038_v32 }
0x28fa   :  { %7441 = vmatpush3.bf16.msra.mxu1 %v8639_v44  ;;  %6805 = vmatprep.mubr.msk.f32.mxu1 %vm7916_vm1, %v7917_v4 }
0x28fb   :  { %7442 = vmatprep.subr.bf16.mxu1 %v7915_v2 }
0x28fe   :  { %7444 = vmatpush3.bf16.msra.mxu1 %v8645_v47 }
0x28ff   :  { %7451 = vmatprep.subr.bf16.mxu1 %v7915_v2 }
0x29c4   :  { %v3191_v62 = vpop.f32.mrb[32].mxu1 }
0x29c5   :  { %v6785_v50 = vpop.f32.mrb[33].mxu1  ;;  %6806 = vmatmul.mubr.msk.f32.vlgmr.msra.gmra.mrb[36].mxu1 %vm106_vm0, %v3191_v62 }
0x29c6   :  { %7454 = vmatpush3.bf16.xpose.msk.msra.mxu1 %vm8540_vm2, %v8544_v42  ;;  %6835 = vmatprep.mubr.msk.f32.mxu1 %vm7916_vm1, %v7917_v4 }
0x29c7   :  { %7455 = vmatprep.subr.bf16.mxu1 %v7915_v2 }
0x29cc   :  { %v3261_v26 = vpop.f32.mrb[34].mxu1 }
0x29cd   :  { %v6796_v0 = vpop.f32.mrb[35].mxu1 }
0x29ce   :  { %7458 = vmatpush3.bf16.xpose.msk.msra.mxu1 %vm8540_vm2, %v8550_v45 }
0x29cf   :  { %7459 = vmatprep.subr.bf16.mxu1 %v7915_v2 }
0x29d6   :  { %7462 = vmatpush3.bf16.xpose.msk.msra.mxu1 %vm8540_vm2, %v8556_v48 }
0x29d7   :  { %7463 = vmatprep.subr.bf16.mxu1 %v7915_v2 }
0x29de   :  { %7466 = vmatpush3.bf16.xpose.msk.msra.mxu1 %vm8540_vm2, %v8568_v54 }
0x29df   :  { %7491 = vmatprep.subr.bf16.mxu1 %v7915_v2 }
0x2a98   :  { %v3334_v61 = vpop.f32.mrb[36].mxu1 }
0x2a99   :  { %v3335_v1 = vadd.f32 %v3334_v61, %v3261_v26  ;;  %v6807_v3 = vpop.f32.mrb[37].mxu1 }
0x2a9b   :  { %v3338_v9 = vadd.f32 %v8702_v63, %v3335_v1 }
0x2a9d   :  { %7808 = vtanh.f32 %v3338_v9 }
0x2aa7   :  { %v7809_v14 = vpop.eup %7808 }
0x2aa8   :  { %5893 = vst.msk [vmem:[%s9373_s28 + $0x10] sm:$0xff] %vm106_vm0, %v7809_v14  ;;  %6817 = vmatmul.mubr.msk.f32.vlgmr.msra.gmra.mrb[48].mxu0 %vm106_vm0, %v7809_v14  ;;  %v2051_v14 = vadd.f32 %v8565_v24, %v8613_v18 }
0x2aa9   :  { %7469 = vmatpush3.bf16.msra.mxu0 %v8498_v8  ;;  %6854 = vmatprep.mubr.msk.f32.mxu0 %vm7916_vm1, %v7917_v4 }
0x2aaa   :  { %7470 = vmatprep.subr.bf16.mxu0 %v7915_v2 }
0x2aad   :  { %7472 = vmatpush3.bf16.msra.mxu0 %v8508_v16 }
0x2aae   :  { %7473 = vmatprep.subr.bf16.mxu0 %v7915_v2 }
0x2ab1   :  { %7475 = vmatpush3.bf16.msra.mxu0 %v8512_v25 }
0x2ab2   :  { %7476 = vmatprep.subr.bf16.mxu0 %v7915_v2 }
0x2ab5   :  { %7478 = vmatpush3.bf16.msra.mxu0 %v8516_v27 }
0x2ab6   :  { %7479 = vmatprep.subr.bf16.mxu0 %v7915_v2 }
0x2b7b   :  { %v3413_v21 = vpop.f32.mrb[48].mxu0 }
0x2b7c   :  { %v3417_v13 = vadd.f32 %v3413_v21, %v2046_v7  ;;  %v6818_v5 = vpop.f32.mrb[49].mxu0 }
0x2b7e   :  { %7810 = vtanh.f32 %v3417_v13  ;;  %v5895_v40 = vmul.f32 -1.442695, %v3417_v13 }
0x2b80   :  { %7812 = vpow2.f32 %v5895_v40 }
0x2b88   :  { %v7811_v12 = vpop.eup %7810 }
0x2b89   :  { %3427 = vrot.lane.b32.xlu0 %v7811_v12, %s7919_s4 }
0x2b8a   :  { %v7813_v51 = vpop.eup %7812 }
0x2b8b   :  { %v3421_v37 = vadd.f32 1.0, %v7813_v51 }
0x2b8d   :  { %7814 = vrcp.f32 %v3421_v37 }
0x2b97   :  { %v7815_v57 = vpop.eup %7814 }
0x2b98   :  { %v3425_v35 = vmul.f32 %v7815_v57, %v8794_v33 }
0x2bfb   :  { %v3428_v28 = vpop.permute.xlu0 %3427 }
0x2bfc   :  { %v3430_v29 = vmul.f32 %v7815_v57, %v3428_v28 }
0x2bfe   :  { %3432 = vrot.lane.b32.xlu1 %v3430_v29, %s7920_s10 }
0x2c70   :  { %v3433_v15 = vpop.permute.xlu1 %3432 }
0x2c71   :  { %v8863_v19 = vadd.f32 %v3433_v15, %v3425_v35 }
0x2c73   :  { %7816 = vtanh.f32 %v8863_v19 }
0x2c7d   :  { %v7817_v34 = vpop.eup %7816 }
0x2c7e   :  { %3438 = vrot.lane.b32.xlu1 %v7817_v34, %s7919_s4 }
0x2cf0   :  { %v3439_v36 = vpop.permute.xlu1 %3438 }
0x2cf1   :  { %v3441_v39 = vmul.f32 %v7815_v57, %v3439_v36 }
0x2cf3   :  { %3443 = vrot.lane.b32.xlu0 %v3441_v39, %s7920_s10 }
0x2d65   :  { %v3444_v32 = vpop.permute.xlu0 %3443 }
0x2d66   :  { %6836 = vmatmul.mubr.msk.f32.vlgmr.msra.gmra.mrb[38].mxu1 %vm106_vm0, %v3444_v32 }
0x2d67   :  { %7493 = vmatpush3.bf16.msra.mxu1 %v8490_v6  ;;  %6887 = vmatprep.mubr.msk.f32.mxu1 %vm7916_vm1, %v7917_v4 }
0x2d68   :  { %7494 = vmatprep.subr.bf16.mxu1 %v7915_v2 }
0x2d6b   :  { %7496 = vmatpush3.bf16.msra.mxu1 %v8503_v10 }
0x2d6c   :  { %7513 = vmatprep.subr.bf16.mxu1 %v7915_v2 }
0x2e39   :  { %v3513_v33 = vpop.f32.mrb[38].mxu1 }
0x2e3a   :  { %v3514_v30 = vadd.f32 %v3513_v33, %v8625_v31  ;;  %v6837_v41 = vpop.f32.mrb[39].mxu1 }
0x2e3c   :  { %v3517_v43 = vsel %vm2293_vm3, %v3514_v30, -inf }
0x2e3d   :  { %3518 = vmax.xlane.f32.xlu1 %v3517_v43 }
0x2eca   :  { %v3519_v46 = vpop.xlane.xlu1 %3518 }
0x2ecb   :  { %v3520_v49 = vsub.f32 %v3514_v30, %v3519_v46 }
0x2ecd   :  { %v3521_v52 = vmul.f32 1.442695, %v3520_v49 }
0x2ecf   :  { %7818 = vpow2.f32 %v3521_v52 }
0x2ed9   :  { %v7819_v53 = vpop.eup %7818 }
0x2eda   :  { %v3523_v55 = vsel %vm2293_vm3, %v7819_v53, 0.0 }
0x2edb   :  { %3524 = vadd.xlane.f32.xlu0 %v3523_v55 }
0x2f68   :  { %v3525_v56 = vpop.xlane.xlu0 %3524 }
0x2f69   :  { %7820 = vrcp.f32 %v3525_v56 }
0x2f73   :  { %v7821_v58 = vpop.eup %7820 }
0x2f74   :  { %v3527_v59 = vmul.f32 %v7821_v58, %v7819_v53 }
0x2f76   :  { %6855 = vmatmul.mubr.msk.f32.vlgmr.msra.gmra.mrb[50].mxu0 %vm2293_vm3, %v3527_v59 }
0x2f77   :  { %7481 = vmatpush3.bf16.msra.mxu0 %v8656_v38  ;;  %6865 = vmatprep.mubr.msk.f32.mxu0 %vm7916_vm1, %v7917_v4 }
0x2f78   :  { %7482 = vmatprep.subr.bf16.mxu0 %v7915_v2 }
0x2f7b   :  { %7484 = vmatpush3.bf16.msra.mxu0 %v8666_v60 }
0x2f7c   :  { %7485 = vmatprep.subr.bf16.mxu0 %v7915_v2 }
0x2f7e   :  { %6866 = vmatmul.mubr.msk.f32.vlgmr.msra.gmra.mrb[52].mxu0 %vm106_vm0, %v3444_v32 }
0x2f7f   :  { %7487 = vmatpush3.bf16.msra.mxu0 %v8639_v44  ;;  %6876 = vmatprep.mubr.msk.f32.mxu0 %vm7916_vm1, %v7917_v4 }
0x2f80   :  { %7488 = vmatprep.subr.bf16.mxu0 %v7915_v2 }
0x2f83   :  { %7490 = vmatpush3.bf16.msra.mxu0 %v8645_v47 }
0x2f84   :  { %7497 = vmatprep.subr.bf16.mxu0 %v7915_v2 }
0x3049   :  { %v3597_v11 = vpop.f32.mrb[50].mxu0 }
0x304a   :  { %v6856_v62 = vpop.f32.mrb[51].mxu0  ;;  %6877 = vmatmul.mubr.msk.f32.vlgmr.msra.gmra.mrb[54].mxu0 %vm106_vm0, %v3597_v11 }
0x304b   :  { %7500 = vmatpush3.bf16.xpose.msk.msra.mxu0 %vm8540_vm2, %v8544_v42  ;;  %6906 = vmatprep.mubr.msk.f32.mxu0 %vm7916_vm1, %v7917_v4 }
0x304c   :  { %7501 = vmatprep.subr.bf16.mxu0 %v7915_v2 }
0x3051   :  { %v3667_v50 = vpop.f32.mrb[52].mxu0 }
0x3052   :  { %v6867_v26 = vpop.f32.mrb[53].mxu0 }
0x3053   :  { %7504 = vmatpush3.bf16.xpose.msk.msra.mxu0 %vm8540_vm2, %v8550_v45 }
0x3054   :  { %7505 = vmatprep.subr.bf16.mxu0 %v7915_v2 }
0x305b   :  { %7508 = vmatpush3.bf16.xpose.msk.msra.mxu0 %vm8540_vm2, %v8556_v48 }
0x305c   :  { %7509 = vmatprep.subr.bf16.mxu0 %v7915_v2 }
0x3063   :  { %7512 = vmatpush3.bf16.xpose.msk.msra.mxu0 %vm8540_vm2, %v8568_v54 }
0x3064   :  { %7537 = vmatprep.subr.bf16.mxu0 %v7915_v2 }
0x311d   :  { %v3740_v0 = vpop.f32.mrb[54].mxu0 }
0x311e   :  { %v3741_v61 = vadd.f32 %v3740_v0, %v3667_v50  ;;  %v6878_v1 = vpop.f32.mrb[55].mxu0 }
0x3120   :  { %v3744_v3 = vadd.f32 %v8702_v63, %v3741_v61 }
0x3122   :  { %7822 = vtanh.f32 %v3744_v3  ;;  %v2056_v3 = vadd.f32 %v8611_v23, %v8565_v24 }
0x312c   :  { %v7823_v9 = vpop.eup %7822 }
0x312d   :  { %5908 = vst.msk [vmem:[%s9373_s28 + $0x18] sm:$0xff] %vm106_vm0, %v7823_v9  ;;  %6888 = vmatmul.mubr.msk.f32.vlgmr.msra.gmra.mrb[40].mxu1 %vm106_vm0, %v7823_v9 }
0x312e   :  { %7515 = vmatpush3.bf16.msra.mxu1 %v8498_v8  ;;  %6925 = vmatprep.mubr.msk.f32.mxu1 %vm7916_vm1, %v7917_v4 }
0x312f   :  { %7516 = vmatprep.subr.bf16.mxu1 %v7915_v2 }
0x3132   :  { %7518 = vmatpush3.bf16.msra.mxu1 %v8508_v16 }
0x3133   :  { %7519 = vmatprep.subr.bf16.mxu1 %v7915_v2 }
0x3136   :  { %7521 = vmatpush3.bf16.msra.mxu1 %v8512_v25 }
0x3137   :  { %7522 = vmatprep.subr.bf16.mxu1 %v7915_v2 }
0x313a   :  { %7524 = vmatpush3.bf16.msra.mxu1 %v8516_v27 }
0x313b   :  { %7525 = vmatprep.subr.bf16.mxu1 %v7915_v2 }
0x3200   :  { %v3819_v7 = vpop.f32.mrb[40].mxu1 }
0x3201   :  { %v3823_v21 = vadd.f32 %v3819_v7, %v2051_v14  ;;  %v6889_v13 = vpop.f32.mrb[41].mxu1 }
0x3203   :  { %7824 = vtanh.f32 %v3823_v21  ;;  %v5910_v12 = vmul.f32 -1.442695, %v3823_v21 }
0x3205   :  { %7826 = vpow2.f32 %v5910_v12 }
0x320d   :  { %v7825_v5 = vpop.eup %7824 }
0x320e   :  { %3833 = vrot.lane.b32.xlu0 %v7825_v5, %s7919_s4 }
0x320f   :  { %v7827_v40 = vpop.eup %7826 }
0x3210   :  { %v3827_v51 = vadd.f32 1.0, %v7827_v40 }
0x3212   :  { %7828 = vrcp.f32 %v3827_v51 }
0x321c   :  { %v7829_v37 = vpop.eup %7828 }
0x321d   :  { %v3831_v29 = vmul.f32 %v7829_v37, %v8863_v19 }
0x3280   :  { %v3834_v57 = vpop.permute.xlu0 %3833 }
0x3281   :  { %v3836_v28 = vmul.f32 %v7829_v37, %v3834_v57 }
0x3283   :  { %3838 = vrot.lane.b32.xlu1 %v3836_v28, %s7920_s10 }
0x32f5   :  { %v3839_v18 = vpop.permute.xlu1 %3838 }
0x32f6   :  { %v8932_v35 = vadd.f32 %v3839_v18, %v3831_v29 }
0x32f8   :  { %7830 = vtanh.f32 %v8932_v35 }
0x3302   :  { %v7831_v15 = vpop.eup %7830 }
0x3303   :  { %3844 = vrot.lane.b32.xlu1 %v7831_v15, %s7919_s4 }
0x3375   :  { %v3845_v34 = vpop.permute.xlu1 %3844 }
0x3376   :  { %v3847_v36 = vmul.f32 %v7829_v37, %v3845_v34 }
0x3378   :  { %3849 = vrot.lane.b32.xlu0 %v3847_v36, %s7920_s10 }
0x33ea   :  { %v3850_v39 = vpop.permute.xlu0 %3849 }
0x33eb   :  { %6907 = vmatmul.mubr.msk.f32.vlgmr.msra.gmra.mrb[56].mxu0 %vm106_vm0, %v3850_v39 }
0x33ec   :  { %7539 = vmatpush3.bf16.msra.mxu0 %v8490_v6  ;;  %6958 = vmatprep.mubr.msk.f32.mxu0 %vm7916_vm1, %v7917_v4 }
0x33ed   :  { %7540 = vmatprep.subr.bf16.mxu0 %v7915_v2 }
0x33f0   :  { %7542 = vmatpush3.bf16.msra.mxu0 %v8503_v10 }
0x33f1   :  { %7559 = vmatprep.subr.bf16.mxu0 %v7915_v2 }
0x34be   :  { %v3919_v19 = vpop.f32.mrb[56].mxu0 }
0x34bf   :  { %v3920_v32 = vadd.f32 %v3919_v19, %v8625_v31  ;;  %v6908_v33 = vpop.f32.mrb[57].mxu0 }
0x34c1   :  { %v3923_v30 = vsel %vm2293_vm3, %v3920_v32, -inf }
0x34c2   :  { %3924 = vmax.xlane.f32.xlu1 %v3923_v30 }
0x354f   :  { %v3925_v41 = vpop.xlane.xlu1 %3924 }
0x3550   :  { %v3926_v43 = vsub.f32 %v3920_v32, %v3925_v41 }
0x3552   :  { %v3927_v46 = vmul.f32 1.442695, %v3926_v43 }
0x3554   :  { %7832 = vpow2.f32 %v3927_v46 }
0x355e   :  { %v7833_v49 = vpop.eup %7832 }
0x355f   :  { %v3929_v52 = vsel %vm2293_vm3, %v7833_v49, 0.0 }
0x3560   :  { %3930 = vadd.xlane.f32.xlu0 %v3929_v52 }
0x35ed   :  { %v3931_v53 = vpop.xlane.xlu0 %3930 }
0x35ee   :  { %7834 = vrcp.f32 %v3931_v53 }
0x35f8   :  { %v7835_v55 = vpop.eup %7834 }
0x35f9   :  { %v3933_v56 = vmul.f32 %v7835_v55, %v7833_v49 }
0x35fb   :  { %6926 = vmatmul.mubr.msk.f32.vlgmr.msra.gmra.mrb[42].mxu1 %vm2293_vm3, %v3933_v56 }
0x35fc   :  { %7527 = vmatpush3.bf16.msra.mxu1 %v8656_v38  ;;  %6936 = vmatprep.mubr.msk.f32.mxu1 %vm7916_vm1, %v7917_v4 }
0x35fd   :  { %7528 = vmatprep.subr.bf16.mxu1 %v7915_v2 }
0x3600   :  { %7530 = vmatpush3.bf16.msra.mxu1 %v8666_v60 }
0x3601   :  { %7531 = vmatprep.subr.bf16.mxu1 %v7915_v2 }
0x3603   :  { %6937 = vmatmul.mubr.msk.f32.vlgmr.msra.gmra.mrb[44].mxu1 %vm106_vm0, %v3850_v39 }
0x3604   :  { %7533 = vmatpush3.bf16.msra.mxu1 %v8639_v44  ;;  %6947 = vmatprep.mubr.msk.f32.mxu1 %vm7916_vm1, %v7917_v4 }
0x3605   :  { %7534 = vmatprep.subr.bf16.mxu1 %v7915_v2 }
0x3608   :  { %7536 = vmatpush3.bf16.msra.mxu1 %v8645_v47 }
0x3609   :  { %7543 = vmatprep.subr.bf16.mxu1 %v7915_v2 }
0x36ce   :  { %v4003_v58 = vpop.f32.mrb[42].mxu1 }
0x36cf   :  { %v6927_v59 = vpop.f32.mrb[43].mxu1  ;;  %6948 = vmatmul.mubr.msk.f32.vlgmr.msra.gmra.mrb[46].mxu1 %vm106_vm0, %v4003_v58 }
0x36d0   :  { %7546 = vmatpush3.bf16.xpose.msk.msra.mxu1 %vm8540_vm2, %v8544_v42  ;;  %6977 = vmatprep.mubr.msk.f32.mxu1 %vm7916_vm1, %v7917_v4 }
0x36d1   :  { %7547 = vmatprep.subr.bf16.mxu1 %v7915_v2 }
0x36d6   :  { %v4073_v11 = vpop.f32.mrb[44].mxu1 }
0x36d7   :  { %v6938_v62 = vpop.f32.mrb[45].mxu1 }
0x36d8   :  { %7550 = vmatpush3.bf16.xpose.msk.msra.mxu1 %vm8540_vm2, %v8550_v45 }
0x36d9   :  { %7551 = vmatprep.subr.bf16.mxu1 %v7915_v2 }
0x36e0   :  { %7554 = vmatpush3.bf16.xpose.msk.msra.mxu1 %vm8540_vm2, %v8556_v48 }
0x36e1   :  { %7555 = vmatprep.subr.bf16.mxu1 %v7915_v2 }
0x36e8   :  { %7558 = vmatpush3.bf16.xpose.msk.msra.mxu1 %vm8540_vm2, %v8568_v54 }
0x36e9   :  { %7583 = vmatprep.subr.bf16.mxu1 %v7915_v2 }
0x37a2   :  { %v4146_v50 = vpop.f32.mrb[46].mxu1 }
0x37a3   :  { %v4147_v26 = vadd.f32 %v4146_v50, %v4073_v11  ;;  %v6949_v0 = vpop.f32.mrb[47].mxu1 }
0x37a5   :  { %v4150_v61 = vadd.f32 %v8702_v63, %v4147_v26 }
0x37a7   :  { %7836 = vtanh.f32 %v4150_v61 }
0x37b1   :  { %v7837_v1 = vpop.eup %7836 }
0x37b2   :  { %5923 = vst.msk [vmem:[%s9373_s28 + $0x20] sm:$0xff] %vm106_vm0, %v7837_v1  ;;  %6959 = vmatmul.mubr.msk.f32.vlgmr.msra.gmra.mrb[58].mxu0 %vm106_vm0, %v7837_v1 }
0x37b3   :  { %7561 = vmatpush3.bf16.msra.mxu0 %v8498_v8  ;;  %6996 = vmatprep.mubr.msk.f32.mxu0 %vm7916_vm1, %v7917_v4 }
0x37b4   :  { %7562 = vmatprep.subr.bf16.mxu0 %v7915_v2 }
0x37b7   :  { %7564 = vmatpush3.bf16.msra.mxu0 %v8508_v16 }
0x37b8   :  { %7565 = vmatprep.subr.bf16.mxu0 %v7915_v2 }
0x37bb   :  { %7567 = vmatpush3.bf16.msra.mxu0 %v8512_v25 }
0x37bc   :  { %7568 = vmatprep.subr.bf16.mxu0 %v7915_v2 }
0x37bf   :  { %7570 = vmatpush3.bf16.msra.mxu0 %v8516_v27 }
0x37c0   :  { %7571 = vmatprep.subr.bf16.mxu0 %v7915_v2 }
0x3885   :  { %v4225_v9 = vpop.f32.mrb[58].mxu0 }
0x3886   :  { %v4229_v14 = vadd.f32 %v4225_v9, %v2056_v3  ;;  %v6960_v7 = vpop.f32.mrb[59].mxu0 }
0x3888   :  { %7838 = vtanh.f32 %v4229_v14  ;;  %v5925_v13 = vmul.f32 -1.442695, %v4229_v14 }
0x388a   :  { %7840 = vpow2.f32 %v5925_v13 }
0x3892   :  { %v7839_v21 = vpop.eup %7838 }
0x3893   :  { %4239 = vrot.lane.b32.xlu0 %v7839_v21, %s7919_s4 }
0x3894   :  { %v7841_v5 = vpop.eup %7840 }
0x3895   :  { %v4233_v12 = vadd.f32 1.0, %v7841_v5 }
0x3897   :  { %7842 = vrcp.f32 %v4233_v12 }
0x38a1   :  { %v7843_v40 = vpop.eup %7842 }
0x38a2   :  { %v4237_v57 = vmul.f32 %v7843_v40, %v8932_v35 }
0x3905   :  { %v4240_v51 = vpop.permute.xlu0 %4239 }
0x3906   :  { %v4242_v37 = vmul.f32 %v7843_v40, %v4240_v51 }
0x3908   :  { %4244 = vrot.lane.b32.xlu1 %v4242_v37, %s7920_s10 }
0x397a   :  { %v4245_v24 = vpop.permute.xlu1 %4244 }
0x397b   :  { %v9001_v23 = vadd.f32 %v4245_v24, %v4237_v57 }
0x397d   :  { %7844 = vtanh.f32 %v9001_v23 }
0x3987   :  { %v7845_v28 = vpop.eup %7844 }
0x3988   :  { %4250 = vrot.lane.b32.xlu1 %v7845_v28, %s7919_s4 }
0x39fa   :  { %v4251_v29 = vpop.permute.xlu1 %4250 }
0x39fb   :  { %v4253_v18 = vmul.f32 %v7843_v40, %v4251_v29 }
0x39fd   :  { %4255 = vrot.lane.b32.xlu0 %v4253_v18, %s7920_s10 }
0x3a6f   :  { %v4256_v15 = vpop.permute.xlu0 %4255 }
0x3a70   :  { %6978 = vmatmul.mubr.msk.f32.vlgmr.msra.gmra.mrb[48].mxu1 %vm106_vm0, %v4256_v15 }
0x3a71   :  { %7585 = vmatpush3.bf16.msra.mxu1 %v8490_v6  ;;  %7029 = vmatprep.mubr.msk.f32.mxu1 %vm7916_vm1, %v7917_v4 }
0x3a72   :  { %7586 = vmatprep.subr.bf16.mxu1 %v7915_v2 }
0x3a75   :  { %7588 = vmatpush3.bf16.msra.mxu1 %v8503_v10 }
0x3a76   :  { %7605 = vmatprep.subr.bf16.mxu1 %v7915_v2 }
0x3b43   :  { %v4325_v35 = vpop.f32.mrb[48].mxu1 }
0x3b44   :  { %v4326_v34 = vadd.f32 %v4325_v35, %v8625_v31  ;;  %v6979_v36 = vpop.f32.mrb[49].mxu1 }
0x3b46   :  { %v4329_v39 = vsel %vm2293_vm3, %v4326_v34, -inf }
0x3b47   :  { %4330 = vmax.xlane.f32.xlu1 %v4329_v39 }
0x3bd4   :  { %v4331_v19 = vpop.xlane.xlu1 %4330 }
0x3bd5   :  { %v4332_v32 = vsub.f32 %v4326_v34, %v4331_v19 }
0x3bd7   :  { %v4333_v33 = vmul.f32 1.442695, %v4332_v32 }
0x3bd9   :  { %7846 = vpow2.f32 %v4333_v33 }
0x3be3   :  { %v7847_v30 = vpop.eup %7846 }
0x3be4   :  { %v4335_v41 = vsel %vm2293_vm3, %v7847_v30, 0.0 }
0x3be5   :  { %4336 = vadd.xlane.f32.xlu0 %v4335_v41 }
0x3c72   :  { %v4337_v43 = vpop.xlane.xlu0 %4336 }
0x3c73   :  { %7848 = vrcp.f32 %v4337_v43 }
0x3c7d   :  { %v7849_v46 = vpop.eup %7848 }
0x3c7e   :  { %v4339_v49 = vmul.f32 %v7849_v46, %v7847_v30 }
0x3c80   :  { %6997 = vmatmul.mubr.msk.f32.vlgmr.msra.gmra.mrb[60].mxu0 %vm2293_vm3, %v4339_v49  ;;  %v9130_v49 = vld [vmem:[%s9372_s19] ss:$0 sm:$0xff] }
0x3c81   :  { %7573 = vmatpush3.bf16.msra.mxu0 %v8656_v38  ;;  %7007 = vmatprep.mubr.msk.f32.mxu0 %vm7916_vm1, %v7917_v4 }
0x3c82   :  { %7574 = vmatprep.subr.bf16.mxu0 %v7915_v2 }
0x3c85   :  { %7576 = vmatpush3.bf16.msra.mxu0 %v8666_v60 }
0x3c86   :  { %7577 = vmatprep.subr.bf16.mxu0 %v7915_v2 }
0x3c88   :  { %7008 = vmatmul.mubr.msk.f32.vlgmr.msra.gmra.mrb[62].mxu0 %vm106_vm0, %v4256_v15 }
0x3c89   :  { %7579 = vmatpush3.bf16.msra.mxu0 %v8639_v44  ;;  %7018 = vmatprep.mubr.msk.f32.mxu0 %vm7916_vm1, %v7917_v4 }
0x3c8a   :  { %7580 = vmatprep.subr.bf16.mxu0 %v7915_v2 }
0x3c8d   :  { %7582 = vmatpush3.bf16.msra.mxu0 %v8645_v47 }
0x3c8e   :  { %7589 = vmatprep.subr.bf16.mxu0 %v7915_v2 }
0x3d53   :  { %v4409_v31 = vpop.f32.mrb[60].mxu0 }
0x3d54   :  { %v6998_v52 = vpop.f32.mrb[61].mxu0  ;;  %7019 = vmatmul.mubr.msk.f32.vlgmr.msra.gmra.mrb[64].mxu0 %vm106_vm0, %v4409_v31 }
0x3d55   :  { %7592 = vmatpush3.bf16.xpose.msk.msra.mxu0 %vm8540_vm2, %v8544_v42  ;;  %7048 = vmatprep.mubr.msk.f32.mxu0 %vm7916_vm1, %v7917_v4 }
0x3d56   :  { %7593 = vmatprep.subr.bf16.mxu0 %v7915_v2 }
0x3d5b   :  { %v4479_v53 = vpop.f32.mrb[62].mxu0 }
0x3d5c   :  { %v7009_v55 = vpop.f32.mrb[63].mxu0 }
0x3d5d   :  { %7596 = vmatpush3.bf16.xpose.msk.msra.mxu0 %vm8540_vm2, %v8550_v45 }
0x3d5e   :  { %7597 = vmatprep.subr.bf16.mxu0 %v7915_v2 }
0x3d65   :  { %7600 = vmatpush3.bf16.xpose.msk.msra.mxu0 %vm8540_vm2, %v8556_v48 }
0x3d66   :  { %7601 = vmatprep.subr.bf16.mxu0 %v7915_v2 }
0x3d6d   :  { %7604 = vmatpush3.bf16.xpose.msk.msra.mxu0 %vm8540_vm2, %v8568_v54 }
0x3d6e   :  { %7629 = vmatprep.subr.bf16.mxu0 %v7915_v2 }
0x3e27   :  { %v4552_v56 = vpop.f32.mrb[64].mxu0 }
0x3e28   :  { %v4553_v58 = vadd.f32 %v4552_v56, %v4479_v53  ;;  %v7020_v59 = vpop.f32.mrb[65].mxu0 }
0x3e2a   :  { %v4556_v11 = vadd.f32 %v8702_v63, %v4553_v58  ;;  %v9068_v63 = vld [vmem:[%s9369_s15] ss:$0 sm:$0xff] }
0x3e2b   :  { %v2061_v50 = vadd.f32 %v9068_v63, %v8617_v17 }
0x3e2c   :  { %7850 = vtanh.f32 %v4556_v11  ;;  %v5381_v11 = vld [vmem:[%s9374_s23] sm:$0xff] }
0x3e36   :  { %v7851_v62 = vpop.eup %7850 }
0x3e37   :  { %5938 = vst.msk [vmem:[%s9373_s28 + $0x28] sm:$0xff] %vm106_vm0, %v7851_v62  ;;  %7030 = vmatmul.mubr.msk.f32.vlgmr.msra.gmra.mrb[50].mxu1 %vm106_vm0, %v7851_v62  ;;  %v5382_v62 = vld [vmem:[%s9374_s23 + $0x8] sm:$0xff] }
0x3e38   :  { %7607 = vmatpush3.bf16.msra.mxu1 %v8498_v8  ;;  %7067 = vmatprep.mubr.msk.f32.mxu1 %vm7916_vm1, %v7917_v4 }
0x3e39   :  { %7608 = vmatprep.subr.bf16.mxu1 %v7915_v2 }
0x3e3c   :  { %7610 = vmatpush3.bf16.msra.mxu1 %v8508_v16 }
0x3e3d   :  { %7611 = vmatprep.subr.bf16.mxu1 %v7915_v2 }
0x3e40   :  { %7613 = vmatpush3.bf16.msra.mxu1 %v8512_v25 }
0x3e41   :  { %7614 = vmatprep.subr.bf16.mxu1 %v7915_v2 }
0x3e44   :  { %7616 = vmatpush3.bf16.msra.mxu1 %v8516_v27 }
0x3e45   :  { %7617 = vmatprep.subr.bf16.mxu1 %v7915_v2 }
0x3f0a   :  { %v4631_v26 = vpop.f32.mrb[50].mxu1 }
0x3f0b   :  { %v4635_v0 = vadd.f32 %v4631_v26, %v2061_v50  ;;  %v7031_v61 = vpop.f32.mrb[51].mxu1 }
0x3f0c   :  { %v5383_v61 = vld [vmem:[%s9374_s23 + $0x10] sm:$0xff] }
0x3f0d   :  { %7852 = vtanh.f32 %v4635_v0  ;;  %v5940_v3 = vmul.f32 -1.442695, %v4635_v0 }
0x3f0f   :  { %7854 = vpow2.f32 %v5940_v3 }
0x3f17   :  { %v7853_v1 = vpop.eup %7852 }
0x3f18   :  { %4645 = vrot.lane.b32.xlu0 %v7853_v1, %s7919_s4  ;;  %v5384_v1 = vld [vmem:[%s9374_s23 + $0x18] sm:$0xff] }
0x3f19   :  { %v7855_v9 = vpop.eup %7854  ;;  %v7679_v3 = vpack.c.bf16 %v5384_v1, %v5383_v61 }
0x3f1a   :  { %v4639_v14 = vadd.f32 1.0, %v7855_v9  ;;  %v5373_v9 = vld [vmem:[%s9375_s22] sm:$0xff] }
0x3f1c   :  { %7856 = vrcp.f32 %v4639_v14 }
0x3f26   :  { %v7857_v7 = vpop.eup %7856 }
0x3f27   :  { %v4643_v5 = vmul.f32 %v7857_v7, %v9001_v23  ;;  %v9090_v23 = vld [vmem:[%s9370_s17] sm:$0xff] }
0x3f8a   :  { %v4646_v21 = vpop.permute.xlu0 %4645 }
0x3f8b   :  { %v4648_v13 = vmul.f32 %v7857_v7, %v4646_v21  ;;  %v5375_v21 = vld [vmem:[%s9375_s22 + $0x10] sm:$0xff] }
0x3f8d   :  { %4650 = vrot.lane.b32.xlu1 %v4648_v13, %s7920_s10  ;;  %v5376_v13 = vld [vmem:[%s9375_s22 + $0x18] sm:$0xff] }
0x3fff   :  { %v4651_v17 = vpop.permute.xlu1 %4650 }
0x4000   :  { %v9075_v12 = vadd.f32 %v4651_v17, %v4643_v5  ;;  %v5377_v5 = vld [vmem:[%s9375_s22 + $0x20] sm:$0xff]  ;;  %v5378_v17 = vld [vmem:[%s9375_s22 + $0x28] sm:$0xff] }
0x4002   :  { %7858 = vtanh.f32 %v9075_v12 }
0x400c   :  { %v7859_v40 = vpop.eup %7858 }
0x400d   :  { %4656 = vrot.lane.b32.xlu1 %v7859_v40, %s7919_s4  ;;  %v5380_v40 = vld [vmem:[%s9375_s22 + $0x38] sm:$0xff] }
0x407f   :  { %v4657_v51 = vpop.permute.xlu1 %4656 }
0x4080   :  { %v4659_v37 = vmul.f32 %v7857_v7, %v4657_v51  ;;  %v5374_v7 = vld [vmem:[%s9375_s22 + $0x8] sm:$0xff] }
0x4082   :  { %4661 = vrot.lane.b32.xlu0 %v4659_v37, %s7920_s10 }
0x40f4   :  { %v4662_v57 = vpop.permute.xlu0 %4661 }
0x40f5   :  { %7049 = vmatmul.mubr.msk.f32.vlgmr.msra.gmra.mrb[66].mxu0 %vm106_vm0, %v4662_v57 }
0x40f6   :  { %7631 = vmatpush3.bf16.msra.mxu0 %v8490_v6  ;;  %7100 = vmatprep.mubr.msk.f32.mxu0 %vm7916_vm1, %v7917_v4 }
0x40f7   :  { %7632 = vmatprep.subr.bf16.mxu0 %v7915_v2 }
0x40fa   :  { %7634 = vmatpush3.bf16.msra.mxu0 %v8503_v10 }
0x40fb   :  { %7651 = vmatprep.subr.bf16.mxu0 %v7915_v2 }
0x41c8   :  { %v4731_v24 = vpop.f32.mrb[66].mxu0 }
0x41c9   :  { %v4732_v28 = vadd.f32 %v9090_v23, %v4731_v24  ;;  %v7050_v29 = vpop.f32.mrb[67].mxu0 }
0x41cb   :  { %v4735_v6 = vsel %vm2293_vm3, %v4732_v28, -inf }
0x41cc   :  { %4736 = vmax.xlane.f32.xlu1 %v4735_v6 }
0x4259   :  { %v4737_v18 = vpop.xlane.xlu1 %4736 }
0x425a   :  { %v4738_v15 = vsub.f32 %v4732_v28, %v4737_v18 }
0x425c   :  { %v4739_v35 = vmul.f32 1.442695, %v4738_v15 }
0x425e   :  { %7860 = vpow2.f32 %v4739_v35 }
0x4268   :  { %v7861_v34 = vpop.eup %7860 }
0x4269   :  { %v4741_v10 = vsel %vm2293_vm3, %v7861_v34, 0.0 }
0x426a   :  { %4742 = vadd.xlane.f32.xlu0 %v4741_v10 }
0x42f7   :  { %v4743_v36 = vpop.xlane.xlu0 %4742 }
0x42f8   :  { %7862 = vrcp.f32 %v4743_v36 }
0x4302   :  { %v7863_v39 = vpop.eup %7862 }
0x4303   :  { %v4745_v19 = vmul.f32 %v7863_v39, %v7861_v34 }
0x4305   :  { %7068 = vmatmul.mubr.msk.f32.vlgmr.msra.gmra.mrb[52].mxu1 %vm2293_vm3, %v4745_v19  ;;  %v5521_v19 = vld [vmem:[%s9373_s28] sm:$0xff] }
0x4306   :  { %7619 = vmatpush3.bf16.msra.mxu1 %v8656_v38  ;;  %7078 = vmatprep.mubr.msk.f32.mxu1 %vm7916_vm1, %v7917_v4 }
0x4307   :  { %7620 = vmatprep.subr.bf16.mxu1 %v7915_v2 }
0x430a   :  { %7622 = vmatpush3.bf16.msra.mxu1 %v8666_v60 }
0x430b   :  { %7623 = vmatprep.subr.bf16.mxu1 %v7915_v2 }
0x430d   :  { %7079 = vmatmul.mubr.msk.f32.vlgmr.msra.gmra.mrb[54].mxu1 %vm106_vm0, %v4662_v57 }
0x430e   :  { %7625 = vmatpush3.bf16.msra.mxu1 %v8639_v44  ;;  %7089 = vmatprep.mubr.msk.f32.mxu1 %vm7916_vm1, %v7917_v4 }
0x430f   :  { %7626 = vmatprep.subr.bf16.mxu1 %v7915_v2 }
0x4312   :  { %7628 = vmatpush3.bf16.msra.mxu1 %v8645_v47 }
0x4313   :  { %7635 = vmatprep.subr.bf16.mxu1 %v7915_v2 }
0x43d8   :  { %v4815_v32 = vpop.f32.mrb[52].mxu1 }
0x43d9   :  { %v7069_v33 = vpop.f32.mrb[53].mxu1  ;;  %7090 = vmatmul.mubr.msk.f32.vlgmr.msra.gmra.mrb[56].mxu1 %vm106_vm0, %v4815_v32 }
0x43da   :  { %7638 = vmatpush3.bf16.xpose.msk.msra.mxu1 %vm8540_vm2, %v8544_v42  ;;  %7119 = vmatprep.mubr.msk.f32.mxu1 %vm7916_vm1, %v7917_v4  ;;  %v5522_v33 = vld [vmem:[%s9373_s28 + $0x8] sm:$0xff] }
0x43db   :  { %7639 = vmatprep.subr.bf16.mxu1 %v7915_v2 }
0x43e0   :  { %v4885_v30 = vpop.f32.mrb[54].mxu1 }
0x43e1   :  { %v7080_v41 = vpop.f32.mrb[55].mxu1 }
0x43e2   :  { %7642 = vmatpush3.bf16.xpose.msk.msra.mxu1 %vm8540_vm2, %v8550_v45  ;;  %v5523_v41 = vld [vmem:[%s9373_s28 + $0x10] sm:$0xff] }
0x43e3   :  { %7643 = vmatprep.subr.bf16.mxu1 %v7915_v2 }
0x43ea   :  { %7646 = vmatpush3.bf16.xpose.msk.msra.mxu1 %vm8540_vm2, %v8556_v48 }
0x43eb   :  { %7647 = vmatprep.subr.bf16.mxu1 %v7915_v2 }
0x43f2   :  { %7650 = vmatpush3.bf16.xpose.msk.msra.mxu1 %vm8540_vm2, %v8568_v54 }
0x44ac   :  { %v4958_v42 = vpop.f32.mrb[56].mxu1 }
0x44ad   :  { %v4959_v43 = vadd.f32 %v4958_v42, %v4885_v30  ;;  %v7091_v46 = vpop.f32.mrb[57].mxu1  ;;  %v5524_v42 = vld [vmem:[%s9373_s28 + $0x18] sm:$0xff] }
0x44ae   :  { %v5526_v46 = vld [vmem:[%s9373_s28 + $0x28] sm:$0xff] }
0x44af   :  { %v4962_v45 = vadd.f32 %v9130_v49, %v4959_v43  ;;  %v5525_v43 = vld [vmem:[%s9373_s28 + $0x20] sm:$0xff] }
0x44b1   :  { %7864 = vtanh.f32 %v4962_v45 }
0x44bb   :  { %v7865_v31 = vpop.eup %7864 }
0x44bc   :  { %5953 = vst.msk [vmem:[%s9373_s28 + $0x30] sm:$0xff] %vm106_vm0, %v7865_v31  ;;  %7101 = vmatmul.mubr.msk.f32.vlgmr.msra.gmra.mrb[68].mxu0 %vm106_vm0, %v7865_v31 }
0x44bd   :  { %7653 = vmatpush3.bf16.msra.mxu0 %v8498_v8  ;;  %7138 = vmatprep.mubr.msk.f32.mxu0 %vm7916_vm1, %v7917_v4  ;;  %v2066_v8 = vadd.f32 %v9068_v63, %v8615_v20  ;;  %v7675_v63 = vpack.c.bf16 %v5382_v62, %v5381_v11 }
0x44be   :  { %7654 = vmatprep.subr.bf16.mxu0 %v7915_v2 }
0x44bf   :  { %7676 = vmatprep.subr.bf16.mxu1 %v7675_v63 }
0x44c1   :  { %7656 = vmatpush3.bf16.msra.mxu0 %v8508_v16 }
0x44c2   :  { %7657 = vmatprep.subr.bf16.mxu0 %v7915_v2 }
0x44c3   :  { %v5527_v51 = vld [vmem:[%s9373_s28 + $0x30] sm:$0xff] }
0x44c5   :  { %7659 = vmatpush3.bf16.msra.mxu0 %v8512_v25 }
0x44c6   :  { %7660 = vmatprep.subr.bf16.mxu0 %v7915_v2 }
0x44c9   :  { %7662 = vmatpush3.bf16.msra.mxu0 %v8516_v27 }
0x44ca   :  { %7663 = vmatprep.subr.bf16.mxu0 %v7915_v2 }
0x458f   :  { %v5037_v22 = vpop.f32.mrb[68].mxu0 }
0x4590   :  { %v5041_v48 = vadd.f32 %v5037_v22, %v2066_v8  ;;  %v7102_v54 = vpop.f32.mrb[69].mxu0 }
0x4592   :  { %7866 = vtanh.f32 %v5041_v48  ;;  %v5955_v16 = vmul.f32 -1.442695, %v5041_v48 }
0x4594   :  { %7868 = vpow2.f32 %v5955_v16  ;;  %v9260_v16 = vld [vmem:[%s9377_s24] ss:$0 sm:$0xff] }
0x459c   :  { %v7867_v52 = vpop.eup %7866 }
0x459d   :  { %5051 = vrot.lane.b32.xlu0 %v7867_v52, %s7919_s4 }
0x459e   :  { %v7869_v53 = vpop.eup %7868 }
0x459f   :  { %v5045_v25 = vadd.f32 1.0, %v7869_v53 }
0x45a1   :  { %7870 = vrcp.f32 %v5045_v25 }
0x45ab   :  { %v7871_v55 = vpop.eup %7870 }
0x45ac   :  { %v5049_v58 = vmul.f32 %v7871_v55, %v9075_v12  ;;  %v5379_v12 = vld [vmem:[%s9375_s22 + $0x30] sm:$0xff] }
0x460f   :  { %v5052_v56 = vpop.permute.xlu0 %5051 }
0x4610   :  { %v5054_v27 = vmul.f32 %v7871_v55, %v5052_v56 }
0x4612   :  { %5056 = vrot.lane.b32.xlu1 %v5054_v27, %s7920_s10  ;;  %v9267_v27 = vstv %s9378_s25 }
0x4684   :  { %v5057_v20 = vpop.permute.xlu1 %5056 }
0x4685   :  { %v5059_v59 = vadd.f32 %v5057_v20, %v5049_v58  ;;  %v9273_v20 = vld [vmem:[%s9379_s21] ss:$0 sm:$0xff] }
0x4687   :  { %7872 = vtanh.f32 %v5059_v59 }
0x4691   :  { %v7873_v50 = vpop.eup %7872 }
0x4692   :  { %5062 = vrot.lane.b32.xlu1 %v7873_v50, %s7919_s4 }
0x4704   :  { %v5063_v26 = vpop.permute.xlu1 %5062 }
0x4705   :  { %v5065_v0 = vmul.f32 %v7871_v55, %v5063_v26 }
0x4707   :  { %5067 = vrot.lane.b32.xlu0 %v5065_v0, %s7920_s10 }
0x4779   :  { %v5068_v14 = vpop.permute.xlu0 %5067 }
0x477a   :  { %7120 = vmatmul.mubr.msk.f32.vlgmr.msra.gmra.mrb[58].mxu1 %vm106_vm0, %v5068_v14 }
0x477b   :  { %7678 = vmatpush3.bf16.msra.mxu1 %v7675_v63  ;;  %7171 = vmatprep.mubr.msk.f32.mxu1 %vm106_vm0, %v5373_v9 }
0x477c   :  { %7680 = vmatprep.subr.bf16.mxu1 %v7679_v3 }
0x477f   :  { %7682 = vmatpush3.bf16.msra.mxu1 %v7679_v3 }
0x4782   :  { %7172 = vmatmul.mubr.msk.f32.vlgmr.msra.gmra.mrb[60].mxu1 %vm106_vm0, %v5374_v7 }
0x4783   :  { %7174 = vmatprep.mubr.msk.f32.mxu1 %vm106_vm0, %v5375_v21 }
0x4786   :  { %7175 = vmatmul.mubr.msk.f32.gmra.mrb[62].mxu1 %vm106_vm0, %v5376_v13 }
0x4787   :  { %7177 = vmatprep.mubr.msk.f32.mxu1 %vm106_vm0, %v5377_v5 }
0x478a   :  { %7178 = vmatmul.mubr.msk.f32.gmra.mrb[64].mxu1 %vm106_vm0, %v5378_v17 }
0x478b   :  { %7180 = vmatprep.mubr.msk.f32.mxu1 %vm106_vm0, %v5379_v12 }
0x478e   :  { %7181 = vmatmul.mubr.msk.f32.gmra.mrb[66].mxu1 %vm106_vm0, %v5380_v40 }
0x478f   :  { %7200 = vmatprep.mubr.msk.f32.mxu1 %vm106_vm0, %v5527_v51 }
0x484d   :  { %v5137_v37 = vpop.f32.mrb[58].mxu1 }
0x484e   :  { %v5138_v57 = vadd.f32 %v9090_v23, %v5137_v37  ;;  %v7121_v24 = vpop.f32.mrb[59].mxu1 }
0x4850   :  { %v5141_v28 = vsel %vm2293_vm3, %v5138_v57, -inf }
0x4851   :  { %5142 = vmax.xlane.f32.xlu1 %v5141_v28 }
0x4855   :  { %v7173_v45 = vpop.f32.mrb[60].mxu1 }
0x4856   :  { %v5482_v31 = vpop.f32.mrb[61].mxu1  ;;  %v5488_v56 = vadd.f32 %v7173_v45, %v9260_v16 }
0x4857   :  { %v5483_v58 = vadd.f32 %v9260_v16, %v5482_v31 }
0x4858   :  { %v5671_v59 = vmul.f32 %v9267_v27, %v5488_v56 }
0x4859   :  { %v7176_v8 = vpop.f32.mrb[62].mxu1 }
0x485a   :  { %v5492_v22 = vpop.f32.mrb[63].mxu1  ;;  %v5498_v11 = vadd.f32 %v7176_v8, %v9260_v16 }
0x485b   :  { %v5493_v63 = vadd.f32 %v9260_v16, %v5492_v22 }
0x485c   :  { %v5673_v1 = vmul.f32 %v9267_v27, %v5498_v11 }
0x485d   :  { %v7179_v48 = vpop.f32.mrb[64].mxu1 }
0x485e   :  { %v5502_v54 = vpop.f32.mrb[65].mxu1  ;;  %v5508_v3 = vadd.f32 %v7179_v48, %v9260_v16 }
0x485f   :  { %v5503_v21 = vadd.f32 %v9260_v16, %v5502_v54 }
0x4860   :  { %v5675_v51 = vmul.f32 %v9267_v27, %v5508_v3 }
0x48de   :  { %v5143_v29 = vpop.xlane.xlu1 %5142 }
0x48df   :  { %v5144_v6 = vsub.f32 %v5138_v57, %v5143_v29  ;;  %v5674_v57 = vmul.f32 %v9267_v27, %v5503_v21 }
0x48e1   :  { %v5145_v18 = vmul.f32 1.442695, %v5144_v6 }
0x48e3   :  { %7874 = vpow2.f32 %v5145_v18 }
0x48ed   :  { %v7875_v15 = vpop.eup %7874 }
0x48ee   :  { %v5147_v35 = vsel %vm2293_vm3, %v7875_v15, 0.0 }
0x48ef   :  { %5148 = vadd.xlane.f32.xlu0 %v5147_v35 }
0x497c   :  { %v5149_v34 = vpop.xlane.xlu0 %5148 }
0x497d   :  { %7876 = vrcp.f32 %v5149_v34  ;;  %v7182_v34 = vpop.f32.mrb[66].mxu1 }
0x4987   :  { %v7877_v10 = vpop.eup %7876 }
0x4988   :  { %v5151_v36 = vmul.f32 %v7877_v10, %v7875_v15  ;;  %v5512_v10 = vpop.f32.mrb[67].mxu1 }
0x498a   :  { %7139 = vmatmul.mubr.msk.f32.vlgmr.msra.gmra.mrb[70].mxu0 %vm2293_vm3, %v5151_v36 }
0x498b   :  { %7665 = vmatpush3.bf16.msra.mxu0 %v8656_v38  ;;  %7149 = vmatprep.mubr.msk.f32.mxu0 %vm7916_vm1, %v7917_v4  ;;  %v5529_v38 = vld [vmem:[%s9376_s20] sm:$0xff] }
0x498c   :  { %7666 = vmatprep.subr.bf16.mxu0 %v7915_v2 }
0x498f   :  { %7668 = vmatpush3.bf16.msra.mxu0 %v8666_v60  ;;  %v5530_v60 = vld [vmem:[%s9376_s20 + $0x8] sm:$0xff] }
0x4990   :  { %7669 = vmatprep.subr.bf16.mxu0 %v7915_v2  ;;  %v7683_v23 = vpack.c.bf16 %v5530_v60, %v5529_v38 }
0x4992   :  { %7150 = vmatmul.mubr.msk.f32.vlgmr.msra.gmra.mrb[72].mxu0 %vm106_vm0, %v5068_v14  ;;  %7691 = vmatprep.subr.bf16.mxu1 %v7683_v23  ;;  %v5672_v14 = vmul.f32 %v9267_v27, %v5493_v63 }
0x4993   :  { %7671 = vmatpush3.bf16.msra.mxu0 %v8639_v44  ;;  %7160 = vmatprep.mubr.msk.f32.mxu0 %vm7916_vm1, %v7917_v4  ;;  %v5531_v44 = vld [vmem:[%s9376_s20 + $0x10] sm:$0xff] }
0x4994   :  { %7672 = vmatprep.subr.bf16.mxu0 %v7915_v2  ;;  %v5532_v2 = vld [vmem:[%s9376_s20 + $0x18] sm:$0xff]  ;;  %7693 = vmatpush3.bf16.msra.mxu1 %v7683_v23 }
0x4995   :  { %v7687_v4 = vpack.c.bf16 %v5532_v2, %v5531_v44 }
0x4997   :  { %7674 = vmatpush3.bf16.msra.mxu0 %v8645_v47  ;;  %7692 = vmatprep.subr.bf16.mxu1 %v7687_v4 }
0x4998   :  { %7684 = vmatprep.subr.bf16.mxu0 %v7683_v23  ;;  %7694 = vmatpush3.bf16.msra.mxu1 %v7687_v4 }
0x4a5d   :  { %v5221_v47 = vpop.f32.mrb[70].mxu0 }
0x4a5e   :  { %v7140_v39 = vpop.f32.mrb[71].mxu0  ;;  %7161 = vmatmul.mubr.msk.f32.vlgmr.msra.gmra.mrb[74].mxu0 %vm106_vm0, %v5221_v47 }
0x4a5f   :  { %7686 = vmatpush3.bf16.msra.mxu0 %v7683_v23  ;;  %7191 = vmatprep.mubr.msk.f32.mxu0 %vm106_vm0, %v5521_v19 }
0x4a60   :  { %7688 = vmatprep.subr.bf16.mxu0 %v7687_v4 }
0x4a63   :  { %7690 = vmatpush3.bf16.msra.mxu0 %v7687_v4 }
0x4a65   :  { %v5291_v32 = vpop.f32.mrb[72].mxu0 }
0x4a66   :  { %v7151_v30 = vpop.f32.mrb[73].mxu0  ;;  %7192 = vmatmul.mubr.msk.f32.vlgmr.msra.gmra.mrb[76].mxu0 %vm106_vm0, %v5522_v33 }
0x4a67   :  { %7194 = vmatprep.mubr.msk.f32.mxu0 %vm106_vm0, %v5523_v41  ;;  %v5518_v30 = vadd.f32 %v7182_v34, %v9260_v16 }
0x4a69   :  { %v5677_v8 = vmul.f32 %v9267_v27, %v5518_v30 }
0x4a6a   :  { %7195 = vmatmul.mubr.msk.f32.gmra.mrb[78].mxu0 %vm106_vm0, %v5524_v42 }
0x4a6b   :  { %7197 = vmatprep.mubr.msk.f32.mxu0 %vm106_vm0, %v5525_v43  ;;  %v5513_v43 = vadd.f32 %v9260_v16, %v5512_v10 }
0x4a6e   :  { %7198 = vmatmul.mubr.msk.f32.gmra.mrb[80].mxu0 %vm106_vm0, %v5526_v46 }
0x4b31   :  { %v5364_v52 = vpop.f32.mrb[74].mxu0 }
0x4b32   :  { %v5365_v53 = vadd.f32 %v5364_v52, %v5291_v32  ;;  %v7162_v25 = vpop.f32.mrb[75].mxu0  ;;  %v5676_v52 = vmul.f32 %v9267_v27, %v5513_v43 }
0x4b34   :  { %v5368_v55 = vadd.f32 %v9130_v49, %v5365_v53  ;;  %v5670_v49 = vmul.f32 %v9267_v27, %v5483_v58 }
0x4b36   :  { %7878 = vtanh.f32 %v5368_v55 }
0x4b39   :  { %v7193_v62 = vpop.f32.mrb[76].mxu0 }
0x4b3a   :  { %v5636_v50 = vadd.f32 %v7193_v62, %v9273_v20  ;;  %v5630_v26 = vpop.f32.mrb[77].mxu0 }
0x4b3b   :  { %v5631_v0 = vadd.f32 %v9273_v20, %v5630_v26 }
0x4b3c   :  { %v5679_v61 = vadd.f32 %v5671_v59, %v5636_v50 }
0x4b3d   :  { %v5678_v9 = vadd.f32 %v5670_v49, %v5631_v0  ;;  %v7196_v7 = vpop.f32.mrb[78].mxu0 }
0x4b3e   :  { %5687 = vst [vmem:[%s9380_s26 + $0x8] sm:$0xff] %v5679_v61  ;;  %v5646_v13 = vadd.f32 %v7196_v7, %v9273_v20  ;;  %v5640_v5 = vpop.f32.mrb[79].mxu0  ;;  %5696 = vmax.xlane.f32.xlu1 %v5679_v61 }
0x4b3f   :  { %5686 = vst [vmem:[%s9380_s26] sm:$0xff] %v5678_v9  ;;  %v5641_v17 = vadd.f32 %v9273_v20, %v5640_v5  ;;  %5694 = vmax.xlane.f32.xlu0 %v5678_v9 }
0x4b40   :  { %v7879_v12 = vpop.eup %7878  ;;  %v5681_v40 = vadd.f32 %v5673_v1, %v5646_v13 }
0x4b41   :  { %5968 = vst.msk [vmem:[%s9373_s28 + $0x38] sm:$0xff] %vm106_vm0, %v7879_v12  ;;  %v5680_v37 = vadd.f32 %v5672_v14, %v5641_v17  ;;  %v7199_v24 = vpop.f32.mrb[80].mxu0 }
0x4b42   :  { %5689 = vst [vmem:[%s9380_s26 + $0x18] sm:$0xff] %v5681_v40  ;;  %v5656_v28 = vadd.f32 %v7199_v24, %v9273_v20  ;;  %v5650_v29 = vpop.f32.mrb[81].mxu0  ;;  %5700 = vmax.xlane.f32.xlu1 %v5681_v40 }
0x4b43   :  { %5688 = vst [vmem:[%s9380_s26 + $0x10] sm:$0xff] %v5680_v37  ;;  %v5651_v6 = vadd.f32 %v9273_v20, %v5650_v29  ;;  %5698 = vmax.xlane.f32.xlu0 %v5680_v37 }
0x4b44   :  { %v5683_v18 = vadd.f32 %v5675_v51, %v5656_v28 }
0x4b45   :  { %v5682_v15 = vadd.f32 %v5674_v57, %v5651_v6 }
0x4b46   :  { %5691 = vst [vmem:[%s9380_s26 + $0x28] sm:$0xff] %v5683_v18  ;;  %5704 = vmax.xlane.f32.xlu1 %v5683_v18 }
0x4b47   :  { %5690 = vst [vmem:[%s9380_s26 + $0x20] sm:$0xff] %v5682_v15  ;;  %5702 = vmax.xlane.f32.xlu0 %v5682_v15 }
0x4b48   :  { %v5528_v35 = vld [vmem:[%s9373_s28 + $0x38] sm:$0xff] }
0x4b49   :  { %7201 = vmatmul.mubr.msk.f32.vlgmr.msra.gmra.mrb[68].mxu1 %vm106_vm0, %v5528_v35 }
0x4bcb   :  { %v5697_v36 = vpop.xlane.xlu1 %5696 }
0x4bcc   :  { %v5695_v38 = vpop.xlane.xlu0 %5694  ;;  %v5711_v23 = vsub.f32 %v5679_v61, %v5697_v36 }
0x4bcd   :  { %v5710_v2 = vsub.f32 %v5678_v9, %v5695_v38 }
0x4bce   :  { %v5720_v4 = vmul.f32 1.442695, %v5711_v23 }
0x4bcf   :  { %v5701_v60 = vpop.xlane.xlu1 %5700  ;;  %v5718_v39 = vmul.f32 1.442695, %v5710_v2 }
0x4bd0   :  { %v5699_v44 = vpop.xlane.xlu0 %5698  ;;  %v5713_v47 = vsub.f32 %v5681_v40, %v5701_v60  ;;  %7880 = vpow2.f32 %v5720_v4 }
0x4bd1   :  { %v5712_v19 = vsub.f32 %v5680_v37, %v5699_v44  ;;  %7882 = vpow2.f32 %v5718_v39 }
0x4bd2   :  { %v5724_v41 = vmul.f32 1.442695, %v5713_v47 }
0x4bd3   :  { %v5705_v32 = vpop.xlane.xlu1 %5704  ;;  %v5722_v46 = vmul.f32 1.442695, %v5712_v19 }
0x4bd4   :  { %v5703_v33 = vpop.xlane.xlu0 %5702  ;;  %v5715_v42 = vsub.f32 %v5683_v18, %v5705_v32  ;;  %7884 = vpow2.f32 %v5724_v41 }
0x4bd5   :  { %v5714_v45 = vsub.f32 %v5682_v15, %v5703_v33  ;;  %7886 = vpow2.f32 %v5722_v46 }
0x4bd6   :  { %v5728_v54 = vmul.f32 1.442695, %v5715_v42 }
0x4bd7   :  { %v5726_v25 = vmul.f32 1.442695, %v5714_v45 }
0x4bd8   :  { %7888 = vpow2.f32 %v5728_v54 }
0x4bd9   :  { %7890 = vpow2.f32 %v5726_v25 }
0x4bda   :  { %v7881_v16 = vpop.eup %7880 }
0x4bdb   :  { %v7883_v27 = vpop.eup %7882 }
0x4bde   :  { %v7885_v58 = vpop.eup %7884 }
0x4c1c   :  { %v7202_v31 = vpop.f32.mrb[68].mxu1 }
0x4c1d   :  { %v5666_v22 = vadd.f32 %v7202_v31, %v9273_v20  ;;  %v5660_v48 = vpop.f32.mrb[69].mxu1 }
0x4c1e   :  { %v5661_v53 = vadd.f32 %v9273_v20, %v5660_v48  ;;  %v7887_v20 = vpop.eup %7886 }
0x4c1f   :  { %v5685_v55 = vadd.f32 %v5677_v8, %v5666_v22  ;;  %v7889_v59 = vpop.eup %7888 }
0x4c20   :  { %v5684_v56 = vadd.f32 %v5676_v52, %v5661_v53  ;;  %v7891_v11 = vpop.eup %7890 }
0x4c21   :  { %5693 = vst [vmem:[%s9380_s26 + $0x38] sm:$0xff] %v5685_v55  ;;  %5708 = vmax.xlane.f32.xlu1 %v5685_v55 }
0x4c22   :  { %5692 = vst [vmem:[%s9380_s26 + $0x30] sm:$0xff] %v5684_v56  ;;  %5706 = vmax.xlane.f32.xlu0 %v5684_v56 }
0x4c25   :  { %5736 = vadd.xlane.f32.xlu1 %v7881_v16 }
0x4c26   :  { %5734 = vadd.xlane.f32.xlu0 %v7883_v27 }
0x4c29   :  { %5740 = vadd.xlane.f32.xlu1 %v7885_v58 }
0x4c2a   :  { %5738 = vadd.xlane.f32.xlu0 %v7887_v20 }
0x4c2d   :  { %5744 = vadd.xlane.f32.xlu1 %v7889_v59 }
0x4c2e   :  { %5742 = vadd.xlane.f32.xlu0 %v7891_v11 }
0x4cae   :  { %v5709_v49 = vpop.xlane.xlu1 %5708 }
0x4caf   :  { %v5717_v62 = vsub.f32 %v5685_v55, %v5709_v49  ;;  %v5707_v63 = vpop.xlane.xlu0 %5706 }
0x4cb0   :  { %v5716_v50 = vsub.f32 %v5684_v56, %v5707_v63 }
0x4cb1   :  { %v5732_v26 = vmul.f32 1.442695, %v5717_v62 }
0x4cb2   :  { %v5730_v0 = vmul.f32 1.442695, %v5716_v50  ;;  %v5737_v61 = vpop.xlane.xlu1 %5736 }
0x4cb3   :  { %7892 = vpow2.f32 %v5732_v26  ;;  %v5735_v1 = vpop.xlane.xlu0 %5734 }
0x4cb4   :  { %7894 = vpow2.f32 %v5730_v0 }
0x4cb5   :  { %7896 = vrcp.f32 %v5737_v61 }
0x4cb6   :  { %7898 = vrcp.f32 %v5735_v1  ;;  %v5741_v3 = vpop.xlane.xlu1 %5740 }
0x4cb7   :  { %7900 = vrcp.f32 %v5741_v3  ;;  %v5739_v9 = vpop.xlane.xlu0 %5738 }
0x4cb8   :  { %7902 = vrcp.f32 %v5739_v9 }
0x4cba   :  { %v5745_v14 = vpop.xlane.xlu1 %5744 }
0x4cbb   :  { %7904 = vrcp.f32 %v5745_v14  ;;  %v5743_v7 = vpop.xlane.xlu0 %5742 }
0x4cbc   :  { %7906 = vrcp.f32 %v5743_v7 }
0x4cbd   :  { %v7893_v21 = vpop.eup %7892 }
0x4cbe   :  { %v7895_v13 = vpop.eup %7894  ;;  %5748 = vadd.xlane.f32.xlu1 %v7893_v21 }
0x4cbf   :  { %v7897_v5 = vpop.eup %7896  ;;  %5746 = vadd.xlane.f32.xlu0 %v7895_v13 }
0x4cc0   :  { %v7899_v17 = vpop.eup %7898  ;;  %v5753_v12 = vmul.f32 %v7897_v5, %v7881_v16 }
0x4cc1   :  { %v7901_v40 = vpop.eup %7900  ;;  %v5751_v51 = vmul.f32 %v7899_v17, %v7883_v27 }
0x4cc2   :  { %v7903_v37 = vpop.eup %7902  ;;  %5767 = vst [vmem:[%s9381_s27 + $0x8] sm:$0xff] %v5753_v12  ;;  %v5757_v57 = vmul.f32 %v7901_v40, %v7885_v58 }
0x4cc3   :  { %5766 = vst [vmem:[%s9381_s27] sm:$0xff] %v5751_v51  ;;  %v5755_v24 = vmul.f32 %v7903_v37, %v7887_v20 }
0x4cc4   :  { %5769 = vst [vmem:[%s9381_s27 + $0x18] sm:$0xff] %v5757_v57 }
0x4cc5   :  { %v7905_v28 = vpop.eup %7904  ;;  %5768 = vst [vmem:[%s9381_s27 + $0x10] sm:$0xff] %v5755_v24 }
0x4cc6   :  { %v7907_v29 = vpop.eup %7906  ;;  %v5761_v6 = vmul.f32 %v7905_v28, %v7889_v59 }
0x4cc7   :  { %v5759_v18 = vmul.f32 %v7907_v29, %v7891_v11 }
0x4cc8   :  { %5771 = vst [vmem:[%s9381_s27 + $0x28] sm:$0xff] %v5761_v6 }
0x4cc9   :  { %5770 = vst [vmem:[%s9381_s27 + $0x20] sm:$0xff] %v5759_v18 }
0x4d4b   :  { %v5749_v15 = vpop.xlane.xlu1 %5748 }
0x4d4c   :  { %7908 = vrcp.f32 %v5749_v15  ;;  %v5747_v35 = vpop.xlane.xlu0 %5746 }
0x4d4d   :  { %7910 = vrcp.f32 %v5747_v35 }
0x4d56   :  { %v7909_v34 = vpop.eup %7908 }
0x4d57   :  { %v7911_v10 = vpop.eup %7910  ;;  %v5765_v36 = vmul.f32 %v7909_v34, %v7893_v21 }
0x4d58   :  { %v5763_v38 = vmul.f32 %v7911_v10, %v7895_v13 }
0x4d59   :  { %5773 = vst [vmem:[%s9381_s27 + $0x38] sm:$0xff] %v5765_v36 }
0x4d5a   :  { %5772 = vst [vmem:[%s9381_s27 + $0x30] sm:$0xff] %v5763_v38 }

</bundles_post_ra>
